<compile_context>
chip_gen: v7x
topology: tpu7x:2x2x1
jax: 0.10.0
libtpu: 0.0.40
codegen_flags: <defaults>
</compile_context>

<pallas_src>
import functools

import numpy as np
import jax
import jax.numpy as jnp
from jax import lax
from jax.experimental import pallas as pl
from jax.experimental.pallas import tpu as pltpu


# ------------------------------ fused kernel --------------------------------

def _net_kernel(x_ref, w1e_ref, w1o_ref, b1_ref, w2e_ref, w2o_ref, b2_ref,
                wf1_ref, bf1_ref, wf2_ref, bf2_ref, wf3_ref, bf3_ref,
                o_ref, *, bn):
    f32, bf16 = jnp.float32, jnp.bfloat16

    def banded_conv(inp, we_ref, wo_ref, oh):
        """Strided-output conv: sum over 5 kernel rows of (M,K)x(K,N) dots.

        inp: (bn, H, K) bf16; we/wo produce the even/odd conv columns.
        Returns max(even, odd) -> W-pooled rows (bn*oh, N) f32.
        """
        k = inp.shape[2]
        acc_e = None
        acc_o = None
        for dy in range(5):
            lhs = inp[:, dy:dy + oh, :].reshape(bn * oh, k)
            te = jnp.dot(lhs, we_ref[dy], preferred_element_type=f32)
            to = jnp.dot(lhs, wo_ref[dy], preferred_element_type=f32)
            acc_e = te if acc_e is None else acc_e + te
            acc_o = to if acc_o is None else acc_o + to
        return jnp.maximum(acc_e, acc_o)

    # ---- conv1 + pool (bias/ReLU commute with max-pool, applied once) ----
    xb = x_ref[...].astype(bf16)                       # (bn, 32, 96)  96 = w*3+c
    m1 = banded_conv(xb, w1e_ref, w1o_ref, 28)         # (bn*28, 84)  W-pooled
    m1 = jnp.max(m1.reshape(bn * 14, 2, 84), axis=1)   # H-pool -> (bn*14, 84)
    a1 = jnp.maximum(m1 + b1_ref[...], 0.0)            # bias + ReLU
    a1 = a1.astype(bf16).reshape(bn, 14, 84)           # 84 = ow2*6 + c

    # ---- conv2 + pool ----
    m2 = banded_conv(a1, w2e_ref, w2o_ref, 10)         # (bn*10, 80)
    m2 = jnp.max(m2.reshape(bn * 5, 2, 80), axis=1)    # (bn*5, 80)
    a2 = jnp.maximum(m2 + b2_ref[...], 0.0)
    a2 = a2.astype(bf16).reshape(bn, 5, 80)            # 80 = ow4*16 + c

    # ---- fc1: NCHW flatten folded into wf1 (5, 80, 120); 5 dense dots ----
    z1 = None
    for h in range(5):
        lhs = a2[:, h:h + 1, :].reshape(bn, 80)
        t = jnp.dot(lhs, wf1_ref[h], preferred_element_type=f32)
        z1 = t if z1 is None else z1 + t
    z1 = jnp.maximum(z1 + bf1_ref[...], 0.0)           # (bn, 120)

    z2 = jnp.dot(z1.astype(bf16), wf2_ref[...], preferred_element_type=f32)
    z2 = jnp.maximum(z2 + bf2_ref[...], 0.0)           # (bn, 84)

    z3 = jnp.dot(z2.astype(bf16), wf3_ref[...], preferred_element_type=f32)
    o_ref[...] = z3 + bf3_ref[...]                     # (bn, 10)


# ------------------------------- host wrapper --------------------------------

def net_forward(x_nchw, p, *, block_batch=64):
    n = x_nchw.shape[0]
    # NCHW -> NHWC -> fuse (W, C) on the lane axis: (n, 32, 96).
    x = jnp.transpose(x_nchw, (0, 2, 3, 1)).astype(jnp.float32).reshape(n, 32, 96)

    if n <= block_batch:
        bn, n_pad = n, n
    else:
        bn = max(8, (block_batch // 8) * 8)            # (8,128) rule for out block
        n_pad = ((n + bn - 1) // bn) * bn
        if n_pad != n:
            x = jnp.pad(x, ((0, n_pad - n), (0, 0), (0, 0)))
    grid = (n_pad // bn,)

    const = lambda i: (0, 0)
    const3 = lambda i: (0, 0, 0)
    out = pl.pallas_call(
        functools.partial(_net_kernel, bn=bn),
        out_shape=jax.ShapeDtypeStruct((n_pad, 10), jnp.float32),
        grid=grid,
        in_specs=[
            pl.BlockSpec((bn, 32, 96), lambda i: (i, 0, 0)),
            pl.BlockSpec((5, 96, 84), const3),    # w1 even columns
            pl.BlockSpec((5, 96, 84), const3),    # w1 odd columns
            pl.BlockSpec((1, 84), const),         # b1 (tiled over ow2)
            pl.BlockSpec((5, 84, 80), const3),    # w2 even
            pl.BlockSpec((5, 84, 80), const3),    # w2 odd
            pl.BlockSpec((1, 80), const),         # b2 (tiled over ow4)
            pl.BlockSpec((5, 80, 120), const3),   # fc1 (NCHW flatten folded in)
            pl.BlockSpec((1, 120), const),
            pl.BlockSpec((120, 84), const),       # fc2
            pl.BlockSpec((1, 84), const),
            pl.BlockSpec((84, 10), const),        # fc3
            pl.BlockSpec((1, 10), const),
        ],
        out_specs=pl.BlockSpec((bn, 10), lambda i: (i, 0)),
        compiler_params=pltpu.CompilerParams(
            dimension_semantics=("parallel",)),
    )(x, p["w1e"], p["w1o"], p["b1"], p["w2e"], p["w2o"], p["b2"],
      p["wf1"], p["bf1"], p["wf2"], p["bf2"], p["wf3"], p["bf3"])
    return out[:n]


# ------------------------------- parameters ----------------------------------

def _band_conv(w_oihw, in_w, out_w, off):
    """Block-banded stride-2-output conv weight: (5, in_w*ci, out_w*co).

    band[dy][w*ci + c_in, ow*co + c_out] = w[c_out, c_in, dy, w - (2*ow+off)]
    if 0 <= w - (2*ow+off) < 5 else 0.  Produces only the even (off=0) or odd
    (off=1) conv output columns, so max(even, odd) is the W-direction pool.
    """
    co_n, ci_n, kh, kw = w_oihw.shape
    wt = np.transpose(np.asarray(w_oihw, np.float32), (2, 3, 1, 0))  # (kh,kw,ci,co)
    band = np.zeros((kh, in_w, ci_n, out_w, co_n), np.float32)
    for dy in range(kh):
        for ow in range(out_w):
            w0 = 2 * ow + off
            band[dy, w0:w0 + kw, :, ow, :] = wt[dy]
    return band.reshape(kh, in_w * ci_n, out_w * co_n)


def init_params(key):
    """PyTorch-default U(-1/sqrt(fan_in), +) init.

    Returns (kernel_params, torch_params): kernel_params hold the bf16,
    kernel-layout (banded / pre-permuted) weights; torch_params hold the
    original f32 torch-layout tensors used only by the pure-JAX reference.
    """
    def u(k, shape, fan_in):
        bound = 1.0 / np.sqrt(np.float32(fan_in))
        return jax.random.uniform(k, shape, jnp.float32, -bound, bound)

    ks = jax.random.split(key, 10)
    t = {
        "conv1_w": u(ks[0], (6, 3, 5, 5), 3 * 25),
        "conv1_b": u(ks[1], (6,), 3 * 25),
        "conv2_w": u(ks[2], (16, 6, 5, 5), 6 * 25),
        "conv2_b": u(ks[3], (16,), 6 * 25),
        "fc1_w": u(ks[4], (120, 400), 400),
        "fc1_b": u(ks[5], (120,), 400),
        "fc2_w": u(ks[6], (84, 120), 120),
        "fc2_b": u(ks[7], (84,), 120),
        "fc3_w": u(ks[8], (10, 84), 84),
        "fc3_b": u(ks[9], (10,), 84),
    }
    bf = jnp.bfloat16
    f1 = np.asarray(t["fc1_w"], np.float32)
    # fc1 rows follow the torch NCHW flatten f = c*25 + h*5 + w; re-lay as
    # (h, w*16+c, out) to match the kernel's (ow4, c_out)-fused lane layout.
    wf1 = np.transpose(f1.reshape(120, 16, 5, 5), (2, 3, 1, 0)).reshape(5, 80, 120)
    p = {
        "w1e": jnp.asarray(_band_conv(t["conv1_w"], 32, 14, 0), bf),
        "w1o": jnp.asarray(_band_conv(t["conv1_w"], 32, 14, 1), bf),
        "b1": jnp.asarray(np.tile(np.asarray(t["conv1_b"], np.float32), 14),
                          jnp.float32).reshape(1, 84),
        "w2e": jnp.asarray(_band_conv(t["conv2_w"], 14, 5, 0), bf),
        "w2o": jnp.asarray(_band_conv(t["conv2_w"], 14, 5, 1), bf),
        "b2": jnp.asarray(np.tile(np.asarray(t["conv2_b"], np.float32), 5),
                          jnp.float32).reshape(1, 80),
        "wf1": jnp.asarray(wf1, bf),
        "bf1": t["fc1_b"].reshape(1, 120),
        "wf2": jnp.transpose(t["fc2_w"], (1, 0)).astype(bf),   # (120, 84)
        "bf2": t["fc2_b"].reshape(1, 84),
        "wf3": jnp.transpose(t["fc3_w"], (1, 0)).astype(bf),   # (84, 10)
        "bf3": t["fc3_b"].reshape(1, 10),
    }
    return p, t


# ------------------------- pure-JAX reference check --------------------------

def _q(v):
    """Mirror the kernel's bf16 rounding of MXU operands."""
    return v.astype(jnp.bfloat16).astype(jnp.float32)


def ref_forward(x_nchw, t):
    hp = lax.Precision.HIGHEST
    n = x_nchw.shape[0]
    x = jnp.transpose(x_nchw, (0, 2, 3, 1)).astype(jnp.float32)

    def conv_relu_pool(xin, w_oihw, b):
        y = lax.conv_general_dilated(
            _q(xin), _q(w_oihw), window_strides=(1, 1), padding="VALID",
            dimension_numbers=("NHWC", "OIHW", "NHWC"), precision=hp)
        y = jnp.maximum(y + b.reshape(1, 1, 1, -1), 0.0)
        nb, hh, ww, c = y.shape
        return y.reshape(nb, hh // 2, 2, ww // 2, 2, c).max(axis=(2, 4))

    y = conv_relu_pool(x, t["conv1_w"], t["conv1_b"])        # (n, 14, 14, 6)
    y = conv_relu_pool(y, t["conv2_w"], t["conv2_b"])        # (n, 5, 5, 16)
    y = jnp.transpose(y, (0, 3, 1, 2)).reshape(n, 400)       # NCHW flatten
    y = jnp.maximum(jnp.dot(_q(y), _q(t["fc1_w"]).T, precision=hp)
                    + t["fc1_b"], 0.0)
    y = jnp.maximum(jnp.dot(_q(y), _q(t["fc2_w"]).T, precision=hp)
                    + t["fc2_b"], 0.0)
    return jnp.dot(_q(y), _q(t["fc3_w"]).T, precision=hp) + t["fc3_b"]


# ----------------------------------- main ------------------------------------

if __name__ == "__main__":
    key = jax.random.PRNGKey(0)
    kx, kp = jax.random.split(key)
    # Input must be (N, 3, 32, 32) for the 16*5*5 flatten to hold.
    x = jax.random.normal(kx, (2, 3, 32, 32), jnp.float32)
    params, tparams = init_params(kp)

    out = jax.block_until_ready(jax.jit(net_forward)(x, params))

    ref = ref_forward(x, tparams)
    assert out.shape == (2, 10), out.shape
    max_err = float(jnp.max(jnp.abs(out - ref)))
    assert max_err < 2e-3, max_err
    print("KERNEL_OK")
</pallas_src>

<mosaic_0001>
module attributes {stable_mosaic.version = 11 : i64} {
  func.func @_net_kernel(%arg0: i32, %arg1: memref<2x32x96xf32, #tpu.memory_space<vmem>>, %arg2: memref<5x96x84xbf16, #tpu.memory_space<vmem>>, %arg3: memref<5x96x84xbf16, #tpu.memory_space<vmem>>, %arg4: memref<1x84xf32, #tpu.memory_space<vmem>>, %arg5: memref<5x84x80xbf16, #tpu.memory_space<vmem>>, %arg6: memref<5x84x80xbf16, #tpu.memory_space<vmem>>, %arg7: memref<1x80xf32, #tpu.memory_space<vmem>>, %arg8: memref<5x80x120xbf16, #tpu.memory_space<vmem>>, %arg9: memref<1x120xf32, #tpu.memory_space<vmem>>, %arg10: memref<120x84xbf16, #tpu.memory_space<vmem>>, %arg11: memref<1x84xf32, #tpu.memory_space<vmem>>, %arg12: memref<84x10xbf16, #tpu.memory_space<vmem>>, %arg13: memref<1x10xf32, #tpu.memory_space<vmem>>, %arg14: memref<2x10xf32, #tpu.memory_space<vmem>>) attributes {dimension_semantics = [#tpu.dimension_semantics<parallel>], iteration_bounds = array<i64: 1>, scalar_prefetch = 0 : i64, scratch_operands = 0 : i64, tpu.core_type = #tpu.core_type<tc>, window_params = [{transform_indices = @transform_0, window_bounds = array<i64: 2, 32, 96>}, {pipeline_mode = #tpu.pipeline_mode<synchronous>, transform_indices = @transform_1, window_bounds = array<i64: 5, 96, 84>}, {pipeline_mode = #tpu.pipeline_mode<synchronous>, transform_indices = @transform_2, window_bounds = array<i64: 5, 96, 84>}, {pipeline_mode = #tpu.pipeline_mode<synchronous>, transform_indices = @transform_3, window_bounds = array<i64: 1, 84>}, {pipeline_mode = #tpu.pipeline_mode<synchronous>, transform_indices = @transform_4, window_bounds = array<i64: 5, 84, 80>}, {pipeline_mode = #tpu.pipeline_mode<synchronous>, transform_indices = @transform_5, window_bounds = array<i64: 5, 84, 80>}, {pipeline_mode = #tpu.pipeline_mode<synchronous>, transform_indices = @transform_6, window_bounds = array<i64: 1, 80>}, {pipeline_mode = #tpu.pipeline_mode<synchronous>, transform_indices = @transform_7, window_bounds = array<i64: 5, 80, 120>}, {pipeline_mode = #tpu.pipeline_mode<synchronous>, transform_indices = @transform_8, window_bounds = array<i64: 1, 120>}, {pipeline_mode = #tpu.pipeline_mode<synchronous>, transform_indices = @transform_9, window_bounds = array<i64: 120, 84>}, {pipeline_mode = #tpu.pipeline_mode<synchronous>, transform_indices = @transform_10, window_bounds = array<i64: 1, 84>}, {pipeline_mode = #tpu.pipeline_mode<synchronous>, transform_indices = @transform_11, window_bounds = array<i64: 84, 10>}, {pipeline_mode = #tpu.pipeline_mode<synchronous>, transform_indices = @transform_12, window_bounds = array<i64: 1, 10>}, {transform_indices = @transform_13, window_bounds = array<i64: 2, 10>}]} {
    %c0 = arith.constant 0 : index
    %c0_0 = arith.constant 0 : index
    %c0_1 = arith.constant 0 : index
    %0 = vector.load %arg1[%c0, %c0_0, %c0_1] : memref<2x32x96xf32, #tpu.memory_space<vmem>>, vector<2x32x96xf32>
    %1 = arith.truncf %0 : vector<2x32x96xf32> to vector<2x32x96xbf16>
    %2 = vector.extract_strided_slice %1 {offsets = [0, 0, 0], sizes = [2, 28, 96], strides = [1, 1, 1]} : vector<2x32x96xbf16> to vector<2x28x96xbf16>
    %3 = vector.shape_cast %2 : vector<2x28x96xbf16> to vector<56x96xbf16>
    %c0_2 = arith.constant 0 : index
    %c0_3 = arith.constant 0 : index
    %c0_4 = arith.constant 0 : index
    %4 = vector.load %arg2[%c0_2, %c0_3, %c0_4] : memref<5x96x84xbf16, #tpu.memory_space<vmem>>, vector<1x96x84xbf16>
    %5 = vector.shape_cast %4 : vector<1x96x84xbf16> to vector<96x84xbf16>
    %cst = arith.constant dense<0.000000e+00> : vector<56x84xf32>
    %6 = tpu.matmul %3, %5, %cst {dimension_numbers = #tpu.dot_dimension_numbers<[1], [0], [0], [1], [0, 0, 1, 1], [], []>} : vector<56x96xbf16>, vector<96x84xbf16>, vector<56x84xf32> -> vector<56x84xf32>
    %c0_5 = arith.constant 0 : index
    %c0_6 = arith.constant 0 : index
    %c0_7 = arith.constant 0 : index
    %7 = vector.load %arg3[%c0_5, %c0_6, %c0_7] : memref<5x96x84xbf16, #tpu.memory_space<vmem>>, vector<1x96x84xbf16>
    %8 = vector.shape_cast %7 : vector<1x96x84xbf16> to vector<96x84xbf16>
    %cst_8 = arith.constant dense<0.000000e+00> : vector<56x84xf32>
    %9 = tpu.matmul %3, %8, %cst_8 {dimension_numbers = #tpu.dot_dimension_numbers<[1], [0], [0], [1], [0, 0, 1, 1], [], []>} : vector<56x96xbf16>, vector<96x84xbf16>, vector<56x84xf32> -> vector<56x84xf32>
    %10 = vector.extract_strided_slice %1 {offsets = [0, 1, 0], sizes = [2, 28, 96], strides = [1, 1, 1]} : vector<2x32x96xbf16> to vector<2x28x96xbf16>
    %11 = vector.shape_cast %10 : vector<2x28x96xbf16> to vector<56x96xbf16>
    %c1 = arith.constant 1 : index
    %c0_9 = arith.constant 0 : index
    %c0_10 = arith.constant 0 : index
    %12 = vector.load %arg2[%c1, %c0_9, %c0_10] : memref<5x96x84xbf16, #tpu.memory_space<vmem>>, vector<1x96x84xbf16>
    %13 = vector.shape_cast %12 : vector<1x96x84xbf16> to vector<96x84xbf16>
    %cst_11 = arith.constant dense<0.000000e+00> : vector<56x84xf32>
    %14 = tpu.matmul %11, %13, %cst_11 {dimension_numbers = #tpu.dot_dimension_numbers<[1], [0], [0], [1], [0, 0, 1, 1], [], []>} : vector<56x96xbf16>, vector<96x84xbf16>, vector<56x84xf32> -> vector<56x84xf32>
    %c1_12 = arith.constant 1 : index
    %c0_13 = arith.constant 0 : index
    %c0_14 = arith.constant 0 : index
    %15 = vector.load %arg3[%c1_12, %c0_13, %c0_14] : memref<5x96x84xbf16, #tpu.memory_space<vmem>>, vector<1x96x84xbf16>
    %16 = vector.shape_cast %15 : vector<1x96x84xbf16> to vector<96x84xbf16>
    %cst_15 = arith.constant dense<0.000000e+00> : vector<56x84xf32>
    %17 = tpu.matmul %11, %16, %cst_15 {dimension_numbers = #tpu.dot_dimension_numbers<[1], [0], [0], [1], [0, 0, 1, 1], [], []>} : vector<56x96xbf16>, vector<96x84xbf16>, vector<56x84xf32> -> vector<56x84xf32>
    %18 = arith.addf %6, %14 : vector<56x84xf32>
    %19 = arith.addf %9, %17 : vector<56x84xf32>
    %20 = vector.extract_strided_slice %1 {offsets = [0, 2, 0], sizes = [2, 28, 96], strides = [1, 1, 1]} : vector<2x32x96xbf16> to vector<2x28x96xbf16>
    %21 = vector.shape_cast %20 : vector<2x28x96xbf16> to vector<56x96xbf16>
    %c2 = arith.constant 2 : index
    %c0_16 = arith.constant 0 : index
    %c0_17 = arith.constant 0 : index
    %22 = vector.load %arg2[%c2, %c0_16, %c0_17] : memref<5x96x84xbf16, #tpu.memory_space<vmem>>, vector<1x96x84xbf16>
    %23 = vector.shape_cast %22 : vector<1x96x84xbf16> to vector<96x84xbf16>
    %cst_18 = arith.constant dense<0.000000e+00> : vector<56x84xf32>
    %24 = tpu.matmul %21, %23, %cst_18 {dimension_numbers = #tpu.dot_dimension_numbers<[1], [0], [0], [1], [0, 0, 1, 1], [], []>} : vector<56x96xbf16>, vector<96x84xbf16>, vector<56x84xf32> -> vector<56x84xf32>
    %c2_19 = arith.constant 2 : index
    %c0_20 = arith.constant 0 : index
    %c0_21 = arith.constant 0 : index
    %25 = vector.load %arg3[%c2_19, %c0_20, %c0_21] : memref<5x96x84xbf16, #tpu.memory_space<vmem>>, vector<1x96x84xbf16>
    %26 = vector.shape_cast %25 : vector<1x96x84xbf16> to vector<96x84xbf16>
    %cst_22 = arith.constant dense<0.000000e+00> : vector<56x84xf32>
    %27 = tpu.matmul %21, %26, %cst_22 {dimension_numbers = #tpu.dot_dimension_numbers<[1], [0], [0], [1], [0, 0, 1, 1], [], []>} : vector<56x96xbf16>, vector<96x84xbf16>, vector<56x84xf32> -> vector<56x84xf32>
    %28 = arith.addf %18, %24 : vector<56x84xf32>
    %29 = arith.addf %19, %27 : vector<56x84xf32>
    %30 = vector.extract_strided_slice %1 {offsets = [0, 3, 0], sizes = [2, 28, 96], strides = [1, 1, 1]} : vector<2x32x96xbf16> to vector<2x28x96xbf16>
    %31 = vector.shape_cast %30 : vector<2x28x96xbf16> to vector<56x96xbf16>
    %c3 = arith.constant 3 : index
    %c0_23 = arith.constant 0 : index
    %c0_24 = arith.constant 0 : index
    %32 = vector.load %arg2[%c3, %c0_23, %c0_24] : memref<5x96x84xbf16, #tpu.memory_space<vmem>>, vector<1x96x84xbf16>
    %33 = vector.shape_cast %32 : vector<1x96x84xbf16> to vector<96x84xbf16>
    %cst_25 = arith.constant dense<0.000000e+00> : vector<56x84xf32>
    %34 = tpu.matmul %31, %33, %cst_25 {dimension_numbers = #tpu.dot_dimension_numbers<[1], [0], [0], [1], [0, 0, 1, 1], [], []>} : vector<56x96xbf16>, vector<96x84xbf16>, vector<56x84xf32> -> vector<56x84xf32>
    %c3_26 = arith.constant 3 : index
    %c0_27 = arith.constant 0 : index
    %c0_28 = arith.constant 0 : index
    %35 = vector.load %arg3[%c3_26, %c0_27, %c0_28] : memref<5x96x84xbf16, #tpu.memory_space<vmem>>, vector<1x96x84xbf16>
    %36 = vector.shape_cast %35 : vector<1x96x84xbf16> to vector<96x84xbf16>
    %cst_29 = arith.constant dense<0.000000e+00> : vector<56x84xf32>
    %37 = tpu.matmul %31, %36, %cst_29 {dimension_numbers = #tpu.dot_dimension_numbers<[1], [0], [0], [1], [0, 0, 1, 1], [], []>} : vector<56x96xbf16>, vector<96x84xbf16>, vector<56x84xf32> -> vector<56x84xf32>
    %38 = arith.addf %28, %34 : vector<56x84xf32>
    %39 = arith.addf %29, %37 : vector<56x84xf32>
    %40 = vector.extract_strided_slice %1 {offsets = [0, 4, 0], sizes = [2, 28, 96], strides = [1, 1, 1]} : vector<2x32x96xbf16> to vector<2x28x96xbf16>
    %41 = vector.shape_cast %40 : vector<2x28x96xbf16> to vector<56x96xbf16>
    %c4 = arith.constant 4 : index
    %c0_30 = arith.constant 0 : index
    %c0_31 = arith.constant 0 : index
    %42 = vector.load %arg2[%c4, %c0_30, %c0_31] : memref<5x96x84xbf16, #tpu.memory_space<vmem>>, vector<1x96x84xbf16>
    %43 = vector.shape_cast %42 : vector<1x96x84xbf16> to vector<96x84xbf16>
    %cst_32 = arith.constant dense<0.000000e+00> : vector<56x84xf32>
    %44 = tpu.matmul %41, %43, %cst_32 {dimension_numbers = #tpu.dot_dimension_numbers<[1], [0], [0], [1], [0, 0, 1, 1], [], []>} : vector<56x96xbf16>, vector<96x84xbf16>, vector<56x84xf32> -> vector<56x84xf32>
    %c4_33 = arith.constant 4 : index
    %c0_34 = arith.constant 0 : index
    %c0_35 = arith.constant 0 : index
    %45 = vector.load %arg3[%c4_33, %c0_34, %c0_35] : memref<5x96x84xbf16, #tpu.memory_space<vmem>>, vector<1x96x84xbf16>
    %46 = vector.shape_cast %45 : vector<1x96x84xbf16> to vector<96x84xbf16>
    %cst_36 = arith.constant dense<0.000000e+00> : vector<56x84xf32>
    %47 = tpu.matmul %41, %46, %cst_36 {dimension_numbers = #tpu.dot_dimension_numbers<[1], [0], [0], [1], [0, 0, 1, 1], [], []>} : vector<56x96xbf16>, vector<96x84xbf16>, vector<56x84xf32> -> vector<56x84xf32>
    %48 = arith.addf %38, %44 : vector<56x84xf32>
    %49 = arith.addf %39, %47 : vector<56x84xf32>
    %50 = arith.maximumf %48, %49 : vector<56x84xf32>
    %51 = vector.shape_cast %50 : vector<56x84xf32> to vector<28x2x84xf32>
    %cst_37 = arith.constant dense<0xFF800000> : vector<28x84xf32>
    %52 = vector.multi_reduction <maximumf>, %51, %cst_37 [1] : vector<28x2x84xf32> to vector<28x84xf32>
    %c0_38 = arith.constant 0 : index
    %c0_39 = arith.constant 0 : index
    %53 = vector.load %arg4[%c0_38, %c0_39] : memref<1x84xf32, #tpu.memory_space<vmem>>, vector<1x84xf32>
    %54 = vector.broadcast %53 : vector<1x84xf32> to vector<28x84xf32>
    %55 = arith.addf %52, %54 : vector<28x84xf32>
    %cst_40 = arith.constant 0.000000e+00 : f32
    %56 = vector.broadcast %cst_40 : f32 to vector<28x84xf32>
    %57 = arith.maximumf %55, %56 : vector<28x84xf32>
    %58 = arith.truncf %57 : vector<28x84xf32> to vector<28x84xbf16>
    %59 = vector.shape_cast %58 : vector<28x84xbf16> to vector<2x14x84xbf16>
    %60 = vector.extract_strided_slice %59 {offsets = [0, 0, 0], sizes = [2, 10, 84], strides = [1, 1, 1]} : vector<2x14x84xbf16> to vector<2x10x84xbf16>
    %61 = vector.shape_cast %60 : vector<2x10x84xbf16> to vector<20x84xbf16>
    %c0_41 = arith.constant 0 : index
    %c0_42 = arith.constant 0 : index
    %c0_43 = arith.constant 0 : index
    %62 = vector.load %arg5[%c0_41, %c0_42, %c0_43] : memref<5x84x80xbf16, #tpu.memory_space<vmem>>, vector<1x84x80xbf16>
    %63 = vector.shape_cast %62 : vector<1x84x80xbf16> to vector<84x80xbf16>
    %cst_44 = arith.constant dense<0.000000e+00> : vector<20x80xf32>
    %64 = tpu.matmul %61, %63, %cst_44 {dimension_numbers = #tpu.dot_dimension_numbers<[1], [0], [0], [1], [0, 0, 1, 1], [], []>} : vector<20x84xbf16>, vector<84x80xbf16>, vector<20x80xf32> -> vector<20x80xf32>
    %c0_45 = arith.constant 0 : index
    %c0_46 = arith.constant 0 : index
    %c0_47 = arith.constant 0 : index
    %65 = vector.load %arg6[%c0_45, %c0_46, %c0_47] : memref<5x84x80xbf16, #tpu.memory_space<vmem>>, vector<1x84x80xbf16>
    %66 = vector.shape_cast %65 : vector<1x84x80xbf16> to vector<84x80xbf16>
    %cst_48 = arith.constant dense<0.000000e+00> : vector<20x80xf32>
    %67 = tpu.matmul %61, %66, %cst_48 {dimension_numbers = #tpu.dot_dimension_numbers<[1], [0], [0], [1], [0, 0, 1, 1], [], []>} : vector<20x84xbf16>, vector<84x80xbf16>, vector<20x80xf32> -> vector<20x80xf32>
    %68 = vector.extract_strided_slice %59 {offsets = [0, 1, 0], sizes = [2, 10, 84], strides = [1, 1, 1]} : vector<2x14x84xbf16> to vector<2x10x84xbf16>
    %69 = vector.shape_cast %68 : vector<2x10x84xbf16> to vector<20x84xbf16>
    %c1_49 = arith.constant 1 : index
    %c0_50 = arith.constant 0 : index
    %c0_51 = arith.constant 0 : index
    %70 = vector.load %arg5[%c1_49, %c0_50, %c0_51] : memref<5x84x80xbf16, #tpu.memory_space<vmem>>, vector<1x84x80xbf16>
    %71 = vector.shape_cast %70 : vector<1x84x80xbf16> to vector<84x80xbf16>
    %cst_52 = arith.constant dense<0.000000e+00> : vector<20x80xf32>
    %72 = tpu.matmul %69, %71, %cst_52 {dimension_numbers = #tpu.dot_dimension_numbers<[1], [0], [0], [1], [0, 0, 1, 1], [], []>} : vector<20x84xbf16>, vector<84x80xbf16>, vector<20x80xf32> -> vector<20x80xf32>
    %c1_53 = arith.constant 1 : index
    %c0_54 = arith.constant 0 : index
    %c0_55 = arith.constant 0 : index
    %73 = vector.load %arg6[%c1_53, %c0_54, %c0_55] : memref<5x84x80xbf16, #tpu.memory_space<vmem>>, vector<1x84x80xbf16>
    %74 = vector.shape_cast %73 : vector<1x84x80xbf16> to vector<84x80xbf16>
    %cst_56 = arith.constant dense<0.000000e+00> : vector<20x80xf32>
    %75 = tpu.matmul %69, %74, %cst_56 {dimension_numbers = #tpu.dot_dimension_numbers<[1], [0], [0], [1], [0, 0, 1, 1], [], []>} : vector<20x84xbf16>, vector<84x80xbf16>, vector<20x80xf32> -> vector<20x80xf32>
    %76 = arith.addf %64, %72 : vector<20x80xf32>
    %77 = arith.addf %67, %75 : vector<20x80xf32>
    %78 = vector.extract_strided_slice %59 {offsets = [0, 2, 0], sizes = [2, 10, 84], strides = [1, 1, 1]} : vector<2x14x84xbf16> to vector<2x10x84xbf16>
    %79 = vector.shape_cast %78 : vector<2x10x84xbf16> to vector<20x84xbf16>
    %c2_57 = arith.constant 2 : index
    %c0_58 = arith.constant 0 : index
    %c0_59 = arith.constant 0 : index
    %80 = vector.load %arg5[%c2_57, %c0_58, %c0_59] : memref<5x84x80xbf16, #tpu.memory_space<vmem>>, vector<1x84x80xbf16>
    %81 = vector.shape_cast %80 : vector<1x84x80xbf16> to vector<84x80xbf16>
    %cst_60 = arith.constant dense<0.000000e+00> : vector<20x80xf32>
    %82 = tpu.matmul %79, %81, %cst_60 {dimension_numbers = #tpu.dot_dimension_numbers<[1], [0], [0], [1], [0, 0, 1, 1], [], []>} : vector<20x84xbf16>, vector<84x80xbf16>, vector<20x80xf32> -> vector<20x80xf32>
    %c2_61 = arith.constant 2 : index
    %c0_62 = arith.constant 0 : index
    %c0_63 = arith.constant 0 : index
    %83 = vector.load %arg6[%c2_61, %c0_62, %c0_63] : memref<5x84x80xbf16, #tpu.memory_space<vmem>>, vector<1x84x80xbf16>
    %84 = vector.shape_cast %83 : vector<1x84x80xbf16> to vector<84x80xbf16>
    %cst_64 = arith.constant dense<0.000000e+00> : vector<20x80xf32>
    %85 = tpu.matmul %79, %84, %cst_64 {dimension_numbers = #tpu.dot_dimension_numbers<[1], [0], [0], [1], [0, 0, 1, 1], [], []>} : vector<20x84xbf16>, vector<84x80xbf16>, vector<20x80xf32> -> vector<20x80xf32>
    %86 = arith.addf %76, %82 : vector<20x80xf32>
    %87 = arith.addf %77, %85 : vector<20x80xf32>
    %88 = vector.extract_strided_slice %59 {offsets = [0, 3, 0], sizes = [2, 10, 84], strides = [1, 1, 1]} : vector<2x14x84xbf16> to vector<2x10x84xbf16>
    %89 = vector.shape_cast %88 : vector<2x10x84xbf16> to vector<20x84xbf16>
    %c3_65 = arith.constant 3 : index
    %c0_66 = arith.constant 0 : index
    %c0_67 = arith.constant 0 : index
    %90 = vector.load %arg5[%c3_65, %c0_66, %c0_67] : memref<5x84x80xbf16, #tpu.memory_space<vmem>>, vector<1x84x80xbf16>
    %91 = vector.shape_cast %90 : vector<1x84x80xbf16> to vector<84x80xbf16>
    %cst_68 = arith.constant dense<0.000000e+00> : vector<20x80xf32>
    %92 = tpu.matmul %89, %91, %cst_68 {dimension_numbers = #tpu.dot_dimension_numbers<[1], [0], [0], [1], [0, 0, 1, 1], [], []>} : vector<20x84xbf16>, vector<84x80xbf16>, vector<20x80xf32> -> vector<20x80xf32>
    %c3_69 = arith.constant 3 : index
    %c0_70 = arith.constant 0 : index
    %c0_71 = arith.constant 0 : index
    %93 = vector.load %arg6[%c3_69, %c0_70, %c0_71] : memref<5x84x80xbf16, #tpu.memory_space<vmem>>, vector<1x84x80xbf16>
    %94 = vector.shape_cast %93 : vector<1x84x80xbf16> to vector<84x80xbf16>
    %cst_72 = arith.constant dense<0.000000e+00> : vector<20x80xf32>
    %95 = tpu.matmul %89, %94, %cst_72 {dimension_numbers = #tpu.dot_dimension_numbers<[1], [0], [0], [1], [0, 0, 1, 1], [], []>} : vector<20x84xbf16>, vector<84x80xbf16>, vector<20x80xf32> -> vector<20x80xf32>
    %96 = arith.addf %86, %92 : vector<20x80xf32>
    %97 = arith.addf %87, %95 : vector<20x80xf32>
    %98 = vector.extract_strided_slice %59 {offsets = [0, 4, 0], sizes = [2, 10, 84], strides = [1, 1, 1]} : vector<2x14x84xbf16> to vector<2x10x84xbf16>
    %99 = vector.shape_cast %98 : vector<2x10x84xbf16> to vector<20x84xbf16>
    %c4_73 = arith.constant 4 : index
    %c0_74 = arith.constant 0 : index
    %c0_75 = arith.constant 0 : index
    %100 = vector.load %arg5[%c4_73, %c0_74, %c0_75] : memref<5x84x80xbf16, #tpu.memory_space<vmem>>, vector<1x84x80xbf16>
    %101 = vector.shape_cast %100 : vector<1x84x80xbf16> to vector<84x80xbf16>
    %cst_76 = arith.constant dense<0.000000e+00> : vector<20x80xf32>
    %102 = tpu.matmul %99, %101, %cst_76 {dimension_numbers = #tpu.dot_dimension_numbers<[1], [0], [0], [1], [0, 0, 1, 1], [], []>} : vector<20x84xbf16>, vector<84x80xbf16>, vector<20x80xf32> -> vector<20x80xf32>
    %c4_77 = arith.constant 4 : index
    %c0_78 = arith.constant 0 : index
    %c0_79 = arith.constant 0 : index
    %103 = vector.load %arg6[%c4_77, %c0_78, %c0_79] : memref<5x84x80xbf16, #tpu.memory_space<vmem>>, vector<1x84x80xbf16>
    %104 = vector.shape_cast %103 : vector<1x84x80xbf16> to vector<84x80xbf16>
    %cst_80 = arith.constant dense<0.000000e+00> : vector<20x80xf32>
    %105 = tpu.matmul %99, %104, %cst_80 {dimension_numbers = #tpu.dot_dimension_numbers<[1], [0], [0], [1], [0, 0, 1, 1], [], []>} : vector<20x84xbf16>, vector<84x80xbf16>, vector<20x80xf32> -> vector<20x80xf32>
    %106 = arith.addf %96, %102 : vector<20x80xf32>
    %107 = arith.addf %97, %105 : vector<20x80xf32>
    %108 = arith.maximumf %106, %107 : vector<20x80xf32>
    %109 = vector.shape_cast %108 : vector<20x80xf32> to vector<10x2x80xf32>
    %cst_81 = arith.constant dense<0xFF800000> : vector<10x80xf32>
    %110 = vector.multi_reduction <maximumf>, %109, %cst_81 [1] : vector<10x2x80xf32> to vector<10x80xf32>
    %c0_82 = arith.constant 0 : index
    %c0_83 = arith.constant 0 : index
    %111 = vector.load %arg7[%c0_82, %c0_83] : memref<1x80xf32, #tpu.memory_space<vmem>>, vector<1x80xf32>
    %112 = vector.broadcast %111 : vector<1x80xf32> to vector<10x80xf32>
    %113 = arith.addf %110, %112 : vector<10x80xf32>
    %cst_84 = arith.constant 0.000000e+00 : f32
    %114 = vector.broadcast %cst_84 : f32 to vector<10x80xf32>
    %115 = arith.maximumf %113, %114 : vector<10x80xf32>
    %116 = arith.truncf %115 : vector<10x80xf32> to vector<10x80xbf16>
    %117 = vector.shape_cast %116 : vector<10x80xbf16> to vector<2x5x80xbf16>
    %118 = vector.extract_strided_slice %117 {offsets = [0, 0, 0], sizes = [2, 1, 80], strides = [1, 1, 1]} : vector<2x5x80xbf16> to vector<2x1x80xbf16>
    %119 = vector.shape_cast %118 : vector<2x1x80xbf16> to vector<2x80xbf16>
    %c0_85 = arith.constant 0 : index
    %c0_86 = arith.constant 0 : index
    %c0_87 = arith.constant 0 : index
    %120 = vector.load %arg8[%c0_85, %c0_86, %c0_87] : memref<5x80x120xbf16, #tpu.memory_space<vmem>>, vector<1x80x120xbf16>
    %121 = vector.shape_cast %120 : vector<1x80x120xbf16> to vector<80x120xbf16>
    %cst_88 = arith.constant dense<0.000000e+00> : vector<2x120xf32>
    %122 = tpu.matmul %119, %121, %cst_88 {dimension_numbers = #tpu.dot_dimension_numbers<[1], [0], [0], [1], [0, 0, 1, 1], [], []>} : vector<2x80xbf16>, vector<80x120xbf16>, vector<2x120xf32> -> vector<2x120xf32>
    %123 = vector.extract_strided_slice %117 {offsets = [0, 1, 0], sizes = [2, 1, 80], strides = [1, 1, 1]} : vector<2x5x80xbf16> to vector<2x1x80xbf16>
    %124 = vector.shape_cast %123 : vector<2x1x80xbf16> to vector<2x80xbf16>
    %c1_89 = arith.constant 1 : index
    %c0_90 = arith.constant 0 : index
    %c0_91 = arith.constant 0 : index
    %125 = vector.load %arg8[%c1_89, %c0_90, %c0_91] : memref<5x80x120xbf16, #tpu.memory_space<vmem>>, vector<1x80x120xbf16>
    %126 = vector.shape_cast %125 : vector<1x80x120xbf16> to vector<80x120xbf16>
    %cst_92 = arith.constant dense<0.000000e+00> : vector<2x120xf32>
    %127 = tpu.matmul %124, %126, %cst_92 {dimension_numbers = #tpu.dot_dimension_numbers<[1], [0], [0], [1], [0, 0, 1, 1], [], []>} : vector<2x80xbf16>, vector<80x120xbf16>, vector<2x120xf32> -> vector<2x120xf32>
    %128 = arith.addf %122, %127 : vector<2x120xf32>
    %129 = vector.extract_strided_slice %117 {offsets = [0, 2, 0], sizes = [2, 1, 80], strides = [1, 1, 1]} : vector<2x5x80xbf16> to vector<2x1x80xbf16>
    %130 = vector.shape_cast %129 : vector<2x1x80xbf16> to vector<2x80xbf16>
    %c2_93 = arith.constant 2 : index
    %c0_94 = arith.constant 0 : index
    %c0_95 = arith.constant 0 : index
    %131 = vector.load %arg8[%c2_93, %c0_94, %c0_95] : memref<5x80x120xbf16, #tpu.memory_space<vmem>>, vector<1x80x120xbf16>
    %132 = vector.shape_cast %131 : vector<1x80x120xbf16> to vector<80x120xbf16>
    %cst_96 = arith.constant dense<0.000000e+00> : vector<2x120xf32>
    %133 = tpu.matmul %130, %132, %cst_96 {dimension_numbers = #tpu.dot_dimension_numbers<[1], [0], [0], [1], [0, 0, 1, 1], [], []>} : vector<2x80xbf16>, vector<80x120xbf16>, vector<2x120xf32> -> vector<2x120xf32>
    %134 = arith.addf %128, %133 : vector<2x120xf32>
    %135 = vector.extract_strided_slice %117 {offsets = [0, 3, 0], sizes = [2, 1, 80], strides = [1, 1, 1]} : vector<2x5x80xbf16> to vector<2x1x80xbf16>
    %136 = vector.shape_cast %135 : vector<2x1x80xbf16> to vector<2x80xbf16>
    %c3_97 = arith.constant 3 : index
    %c0_98 = arith.constant 0 : index
    %c0_99 = arith.constant 0 : index
    %137 = vector.load %arg8[%c3_97, %c0_98, %c0_99] : memref<5x80x120xbf16, #tpu.memory_space<vmem>>, vector<1x80x120xbf16>
    %138 = vector.shape_cast %137 : vector<1x80x120xbf16> to vector<80x120xbf16>
    %cst_100 = arith.constant dense<0.000000e+00> : vector<2x120xf32>
    %139 = tpu.matmul %136, %138, %cst_100 {dimension_numbers = #tpu.dot_dimension_numbers<[1], [0], [0], [1], [0, 0, 1, 1], [], []>} : vector<2x80xbf16>, vector<80x120xbf16>, vector<2x120xf32> -> vector<2x120xf32>
    %140 = arith.addf %134, %139 : vector<2x120xf32>
    %141 = vector.extract_strided_slice %117 {offsets = [0, 4, 0], sizes = [2, 1, 80], strides = [1, 1, 1]} : vector<2x5x80xbf16> to vector<2x1x80xbf16>
    %142 = vector.shape_cast %141 : vector<2x1x80xbf16> to vector<2x80xbf16>
    %c4_101 = arith.constant 4 : index
    %c0_102 = arith.constant 0 : index
    %c0_103 = arith.constant 0 : index
    %143 = vector.load %arg8[%c4_101, %c0_102, %c0_103] : memref<5x80x120xbf16, #tpu.memory_space<vmem>>, vector<1x80x120xbf16>
    %144 = vector.shape_cast %143 : vector<1x80x120xbf16> to vector<80x120xbf16>
    %cst_104 = arith.constant dense<0.000000e+00> : vector<2x120xf32>
    %145 = tpu.matmul %142, %144, %cst_104 {dimension_numbers = #tpu.dot_dimension_numbers<[1], [0], [0], [1], [0, 0, 1, 1], [], []>} : vector<2x80xbf16>, vector<80x120xbf16>, vector<2x120xf32> -> vector<2x120xf32>
    %146 = arith.addf %140, %145 : vector<2x120xf32>
    %c0_105 = arith.constant 0 : index
    %c0_106 = arith.constant 0 : index
    %147 = vector.load %arg9[%c0_105, %c0_106] : memref<1x120xf32, #tpu.memory_space<vmem>>, vector<1x120xf32>
    %148 = vector.broadcast %147 : vector<1x120xf32> to vector<2x120xf32>
    %149 = arith.addf %146, %148 : vector<2x120xf32>
    %cst_107 = arith.constant 0.000000e+00 : f32
    %150 = vector.broadcast %cst_107 : f32 to vector<2x120xf32>
    %151 = arith.maximumf %149, %150 : vector<2x120xf32>
    %152 = arith.truncf %151 : vector<2x120xf32> to vector<2x120xbf16>
    %c0_108 = arith.constant 0 : index
    %c0_109 = arith.constant 0 : index
    %153 = vector.load %arg10[%c0_108, %c0_109] : memref<120x84xbf16, #tpu.memory_space<vmem>>, vector<120x84xbf16>
    %cst_110 = arith.constant dense<0.000000e+00> : vector<2x84xf32>
    %154 = tpu.matmul %152, %153, %cst_110 {dimension_numbers = #tpu.dot_dimension_numbers<[1], [0], [0], [1], [0, 0, 1, 1], [], []>} : vector<2x120xbf16>, vector<120x84xbf16>, vector<2x84xf32> -> vector<2x84xf32>
    %c0_111 = arith.constant 0 : index
    %c0_112 = arith.constant 0 : index
    %155 = vector.load %arg11[%c0_111, %c0_112] : memref<1x84xf32, #tpu.memory_space<vmem>>, vector<1x84xf32>
    %156 = vector.broadcast %155 : vector<1x84xf32> to vector<2x84xf32>
    %157 = arith.addf %154, %156 : vector<2x84xf32>
    %cst_113 = arith.constant 0.000000e+00 : f32
    %158 = vector.broadcast %cst_113 : f32 to vector<2x84xf32>
    %159 = arith.maximumf %157, %158 : vector<2x84xf32>
    %160 = arith.truncf %159 : vector<2x84xf32> to vector<2x84xbf16>
    %c0_114 = arith.constant 0 : index
    %c0_115 = arith.constant 0 : index
    %161 = vector.load %arg12[%c0_114, %c0_115] : memref<84x10xbf16, #tpu.memory_space<vmem>>, vector<84x10xbf16>
    %cst_116 = arith.constant dense<0.000000e+00> : vector<2x10xf32>
    %162 = tpu.matmul %160, %161, %cst_116 {dimension_numbers = #tpu.dot_dimension_numbers<[1], [0], [0], [1], [0, 0, 1, 1], [], []>} : vector<2x84xbf16>, vector<84x10xbf16>, vector<2x10xf32> -> vector<2x10xf32>
    %c0_117 = arith.constant 0 : index
    %c0_118 = arith.constant 0 : index
    %163 = vector.load %arg13[%c0_117, %c0_118] : memref<1x10xf32, #tpu.memory_space<vmem>>, vector<1x10xf32>
    %164 = vector.broadcast %163 : vector<1x10xf32> to vector<2x10xf32>
    %165 = arith.addf %162, %164 : vector<2x10xf32>
    %c0_119 = arith.constant 0 : index
    %c0_120 = arith.constant 0 : index
    %166 = vector.load %arg14[%c0_119, %c0_120] : memref<2x10xf32, #tpu.memory_space<vmem>>, vector<2x10xf32>
    tpu.vector_store %arg14[%c0_119, %c0_120], %165 {strides = array<i32>} : memref<2x10xf32, #tpu.memory_space<vmem>>, vector<2x10xf32>,
    return
  }
  func.func @transform_0(%arg0: i32) -> (i32, i32, i32) {
    %c0_i32 = arith.constant 0 : i32
    %c0_i32_0 = arith.constant 0 : i32
    %c0_i32_1 = arith.constant 0 : i32
    return %arg0, %c0_i32, %c0_i32_0 : i32, i32, i32
  }
  func.func @transform_1(%arg0: i32) -> (i32, i32, i32) {
    %c0_i32 = arith.constant 0 : i32
    %c0_i32_0 = arith.constant 0 : i32
    %c0_i32_1 = arith.constant 0 : i32
    %c0_i32_2 = arith.constant 0 : i32
    return %c0_i32, %c0_i32_0, %c0_i32_1 : i32, i32, i32
  }
  func.func @transform_2(%arg0: i32) -> (i32, i32, i32) {
    %c0_i32 = arith.constant 0 : i32
    %c0_i32_0 = arith.constant 0 : i32
    %c0_i32_1 = arith.constant 0 : i32
    %c0_i32_2 = arith.constant 0 : i32
    return %c0_i32, %c0_i32_0, %c0_i32_1 : i32, i32, i32
  }
  func.func @transform_3(%arg0: i32) -> (i32, i32) {
    %c0_i32 = arith.constant 0 : i32
    %c0_i32_0 = arith.constant 0 : i32
    %c0_i32_1 = arith.constant 0 : i32
    return %c0_i32, %c0_i32_0 : i32, i32
  }
  func.func @transform_4(%arg0: i32) -> (i32, i32, i32) {
    %c0_i32 = arith.constant 0 : i32
    %c0_i32_0 = arith.constant 0 : i32
    %c0_i32_1 = arith.constant 0 : i32
    %c0_i32_2 = arith.constant 0 : i32
    return %c0_i32, %c0_i32_0, %c0_i32_1 : i32, i32, i32
  }
  func.func @transform_5(%arg0: i32) -> (i32, i32, i32) {
    %c0_i32 = arith.constant 0 : i32
    %c0_i32_0 = arith.constant 0 : i32
    %c0_i32_1 = arith.constant 0 : i32
    %c0_i32_2 = arith.constant 0 : i32
    return %c0_i32, %c0_i32_0, %c0_i32_1 : i32, i32, i32
  }
  func.func @transform_6(%arg0: i32) -> (i32, i32) {
    %c0_i32 = arith.constant 0 : i32
    %c0_i32_0 = arith.constant 0 : i32
    %c0_i32_1 = arith.constant 0 : i32
    return %c0_i32, %c0_i32_0 : i32, i32
  }
  func.func @transform_7(%arg0: i32) -> (i32, i32, i32) {
    %c0_i32 = arith.constant 0 : i32
    %c0_i32_0 = arith.constant 0 : i32
    %c0_i32_1 = arith.constant 0 : i32
    %c0_i32_2 = arith.constant 0 : i32
    return %c0_i32, %c0_i32_0, %c0_i32_1 : i32, i32, i32
  }
  func.func @transform_8(%arg0: i32) -> (i32, i32) {
    %c0_i32 = arith.constant 0 : i32
    %c0_i32_0 = arith.constant 0 : i32
    %c0_i32_1 = arith.constant 0 : i32
    return %c0_i32, %c0_i32_0 : i32, i32
  }
  func.func @transform_9(%arg0: i32) -> (i32, i32) {
    %c0_i32 = arith.constant 0 : i32
    %c0_i32_0 = arith.constant 0 : i32
    %c0_i32_1 = arith.constant 0 : i32
    return %c0_i32, %c0_i32_0 : i32, i32
  }
  func.func @transform_10(%arg0: i32) -> (i32, i32) {
    %c0_i32 = arith.constant 0 : i32
    %c0_i32_0 = arith.constant 0 : i32
    %c0_i32_1 = arith.constant 0 : i32
    return %c0_i32, %c0_i32_0 : i32, i32
  }
  func.func @transform_11(%arg0: i32) -> (i32, i32) {
    %c0_i32 = arith.constant 0 : i32
    %c0_i32_0 = arith.constant 0 : i32
    %c0_i32_1 = arith.constant 0 : i32
    return %c0_i32, %c0_i32_0 : i32, i32
  }
  func.func @transform_12(%arg0: i32) -> (i32, i32) {
    %c0_i32 = arith.constant 0 : i32
    %c0_i32_0 = arith.constant 0 : i32
    %c0_i32_1 = arith.constant 0 : i32
    return %c0_i32, %c0_i32_0 : i32, i32
  }
  func.func @transform_13(%arg0: i32) -> (i32, i32) {
    %c0_i32 = arith.constant 0 : i32
    %c0_i32_0 = arith.constant 0 : i32
    return %arg0, %c0_i32 : i32, i32
  }
}

</mosaic_0001>

<bundles_post_ra>
// kernel: net_forward.1
= control target key start
LH: loop header
LB: loop body
LE: loop exit
PB: predicated region body
PF: predicated region fallthrough
CT: control target
= control target key end

     0   :  { %v66_v8 = vlaneseq  ;;  %v5944_v15 = vmov 1983009808   ;;  %vm154_vm0 = vsmask.f32 1280  ;;  %vm155_vm1 = vsmask.f32 3336  ;;  %s7669_s0 = inlined_call_operand.vmem [shape: f32[2,32,96], index: 0, kind: input, shape index: {}]   ;;  %s7670_s1 = inlined_call_operand.vmem [shape: bf16[5,96,84], index: 1, kind: input, shape index: {}]   ;;  %s7671_s2 = inlined_call_operand.vmem [shape: bf16[5,96,84], index: 2, kind: input, shape index: {}]   ;;  %s7672_s3 = inlined_call_operand.vmem [shape: f32[1,84], index: 3, kind: input, shape index: {}]   ;;  %s7673_s4 = inlined_call_operand.vmem [shape: bf16[5,84,80], index: 4, kind: input, shape index: {}]   ;;  %s7674_s5 = inlined_call_operand.vmem [shape: bf16[5,84,80], index: 5, kind: input, shape index: {}]   ;;  %s7675_s6 = inlined_call_operand.vmem [shape: f32[1,80], index: 6, kind: input, shape index: {}]   ;;  %s7676_s7 = inlined_call_operand.vmem [shape: bf16[5,80,120], index: 7, kind: input, shape index: {}]   ;;  %s7677_s8 = inlined_call_operand.vmem [shape: f32[1,120], index: 8, kind: input, shape index: {}]   ;;  %s7678_s9 = inlined_call_operand.vmem [shape: bf16[120,84], index: 9, kind: input, shape index: {}]   ;;  %s7679_s10 = inlined_call_operand.vmem [shape: f32[1,84], index: 10, kind: input, shape index: {}]   ;;  %s7680_s11 = inlined_call_operand.vmem [shape: bf16[84,10], index: 11, kind: input, shape index: {}]   ;;  %s7681_s12 = inlined_call_operand.vmem [shape: f32[1,10], index: 12, kind: input, shape index: {}]   ;;  %s7682_s13 = inlined_call_operand.hbm [shape: f32[2,10], index: 13, kind: output, shape index: {}]  }
   0x1   :  { %v5761_v0 = vld [vmem:[%s7670_s1 + $0x30] sm:$0xff]   ;;  %v5763_v2 = vld [vmem:[%s7670_s1 + $0x38] sm:$0xff]   ;;  %v5765_v4 = vld [vmem:[%s7670_s1 + $0x40] sm:$0xff]   ;;  %v64_v16 = vunpack.c.l.s4 %v5944_v15  ;;  %vm157_vm2 = vsmask.f32 5392  ;;  %vm417_vm7 = vcmask 785408  }
   0x2   :  { %v5762_v1 = vld [vmem:[%s7671_s2 + $0x30] sm:$0xff]   ;;  %5185 = vmatprep.subr.bf16.mxu0 %v5761_v0  ;;  %v5764_v3 = vld [vmem:[%s7671_s2 + $0x38] sm:$0xff]   ;;  %v5766_v5 = vld [vmem:[%s7671_s2 + $0x40] sm:$0xff]   ;;  %v67_v17 = vshrl.u32 %v66_v8, 7  ;;  %vm159_vm4 = vsmask.f32 7448 }
   0x3   :  { %5205 = vmatprep.subr.bf16.mxu1 %v5762_v1  ;;  %5186 = vmatpush3.bf16.msra.mxu0 %v5761_v0  ;;  %v5767_v6 = vld [vmem:[%s7670_s1 + $0x48] sm:$0xff]   ;;  %v5769_v9 = vld [vmem:[%s7670_s1 + $0x50] sm:$0xff]   ;;  %v46_v11 = vld [vmem:[%s7669_s0] sm:$0xff]  ;;  %v65_v20 = vunpack.c.0.s8 %v64_v16  ;;  %vm878_vm8 = vcmask 1040384   ;;  %vm879_vm9 = vcmask 1042434   ;;  %vm881_vm10 = vcmask 1044484  }
   0x4   :  { %5206 = vmatpush3.bf16.msra.mxu1 %v5762_v1  ;;  %5187 = vmatprep.subr.bf16.mxu0 %v5763_v2  ;;  %v5768_v7 = vld [vmem:[%s7671_s2 + $0x48] sm:$0xff]   ;;  %v5770_v10 = vld [vmem:[%s7671_s2 + $0x50] sm:$0xff]   ;;  %v49_v14 = vld [vmem:[%s7669_s0 + $0x18] sm:$0xff]  ;;  %vm883_vm11 = vcmask 1046534   ;;  %vm1240_vm14 = vsmask.f32 256 }
   0x5   :  { %5207 = vmatprep.subr.bf16.mxu1 %v5764_v3  ;;  %v47_v12 = vld [vmem:[%s7669_s0 + $0x8] sm:$0xff]  ;;  %v48_v13 = vld [vmem:[%s7669_s0 + $0x10] sm:$0xff]  ;;  %v5771_v21 = vld [vmem:[%s7670_s1 + $0x58] sm:$0xff]   ;;  %v4496_v23 = vpack.c.bf16 %v49_v14, %v49_v14  ;;  %v6069_v26 = vsub.s32 %v65_v20, %v67_v17  ;;  %vm1241_vm15 = vsmask.f32 2312 }
   0x6   :  { %v54_v18 = vpack.c.bf16 %v47_v12, %v46_v11  ;;  %v4495_v19 = vpack.c.bf16 %v47_v12, %v47_v12  ;;  %v55_v22 = vpack.c.bf16 %v49_v14, %v48_v13  ;;  %v50_v24 = vld [vmem:[%s7669_s0 + $0x20] sm:$0xff]  ;;  %v5772_v25 = vld [vmem:[%s7671_s2 + $0x58] sm:$0xff]   ;;  %v6074_v27 = vld [vmem:[%s7669_s0 + $0x28] sm:$0xff] }
   0x7   :  { %5188 = vmatpush3.bf16.msra.mxu0 %v5763_v2  ;;  %v6079_v28 = vld [vmem:[%s7670_s1] sm:$0xff]   ;;  %v56_v29 = vpack.c.bf16 %v6074_v27, %v50_v24  ;;  %v6092_v33 = vrot.slane %v4496_v23, %v6069_v26  ;;  %vm156_vm3 = vmor %vm154_vm0, %vm155_vm1  ;;  %v4497_v23 = vpack.c.bf16 %v6074_v27, %v6074_v27  ;;  %vm1243_vm1 = vsmask.f32 4368  ;;  %v5783_v57 = vld [vmem:[%s7670_s1 + $0x28] sm:$0xff]  }
   0x8   :  { %5208 = vmatpush3.bf16.msra.mxu1 %v5764_v3  ;;  %5189 = vmatprep.subr.bf16.mxu0 %v5765_v4  ;;  %v6083_v30 = vrot.slane %v54_v18, %v6069_v26  ;;  %v6086_v31 = vrot.slane %v4495_v19, %v6069_v26  ;;  %v6089_v32 = vrot.slane %v55_v22, %v6069_v26  ;;  %v6111_v39 = vld [vmem:[%s7671_s2] sm:$0xff]   ;;  %vm6118_vm5 = vmor %vm156_vm3, %vm157_vm2 }
   0x9   :  { %5209 = vmatprep.subr.bf16.mxu1 %v5766_v5  ;;  %v6096_v34 = vrot.slane %v56_v29, %v6069_v26  ;;  %vm6135_vm6 = vmor %vm6118_vm5, %vm159_vm4  ;;  %v6174_v18 = vcombine.high %v6092_v33, %v6092_v33  ;;  %v221_v19 = vshll.u32 %v6092_v33, 16  ;;  %vm1245_vm4 = vsmask.f32 6424 }
   0xa   :  { %v6100_v35 = vcombine.high %v6083_v30, %v6083_v30  ;;  %v6104_v36 = vcombine.high %v6086_v31, %v6086_v31  ;;  %v162_v37 = vshrl.u32 %v6083_v30, 16  ;;  %v165_v38 = vshll.u32 %v6083_v30, 16  ;;  %vm6303_vm12 = vmor %vm878_vm8, %vm879_vm9 }
   0xb   :  { %5190 = vmatpush3.bf16.msra.mxu0 %v5765_v4  ;;  %v181_v40 = vshll.u32 %v6086_v31, 16  ;;  %v185_v41 = vshrl.u32 %v6086_v31, 16  ;;  %v201_v42 = vshll.u32 %v6089_v32, 16  ;;  %v205_v43 = vshrl.u32 %v6089_v32, 16  ;;  %vm882_vm13 = vmor %vm6303_vm12, %vm881_vm10 }
   0xc   :  { %5210 = vmatpush3.bf16.msra.mxu1 %v5766_v5  ;;  %5191 = vmatprep.subr.bf16.mxu0 %v5767_v6  ;;  %v164_v45 = vrot.slane %v162_v37, 6  ;;  %v167_v46 = vrot.slane %v165_v38, 7  ;;  %v171_v47 = vshll.u32 %v6100_v35, 16  ;;  %v175_v48 = vshrl.u32 %v6100_v35, 16  ;;  %vm6341_vm0 = vmor %vm882_vm13, %vm883_vm11 }
   0xd   :  { %5211 = vmatprep.subr.bf16.mxu1 %v5768_v7  ;;  %v183_v49 = vrot.slane %v181_v40, 7  ;;  %v187_v50 = vrot.slane %v185_v41, 6  ;;  %v191_v51 = vshll.u32 %v6104_v36, 16  ;;  %v195_v52 = vshrl.u32 %v6104_v36, 16  ;;  %vm6398_vm2 = vmor %vm1240_vm14, %vm1241_vm15 }
   0xe   :  { %v168_v53 = vor.u32 %v167_v46, %v164_v45  ;;  %v173_v54 = vrot.slane %v171_v47, 7  ;;  %v177_v55 = vrot.slane %v175_v48, 6  ;;  %v203_v56 = vrot.slane %v201_v42, 7  ;;  %vm6430_vm3 = vmor %vm6398_vm2, %vm1243_vm1 }
   0xf   :  { %5192 = vmatpush3.bf16.msra.mxu0 %v5767_v6  ;;  %v188_v58 = vor.u32 %v187_v50, %v183_v49  ;;  %v193_v59 = vrot.slane %v191_v51, 7  ;;  %v197_v60 = vrot.slane %v195_v52, 6  ;;  %v207_v61 = vrot.slane %v205_v43, 6  ;;  %vm6474_vm5 = vmor %vm6430_vm3, %vm1245_vm4 }
  0x10   :  { %5212 = vmatpush3.bf16.msra.mxu1 %v5768_v7  ;;  %5193 = vmatprep.subr.bf16.mxu0 %v5769_v9  ;;  %v169_v62 = vrot.slane %v168_v53, 2  ;;  %v178_v63 = vor.u32 %v177_v55, %v173_v54  ;;  %v6141_v0 = vrot.slane %v175_v48, 7  ;;  %v6143_v1 = vrot.slane %v185_v41, 7 }
  0x11   :  { %5213 = vmatprep.subr.bf16.mxu1 %v5770_v10  ;;  %v189_v2 = vrot.slane %v188_v58, 2  ;;  %v198_v3 = vor.u32 %v197_v60, %v193_v59  ;;  %v208_v4 = vor.u32 %v207_v61, %v203_v56  ;;  %v6145_v5 = vrot.slane %v195_v52, 7  ;;  %v52_v58 = vld [vmem:[%s7669_s0 + $0x30] sm:$0xff] }
  0x12   :  { %v174_v6 = vsel %vm6135_vm6, %v169_v62, %v173_v54  ;;  %v179_v7 = vrot.slane %v178_v63, 2  ;;  %v6150_v8 = vor.u32 %v6141_v0, %v171_v47  ;;  %v6164_v14 = vcombine.high %v6089_v32, %v6089_v32 }
  0x13   :  { %5194 = vmatpush3.bf16.msra.mxu0 %v5769_v9  ;;  %v6153_v9 = vor.u32 %v6143_v1, %v181_v40  ;;  %v199_v11 = vrot.slane %v198_v3, 2  ;;  %v6158_v12 = vor.u32 %v6145_v5, %v191_v51  ;;  %v6168_v15 = vcombine.high %v6096_v34, %v6096_v34 }
  0x14   :  { %5214 = vmatpush3.bf16.msra.mxu1 %v5770_v10  ;;  %5195 = vmatprep.subr.bf16.mxu0 %v5771_v21  ;;  %v194_v10 = vsel %vm6135_vm6, %v189_v2, %v193_v59  ;;  %v184_v13 = vsel %vm6135_vm6, %v179_v7, %v183_v49  ;;  %v209_v20 = vrot.slane %v208_v4, 2  ;;  %v211_v22 = vshll.u32 %v6164_v14, 16 }
  0x15   :  { %5215 = vmatprep.subr.bf16.mxu1 %v5772_v25  ;;  %v204_v16 = vsel %vm6135_vm6, %v199_v11, %v203_v56  ;;  %v322_v17 = vcombine.low %v174_v6, %v184_v13  ;;  %v223_v29 = vrot.slane %v221_v19, 7  ;;  %v225_v38 = vshrl.u32 %v6092_v33, 16  ;;  %v53_v6 = vld [vmem:[%s7669_s0 + $0x38] sm:$0xff] }
  0x16   :  { %v213_v41 = vrot.slane %v211_v22, 7  ;;  %v231_v44 = vshll.u32 %v6174_v18, 16  ;;  %v236_v45 = vshrl.u32 %v6096_v34, 16  ;;  %v239_v48 = vshll.u32 %v6096_v34, 16 }
  0x17   :  { %5196 = vmatpush3.bf16.msra.mxu0 %v5771_v21  ;;  %v323_v21 = vcombine.low %v194_v10, %v204_v16  ;;  %v330_v24 = vrot.slane %v322_v17, %v6069_v26  ;;  %v227_v47 = vrot.slane %v225_v38, 6  ;;  %v245_v27 = vshll.u32 %v6168_v15, 16 }
  0x18   :  { %5216 = vmatpush3.bf16.msra.mxu1 %v5772_v25  ;;  %5225 = vmatprep.subr.bf16.mxu0 %v6079_v28  ;;  %v215_v25 = vshrl.u32 %v6164_v14, 16  ;;  %v214_v50 = vsel %vm6135_vm6, %v209_v20, %v213_v41  ;;  %v238_v51 = vrot.slane %v236_v45, 6  ;;  %v6193_v52 = vrot.slane %v4497_v23, %v6069_v26 }
  0x19   :  { %5245 = vmatprep.subr.bf16.mxu1 %v6111_v39  ;;  %v337_v40 = vrot.slane %v323_v21, %v6069_v26  ;;  %v228_v54 = vor.u32 %v227_v47, %v223_v29  ;;  %v233_v55 = vrot.slane %v231_v44, 7  ;;  %v241_v56 = vrot.slane %v239_v48, 7 }
  0x1a   :  { %v217_v46 = vrot.slane %v215_v25, 6  ;;  %v247_v59 = vrot.slane %v245_v27, 7  ;;  %v6200_v60 = vrot.slane %v215_v25, 7  ;;  %v6202_v61 = vrot.slane %v225_v38, 7 }
  0x1b   :  { %v338_v49 = vcombine.low %v330_v24, %v337_v40  ;;  %v1273_v62 = vshrl.u32 %v6174_v18, 16  ;;  %v229_v2 = vrot.slane %v228_v54, 2  ;;  %v242_v3 = vor.u32 %v241_v56, %v238_v51  ;;  %v5775_v51 = vld [vmem:[%s7670_s1 + $0x8] sm:$0xff]  }
  0x1c   :  { %v218_v53 = vor.u32 %v217_v46, %v213_v41  ;;  %v249_v4 = vshrl.u32 %v6168_v15, 16  ;;  %v6210_v7 = vor.u32 %v6200_v60, %v211_v22  ;;  %v6213_v10 = vor.u32 %v6202_v61, %v221_v19 }
  0x1d   :  { %5197 = vmatprep.mubr.msk.bf16.mxu0 %vm417_vm7, %v338_v49  ;;  %5217 = vmatprep.mubr.msk.bf16.mxu1 %vm417_vm7, %v338_v49  ;;  %v234_v13 = vsel %vm6135_vm6, %v229_v2, %v233_v55  ;;  %v243_v16 = vrot.slane %v242_v3, 2  ;;  %v1275_v17 = vrot.slane %v1273_v62, 7  ;;  %v57_v23 = vpack.c.bf16 %v53_v6, %v52_v58 }
  0x1e   :  { %v219_v63 = vrot.slane %v218_v53, 2  ;;  %v6219_v21 = vrot.slane %v249_v4, 7  ;;  %v6223_v24 = vcombine.high %v6193_v52, %v6193_v52  ;;  %v251_v25 = vrot.slane %v249_v4, 6 }
  0x1f   :  { %v248_v19 = vsel %vm6135_vm6, %v243_v16, %v247_v59  ;;  %v6227_v22 = vor.u32 %v1275_v17, %v231_v44  ;;  %v6235_v46 = vrot.slane %v57_v23, %v6069_v26  ;;  %v7693_v49 = vshrl.u32 %v6193_v52, 16 }
  0x20   :  { %v224_v11 = vsel %vm6135_vm6, %v219_v63, %v223_v29  ;;  %v7691_v29 = vshll.u32 %v6193_v52, 16  ;;  %v340_v38 = vcombine.low %v234_v13, %v248_v19  ;;  %v6232_v41 = vor.u32 %v6219_v21, %v245_v27  ;;  %v5776_v63 = vld [vmem:[%s7671_s2 + $0x8] sm:$0xff]  }
  0x21   :  { %v339_v20 = vcombine.low %v214_v50, %v224_v11  ;;  %v252_v47 = vor.u32 %v251_v25, %v247_v59  ;;  %v7690_v44 = vshll.u32 %v6223_v24, 16  ;;  %v6247_v27 = vcombine.high %v6235_v46, %v6235_v46 }
  0x22   :  { %v257_v48 = vrot.slane %v7691_v29, 7  ;;  %v354_v50 = vrot.slane %v340_v38, %v6069_v26  ;;  %v7692_v53 = vshrl.u32 %v6223_v24, 16  ;;  %v7684_v54 = vshll.u32 %v6235_v46, 16 }
  0x23   :  { %v347_v40 = vrot.slane %v339_v20, %v6069_v26  ;;  %v253_v55 = vrot.slane %v252_v47, 2  ;;  %v261_v56 = vrot.slane %v7693_v49, 6  ;;  %v267_v58 = vrot.slane %v7690_v44, 7  ;;  %v5777_v20 = vld [vmem:[%s7670_s1 + $0x10] sm:$0xff]  }
  0x24   :  { %v7689_v59 = vshrl.u32 %v6235_v46, 16  ;;  %v271_v2 = vrot.slane %v7692_v53, 6  ;;  %v277_v3 = vrot.slane %v7684_v54, 7  ;;  %v7683_v4 = vshll.u32 %v6247_v27, 16 }
  0x25   :  { %v355_v62 = vcombine.low %v347_v40, %v354_v50  ;;  %v6266_v11 = vrot.slane %v205_v43, 7  ;;  %v262_v13 = vor.u32 %v261_v56, %v257_v48  ;;  %v4498_v17 = vpack.c.bf16 %v53_v6, %v53_v6  ;;  %v5778_v6 = vld [vmem:[%s7671_s2 + $0x10] sm:$0xff]  }
  0x26   :  { %v281_v16 = vrot.slane %v7689_v59, 6  ;;  %v272_v23 = vor.u32 %v271_v2, %v267_v58  ;;  %v287_v19 = vrot.slane %v7683_v4, 7  ;;  %v7688_v43 = vshrl.u32 %v6247_v27, 16 }
  0x27   :  { %5198 = vmatmul.mubr.msk.bf16.vlgmr.msra.gmra.mrb[0].mxu0 %vm417_vm7, %v355_v62  ;;  %5218 = vmatmul.mubr.msk.bf16.vlgmr.msra.gmra.mrb[0].mxu1 %vm417_vm7, %v355_v62  ;;  %v258_v25 = vsel %vm6135_vm6, %v253_v55, %v257_v48  ;;  %v263_v38 = vrot.slane %v262_v13, 2  ;;  %v6286_v47 = vrot.slane %v4498_v17, %v6069_v26  ;;  %v608_v56 = vcombine.low %v6086_v31, %v6104_v36 }
  0x28   :  { %5226 = vmatpush3.bf16.msra.mxu0 %v6079_v28  ;;  %5246 = vmatpush3.bf16.msra.mxu1 %v6111_v39  ;;  %v282_v40 = vor.u32 %v281_v16, %v277_v3  ;;  %v273_v50 = vrot.slane %v272_v23, 2  ;;  %v291_v28 = vrot.slane %v7688_v43, 6  ;;  %v607_v39 = vcombine.low %v6083_v30, %v6100_v35  ;;  %v5779_v16 = vld [vmem:[%s7670_s1 + $0x18] sm:$0xff]  }
  0x29   :  { %5227 = vmatprep.subr.bf16.mxu0 %v5775_v51  ;;  %5247 = vmatprep.subr.bf16.mxu1 %v5776_v63  ;;  %v268_v48 = vsel %vm6135_vm6, %v263_v38, %v267_v58  ;;  %v6298_v62 = vcombine.high %v6286_v47, %v6286_v47  ;;  %v7686_v2 = vshll.u32 %v6286_v47, 16  ;;  %v7687_v38 = vshrl.u32 %v6286_v47, 16 }
  0x2a   :  { %v283_v55 = vrot.slane %v282_v40, 2  ;;  %v278_v58 = vsel %vm6135_vm6, %v273_v50, %v277_v3  ;;  %v356_v17 = vcombine.low %v258_v25, %v268_v48  ;;  %v292_v23 = vor.u32 %v291_v28, %v287_v19  ;;  %v5780_v3 = vld [vmem:[%s7671_s2 + $0x18] sm:$0xff]  }
  0x2b   :  { %v297_v4 = vrot.slane %v7686_v2, 7  ;;  %v7685_v54 = vshll.u32 %v6298_v62, 16  ;;  %v622_v48 = vrot.slane %v608_v56, %v6069_v26  ;;  %v6337_v13 = vor.u32 %v6266_v11, %v201_v42  ;;  %v5782_v42 = vld [vmem:[%s7671_s2 + $0x20] sm:$0xff]  }
  0x2c   :  { %5228 = vmatpush3.bf16.msra.mxu0 %v5775_v51  ;;  %5248 = vmatpush3.bf16.msra.mxu1 %v5776_v63  ;;  %v288_v40 = vsel %vm6135_vm6, %v283_v55, %v287_v19  ;;  %v364_v50 = vrot.slane %v356_v17, %v6069_v26  ;;  %v293_v28 = vrot.slane %v292_v23, 2  ;;  %v301_v51 = vrot.slane %v7687_v38, 6 }
  0x2d   :  { %5229 = vmatprep.subr.bf16.mxu0 %v5777_v20  ;;  %5249 = vmatprep.subr.bf16.mxu1 %v5778_v6  ;;  %v357_v25 = vcombine.low %v278_v58, %v288_v40  ;;  %v307_v63 = vrot.slane %v7685_v54, 7  ;;  %v615_v19 = vrot.slane %v607_v39, %v6069_v26  ;;  %v624_v55 = vcombine.low %v6089_v32, %v6164_v14  ;;  %v5803_v39 = vld [vmem:[%s7670_s1 + $0xa8] sm:$0xff]  }
  0x2e   :  { %v302_v17 = vor.u32 %v301_v51, %v297_v4  ;;  %v4563_v56 = vrot.slane %v6083_v30, 9  ;;  %v887_v51 = vrot.slane %v6100_v35, 7  ;;  %v625_v2 = vcombine.low %v6092_v33, %v6096_v34 }
  0x2f   :  { %v371_v58 = vrot.slane %v357_v25, %v6069_v26  ;;  %v5781_v25 = vld [vmem:[%s7670_s1 + $0x20] sm:$0xff]   ;;  %v623_v54 = vcombine.low %v615_v19, %v622_v48  ;;  %v893_v19 = vrot.slane %v6104_v36, 7  ;;  %v896_v43 = vrot.slane %v6089_v32, 7 }
  0x30   :  { %5230 = vmatpush3.bf16.msra.mxu0 %v5777_v20  ;;  %5250 = vmatpush3.bf16.msra.mxu1 %v5778_v6  ;;  %v298_v20 = vsel %vm6135_vm6, %v293_v28, %v297_v4  ;;  %v303_v6 = vrot.slane %v302_v17, 2  ;;  %v641_v4 = vcombine.low %v6168_v15, %v6193_v52  ;;  %v889_v28 = vrot.slane %v887_v51, 2 }
  0x31   :  { %5231 = vmatprep.subr.bf16.mxu0 %v5779_v16  ;;  %5251 = vmatprep.subr.bf16.mxu1 %v5780_v3  ;;  %v372_v40 = vcombine.low %v364_v50, %v371_v58  ;;  %v632_v50 = vrot.slane %v624_v55, %v6069_v26  ;;  %v890_v58 = vrot.slane %v6086_v31, 7  ;;  %v888_v55 = vsel %vm6341_vm0, %v4563_v56, %v887_v51  ;;  %v5784_v56 = vld [vmem:[%s7671_s2 + $0x28] sm:$0xff]  }
  0x32   :  { %v308_v38 = vsel %vm6135_vm6, %v303_v6, %v307_v63  ;;  %v898_v51 = vrot.slane %v896_v43, 2  ;;  %v905_v53 = vrot.slane %v6174_v18, 7  ;;  %v4564_v49 = vrot.slane %v6096_v34, 9  ;;  %v5785_v18 = vld [vmem:[%s7670_s1 + $0x60] sm:$0xff]  }
  0x33   :  { %5201 = vmatprep.mubr.msk.bf16.mxu0 %vm417_vm7, %v372_v40  ;;  %5221 = vmatprep.mubr.msk.bf16.mxu1 %vm417_vm7, %v372_v40  ;;  %v373_v48 = vcombine.low %v298_v20, %v308_v38  ;;  %v892_v17 = vrot.slane %v890_v58, 2  ;;  %v891_v63 = vsel %vm6341_vm0, %v889_v28, %v890_v58  ;;  %v895_v40 = vrot.slane %v893_v19, 2 }
  0x34   :  { %5232 = vmatpush3.bf16.msra.mxu0 %v5779_v16  ;;  %5252 = vmatpush3.bf16.msra.mxu1 %v5780_v3  ;;  %v899_v16 = vrot.slane %v6164_v14, 7  ;;  %v902_v38 = vrot.slane %v6092_v33, 7  ;;  %v642_v20 = vcombine.low %v6223_v24, %v6235_v46  ;;  %v639_v58 = vrot.slane %v625_v2, %v6069_v26 }
  0x35   :  { %5233 = vmatprep.subr.bf16.mxu0 %v5781_v25  ;;  %5253 = vmatprep.subr.bf16.mxu1 %v5782_v42  ;;  %v380_v3 = vrot.slane %v373_v48, %v6069_v26  ;;  %v894_v6 = vsel %vm6341_vm0, %v892_v17, %v893_v19  ;;  %v897_v28 = vsel %vm6341_vm0, %v895_v40, %v896_v43  ;;  %v909_v43 = vrot.slane %v6168_v15, 7 }
  0x36   :  { %v901_v59 = vrot.slane %v899_v16, 2  ;;  %v904_v44 = vrot.slane %v902_v38, 2  ;;  %v942_v48 = vcombine.low %v888_v55, %v891_v63  ;;  %v943_v29 = vcombine.low %v894_v6, %v897_v28 }
  0x37   :  { %5202 = vmatmul.mubr.msk.bf16.gmra.mrb[4].mxu0 %vm417_vm7, %v380_v3  ;;  %5222 = vmatmul.mubr.msk.bf16.gmra.mrb[4].mxu1 %vm417_vm7, %v380_v3  ;;  %v649_v19 = vrot.slane %v641_v4, %v6069_v26  ;;  %v658_v2 = vcombine.low %v6247_v27, %v6286_v47  ;;  %v912_v17 = vrot.slane %v6193_v52, 7  ;;  %v656_v15 = vrot.slane %v642_v20, %v6069_v26 }
  0x38   :  { %5234 = vmatpush3.bf16.msra.mxu0 %v5781_v25  ;;  %5254 = vmatpush3.bf16.msra.mxu1 %v5782_v42  ;;  %v5786_v25 = vld [vmem:[%s7671_s2 + $0x60] sm:$0xff]   ;;  %v900_v42 = vsel %vm6341_vm0, %v898_v51, %v899_v16  ;;  %v903_v4 = vsel %vm6341_vm0, %v901_v59, %v902_v38  ;;  %v915_v63 = vrot.slane %v6223_v24, 7  ;;  %v6416_v40 = vrot.slane %v236_v45, 9  ;;  %v5787_v16 = vld [vmem:[%s7670_s1 + $0x68] sm:$0xff]  }
  0x39   :  { %5235 = vmatprep.subr.bf16.mxu0 %v5783_v57  ;;  %5255 = vmatprep.subr.bf16.mxu1 %v5784_v56  ;;  %v640_v3 = vcombine.low %v632_v50, %v639_v58  ;;  %v911_v6 = vrot.slane %v909_v43, 2  ;;  %v914_v28 = vrot.slane %v912_v17, 2  ;;  %v950_v20 = vrot.slane %v942_v48, %v6069_v26  ;;  %v5788_v51 = vld [vmem:[%s7671_s2 + $0x68] sm:$0xff]  }
  0x3a   :  { %5237 = vmatprep.mubr.msk.bf16.mxu0 %vm417_vm7, %v623_v54  ;;  %5257 = vmatprep.mubr.msk.bf16.mxu1 %vm417_vm7, %v623_v54  ;;  %v957_v59 = vrot.slane %v943_v29, %v6069_v26  ;;  %v918_v38 = vrot.slane %v6235_v46, 7  ;;  %v921_v45 = vrot.slane %v6247_v27, 7  ;;  %v1268_v50 = vrot.slane %v6200_v60, 2 }
  0x3b   :  { %v6440_v29 = vsel %vm6341_vm0, %v904_v44, %v905_v53  ;;  %v6444_v58 = vsel %vm6341_vm0, %v4564_v49, %v909_v43  ;;  %v959_v48 = vcombine.low %v900_v42, %v903_v4  ;;  %v1272_v55 = vrot.slane %v6202_v61, 2  ;;  %v5789_v61 = vld [vmem:[%s7670_s1 + $0x70] sm:$0xff]  }
  0x3c   :  { %5236 = vmatpush3.bf16.msra.mxu0 %v5783_v57  ;;  %5256 = vmatpush3.bf16.msra.mxu1 %v5784_v56  ;;  %v657_v60 = vcombine.low %v649_v19, %v656_v15  ;;  %v665_v57 = vrot.slane %v658_v2, %v6069_v26  ;;  %v917_v56 = vrot.slane %v915_v63, 2  ;;  %v6450_v23 = vsel %vm6341_vm0, %v911_v6, %v912_v17  ;;  %v5790_v53 = vld [vmem:[%s7671_s2 + $0x70] sm:$0xff]  }
  0x3d   :  { %5265 = vmatprep.subr.bf16.mxu0 %v5785_v18  ;;  %5285 = vmatprep.subr.bf16.mxu1 %v5786_v25  ;;  %v6454_v44 = vsel %vm6341_vm0, %v914_v28, %v915_v63  ;;  %v4609_v49 = vrot.slane %v162_v37, 9  ;;  %v6466_v19 = vcombine.low %v950_v20, %v957_v59  ;;  %v960_v2 = vcombine.low %v6440_v29, %v6444_v58  ;;  %v5791_v28 = vld [vmem:[%s7670_s1 + $0x78] sm:$0xff]  }
  0x3e   :  { %v920_v43 = vrot.slane %v918_v38, 2  ;;  %v6470_v30 = vrot.slane %v921_v45, 2  ;;  %v6479_v17 = vrot.slane %v959_v48, %v6069_v26  ;;  %v1252_v42 = vrot.slane %v6141_v0, 2  ;;  %v5800_v37 = vld [vmem:[%s7671_s2 + $0x98] sm:$0xff]  }
  0x3f   :  { %5238 = vmatmul.mubr.msk.bf16.vlgmr.msra.gmra.mrb[0].mxu0 %vm417_vm7, %v640_v3  ;;  %5258 = vmatmul.mubr.msk.bf16.vlgmr.msra.gmra.mrb[0].mxu1 %vm417_vm7, %v640_v3  ;;  %v1251_v15 = vsel %vm6474_vm5, %v4609_v49, %v6150_v8  ;;  %v1256_v4 = vrot.slane %v6143_v1, 2  ;;  %v6488_v63 = vsel %vm6341_vm0, %v917_v56, %v918_v38  ;;  %v1260_v3 = vrot.slane %v6145_v5, 2  ;;  %v5793_v49 = vld [vmem:[%s7670_s1 + $0x80] sm:$0xff]  }
  0x40   :  { %5266 = vmatpush3.bf16.msra.mxu0 %v5785_v18  ;;  %5286 = vmatpush3.bf16.msra.mxu1 %v5786_v25  ;;  %v976_v18 = vcombine.low %v6450_v23, %v6454_v44  ;;  %v924_v25 = vrot.slane %v6286_v47, 7  ;;  %v927_v0 = vrot.slane %v6298_v62, 7  ;;  %v1255_v1 = vsel %vm6474_vm5, %v1252_v42, %v6153_v9 }
  0x41   :  { %5267 = vmatprep.subr.bf16.mxu0 %v5787_v16  ;;  %5287 = vmatprep.subr.bf16.mxu1 %v5788_v51  ;;  %v1259_v8 = vsel %vm6474_vm5, %v1256_v4, %v6158_v12  ;;  %v7708_v6 = vrot.slane %v6266_v11, 2  ;;  %v6513_v20 = vsel %vm6341_vm0, %v920_v43, %v921_v45  ;;  %v1263_v9 = vsel %vm6474_vm5, %v1260_v3, %v6337_v13  ;;  %v5792_v13 = vld [vmem:[%s7671_s2 + $0x78] sm:$0xff]   ;;  %v5794_v3 = vld [vmem:[%s7671_s2 + $0x80] sm:$0xff]  }
  0x42   :  { %5241 = vmatprep.mubr.msk.bf16.mxu0 %vm417_vm7, %v657_v60  ;;  %5261 = vmatprep.mubr.msk.bf16.mxu1 %vm417_vm7, %v657_v60  ;;  %v1322_v59 = vcombine.low %v1251_v15, %v1255_v1  ;;  %v1271_v12 = vsel %vm6474_vm5, %v1268_v50, %v6213_v10  ;;  %v1277_v11 = vsel %vm6474_vm5, %v1272_v55, %v6227_v22  ;;  %v1283_v38 = vrot.slane %v6219_v21, 2 }
  0x43   :  { %v1267_v5 = vsel %vm6474_vm5, %v7708_v6, %v6210_v7  ;;  %v1323_v7 = vcombine.low %v1259_v8, %v1263_v9  ;;  %v7709_v45 = vshrl.u32 %v6193_v52, 16  ;;  %v7710_v22 = vshrl.u32 %v6223_v24, 16 }
  0x44   :  { %5268 = vmatpush3.bf16.msra.mxu0 %v5787_v16  ;;  %5288 = vmatpush3.bf16.msra.mxu1 %v5788_v51  ;;  %v1330_v10 = vrot.slane %v1322_v59, %v6069_v26  ;;  %v1282_v16 = vsel %vm6474_vm5, %v6416_v40, %v6232_v41  ;;  %v1339_v50 = vcombine.low %v1267_v5, %v1271_v12  ;;  %v7711_v55 = vshll.u32 %v6193_v52, 16 }
  0x45   :  { %v1284_v54 = vrot.slane %v7709_v45, 7  ;;  %5269 = vmatprep.subr.bf16.mxu0 %v5789_v61  ;;  %5289 = vmatprep.subr.bf16.mxu1 %v5790_v53  ;;  %v1288_v21 = vrot.slane %v7710_v22, 7  ;;  %v1337_v51 = vrot.slane %v1323_v7, %v6069_v26  ;;  %v1340_v48 = vcombine.low %v1277_v11, %v1282_v16  ;;  %v5795_v16 = vld [vmem:[%s7670_s1 + $0x88] sm:$0xff]  }
  0x46   :  { %v1347_v41 = vrot.slane %v1339_v50, %v6069_v26  ;;  %v7712_v40 = vshll.u32 %v6223_v24, 16  ;;  %v7713_v42 = vshrl.u32 %v6235_v46, 16  ;;  %v7714_v6 = vshrl.u32 %v6247_v27, 16  ;;  %v5796_v50 = vld [vmem:[%s7671_s2 + $0x88] sm:$0xff]  }
  0x47   :  { %v1285_v60 = vor.u32 %v1284_v54, %v7711_v55  ;;  %v1287_v56 = vrot.slane %v1284_v54, 2  ;;  %5242 = vmatmul.mubr.msk.bf16.gmra.mrb[4].mxu0 %vm417_vm7, %v665_v57  ;;  %5262 = vmatmul.mubr.msk.bf16.gmra.mrb[4].mxu1 %vm417_vm7, %v665_v57  ;;  %v1291_v15 = vrot.slane %v1288_v21, 2  ;;  %v6553_v1 = vcombine.low %v1330_v10, %v1337_v51 }
  0x48   :  { %v1289_v43 = vor.u32 %v1288_v21, %v7712_v40  ;;  %v1292_v4 = vrot.slane %v7713_v42, 7  ;;  %5270 = vmatpush3.bf16.msra.mxu0 %v5789_v61  ;;  %5290 = vmatpush3.bf16.msra.mxu1 %v5790_v53  ;;  %v1354_v8 = vrot.slane %v1340_v48, %v6069_v26  ;;  %v1296_v5 = vrot.slane %v7714_v6, 7 }
  0x49   :  { %v1286_v57 = vsel %vm6474_vm5, %v1283_v38, %v1285_v60  ;;  %5271 = vmatprep.subr.bf16.mxu0 %v5791_v28  ;;  %5291 = vmatprep.subr.bf16.mxu1 %v5792_v13  ;;  %v7715_v53 = vshll.u32 %v6235_v46, 16  ;;  %v7716_v12 = vshrl.u32 %v6286_v47, 16  ;;  %v926_v11 = vrot.slane %v924_v25, 2 }
  0x4a   :  { %v1290_v61 = vsel %vm6474_vm5, %v1287_v56, %v1289_v43  ;;  %v1295_v59 = vrot.slane %v1292_v4, 2  ;;  %5277 = vmatprep.mubr.msk.bf16.mxu0 %vm417_vm7, %v6466_v19  ;;  %5297 = vmatprep.mubr.msk.bf16.mxu1 %vm417_vm7, %v6466_v19  ;;  %v6572_v38 = vcombine.low %v1347_v41, %v1354_v8  ;;  %v7717_v45 = vshll.u32 %v6247_v27, 16 }
  0x4b   :  { %v1293_v9 = vor.u32 %v1292_v4, %v7715_v53  ;;  %v1300_v7 = vrot.slane %v7716_v12, 7  ;;  %v1356_v10 = vcombine.low %v1286_v57, %v1290_v61  ;;  %v1299_v22 = vrot.slane %v1296_v5, 2  ;;  %v5799_v57 = vld [vmem:[%s7670_s1 + $0x98] sm:$0xff]   ;;  %v5801_v53 = vld [vmem:[%s7670_s1 + $0xa0] sm:$0xff]   ;;  %v5806_v12 = vld [vmem:[%s7671_s2 + $0xb0] sm:$0xff]  }
  0x4c   :  { %v1297_v54 = vor.u32 %v1296_v5, %v7717_v45  ;;  %v7718_v21 = vshll.u32 %v6286_v47, 16  ;;  %v1304_v48 = vshrl.u32 %v6298_v62, 16  ;;  %5272 = vmatpush3.bf16.msra.mxu0 %v5791_v28  ;;  %5292 = vmatpush3.bf16.msra.mxu1 %v5792_v13  ;;  %v974_v55 = vrot.slane %v960_v2, %v6069_v26  ;;  %v5809_v45 = vld [vmem:[%s7670_s1 + $0xc0] sm:$0xff]  }
  0x4d   :  { %v1294_v19 = vsel %vm6474_vm5, %v1291_v15, %v1293_v9  ;;  %v977_v60 = vcombine.low %v6488_v63, %v6513_v20  ;;  %5273 = vmatprep.subr.bf16.mxu0 %v5793_v49  ;;  %5293 = vmatprep.subr.bf16.mxu1 %v5794_v3  ;;  %v1364_v40 = vrot.slane %v1356_v10, %v6069_v26  ;;  %v1303_v43 = vrot.slane %v1300_v7, 2  ;;  %v5797_v63 = vld [vmem:[%s7670_s1 + $0x90] sm:$0xff]   ;;  %v5812_v10 = vld [vmem:[%s7671_s2 + $0xc8] sm:$0xff]  }
  0x4e   :  { %v1301_v51 = vor.u32 %v1300_v7, %v7718_v21  ;;  %v1298_v56 = vsel %vm6474_vm5, %v1295_v59, %v1297_v54  ;;  %v1306_v15 = vrot.slane %v1304_v48, 7  ;;  %v984_v28 = vrot.slane %v976_v18, %v6069_v26  ;;  %v5798_v20 = vld [vmem:[%s7671_s2 + $0x90] sm:$0xff]   ;;  %v5807_v7 = vld [vmem:[%s7670_s1 + $0xb8] sm:$0xff]   ;;  %v5811_v54 = vld [vmem:[%s7670_s1 + $0xc8] sm:$0xff]  }
  0x4f   :  { %v1357_v41 = vcombine.low %v1294_v19, %v1298_v56  ;;  %v1650_v29 = vcombine.low %v6164_v14, %v6092_v33  ;;  %v4667_v58 = vcombine.high %v6092_v33, %v6096_v34  ;;  %v1667_v2 = vcombine.low %v6193_v52, %v6223_v24  ;;  %v5805_v59 = vld [vmem:[%s7670_s1 + $0xb0] sm:$0xff]   ;;  %v5818_v48 = vld [vmem:[%s7671_s2 + $0xe0] sm:$0xff]  }
  0x50   :  { %v6615_v44 = vsel %vm6474_vm5, %v1299_v22, %v1301_v51  ;;  %v7719_v14 = vshll.u32 %v6298_v62, 16  ;;  %v1668_v34 = vcombine.low %v6235_v46, %v6247_v27  ;;  %5274 = vmatpush3.bf16.msra.mxu0 %v5793_v49  ;;  %5294 = vmatpush3.bf16.msra.mxu1 %v5794_v3  ;;  %v991_v13 = vrot.slane %v977_v60, %v6069_v26  ;;  %v5813_v19 = vld [vmem:[%s7670_s1 + $0xd0] sm:$0xff]   ;;  %v5817_v51 = vld [vmem:[%s7670_s1 + $0xe0] sm:$0xff]   ;;  %v5820_v60 = vld [vmem:[%s7671_s2 + $0xe8] sm:$0xff]  }
  0x51   :  { %v1371_v23 = vrot.slane %v1357_v41, %v6069_v26  ;;  %v1658_v52 = vrot.slane %v1650_v29, %v6069_v26  ;;  %v1665_v24 = vrot.slane %v4667_v58, %v6069_v26  ;;  %v1675_v18 = vrot.slane %v1667_v2, %v6069_v26  ;;  %5275 = vmatprep.subr.bf16.mxu0 %v5795_v16  ;;  %v5814_v22 = vld [vmem:[%s7671_s2 + $0xd0] sm:$0xff]  }
  0x52   :  { %v1307_v33 = vor.u32 %v1306_v15, %v7719_v14  ;;  %5295 = vmatprep.subr.bf16.mxu1 %v5796_v50  ;;  %v1682_v49 = vrot.slane %v1668_v34, %v6069_v26  ;;  %v1684_v3 = vcombine.low %v6286_v47, %v6298_v62  ;;  %v975_v8 = vcombine.low %v6479_v17, %v974_v55  ;;  %v5819_v55 = vld [vmem:[%s7670_s1 + $0xe8] sm:$0xff]  }
  0x53   :  { %v6625_v42 = vcombine.low %v1364_v40, %v1371_v23  ;;  %v6633_v27 = vcombine.low %v1658_v52, %v1665_v24  ;;  %v925_v6 = vsel %vm6341_vm0, %v6470_v30, %v924_v25  ;;  %v928_v17 = vsel %vm6341_vm0, %v926_v11, %v927_v0  ;;  %v5802_v30 = vld [vmem:[%s7671_s2 + $0xa0] sm:$0xff]   ;;  %v5804_v0 = vld [vmem:[%s7671_s2 + $0xa8] sm:$0xff]   ;;  %v5808_v11 = vld [vmem:[%s7671_s2 + $0xb8] sm:$0xff]  }
  0x54   :  { %v6629_v4 = vsel %vm6474_vm5, %v1303_v43, %v1307_v33  ;;  %5276 = vmatpush3.bf16.msra.mxu0 %v5795_v16  ;;  %5296 = vmatpush3.bf16.msra.mxu1 %v5796_v50  ;;  %v6654_v5 = vcombine.low %v1675_v18, %v1682_v49  ;;  %v992_v61 = vcombine.low %v984_v28, %v991_v13 }
  0x55   :  { %v1373_v46 = vcombine.low %v6615_v44, %v6629_v4  ;;  %5305 = vmatprep.subr.bf16.mxu0 %v5797_v63  ;;  %5325 = vmatprep.subr.bf16.mxu1 %v5798_v20  ;;  %v993_v25 = vcombine.low %v925_v6, %v928_v17  ;;  %v1633_v16 = vcombine.low %v6100_v35, %v6086_v31  ;;  %v5815_v35 = vld [vmem:[%s7670_s1 + $0xd8] sm:$0xff]  }
  0x56   :  { %v1634_v50 = vcombine.low %v6104_v36, %v6089_v32  ;;  %v5816_v36 = vld [vmem:[%s7671_s2 + $0xd8] sm:$0xff]  }
  0x57   :  { %5278 = vmatmul.mubr.msk.bf16.vlgmr.msra.gmra.mrb[0].mxu0 %vm417_vm7, %v975_v8  ;;  %5298 = vmatmul.mubr.msk.bf16.vlgmr.msra.gmra.mrb[0].mxu1 %vm417_vm7, %v975_v8  ;;  %v1000_v9 = vrot.slane %v993_v25, %v6069_v26  ;;  %v1641_v31 = vrot.slane %v1633_v16, %v6069_v26 }
  0x58   :  { %5306 = vmatpush3.bf16.msra.mxu0 %v5797_v63  ;;  %5326 = vmatpush3.bf16.msra.mxu1 %v5798_v20  ;;  %v1648_v32 = vrot.slane %v1634_v50, %v6069_v26 }
  0x59   :  { %5307 = vmatprep.subr.bf16.mxu0 %v5799_v57  ;;  %5327 = vmatprep.subr.bf16.mxu1 %v5800_v37 }
  0x5a   :  { %5281 = vmatprep.mubr.msk.bf16.mxu0 %vm417_vm7, %v992_v61  ;;  %5301 = vmatprep.mubr.msk.bf16.mxu1 %vm417_vm7, %v992_v61  ;;  %v1649_v21 = vcombine.low %v1641_v31, %v1648_v32 }
  0x5c   :  { %5308 = vmatpush3.bf16.msra.mxu0 %v5799_v57  ;;  %5328 = vmatpush3.bf16.msra.mxu1 %v5800_v37 }
  0x5d   :  { %5309 = vmatprep.subr.bf16.mxu0 %v5801_v53  ;;  %5329 = vmatprep.subr.bf16.mxu1 %v5802_v30 }
  0x5f   :  { %5282 = vmatmul.mubr.msk.bf16.gmra.mrb[4].mxu0 %vm417_vm7, %v1000_v9  ;;  %5302 = vmatmul.mubr.msk.bf16.gmra.mrb[4].mxu1 %vm417_vm7, %v1000_v9 }
  0x60   :  { %5310 = vmatpush3.bf16.msra.mxu0 %v5801_v53  ;;  %5330 = vmatpush3.bf16.msra.mxu1 %v5802_v30 }
  0x61   :  { %5311 = vmatprep.subr.bf16.mxu0 %v5803_v39  ;;  %5331 = vmatprep.subr.bf16.mxu1 %v5804_v0 }
  0x62   :  { %5317 = vmatprep.mubr.msk.bf16.mxu0 %vm417_vm7, %v6553_v1  ;;  %5337 = vmatprep.mubr.msk.bf16.mxu1 %vm417_vm7, %v6553_v1  ;;  %v5810_v1 = vld [vmem:[%s7671_s2 + $0xc0] sm:$0xff]  }
  0x64   :  { %5312 = vmatpush3.bf16.msra.mxu0 %v5803_v39  ;;  %5332 = vmatpush3.bf16.msra.mxu1 %v5804_v0 }
  0x65   :  { %5313 = vmatprep.subr.bf16.mxu0 %v5805_v59  ;;  %5333 = vmatprep.subr.bf16.mxu1 %v5806_v12 }
  0x68   :  { %5314 = vmatpush3.bf16.msra.mxu0 %v5805_v59  ;;  %5334 = vmatpush3.bf16.msra.mxu1 %v5806_v12 }
  0x69   :  { %5315 = vmatprep.subr.bf16.mxu0 %v5807_v7  ;;  %5335 = vmatprep.subr.bf16.mxu1 %v5808_v11 }
  0x6c   :  { %5316 = vmatpush3.bf16.msra.mxu0 %v5807_v7  ;;  %5336 = vmatpush3.bf16.msra.mxu1 %v5808_v11 }
  0x6d   :  { %5345 = vmatprep.subr.bf16.mxu0 %v5809_v45  ;;  %5365 = vmatprep.subr.bf16.mxu1 %v5810_v1 }
  0x6f   :  { %5318 = vmatmul.mubr.msk.bf16.vlgmr.msra.gmra.mrb[0].mxu0 %vm417_vm7, %v6572_v38  ;;  %5338 = vmatmul.mubr.msk.bf16.vlgmr.msra.gmra.mrb[0].mxu1 %vm417_vm7, %v6572_v38  ;;  %v1380_v38 = vrot.slane %v1373_v46, %v6069_v26 }
  0x70   :  { %5346 = vmatpush3.bf16.msra.mxu0 %v5809_v45  ;;  %5366 = vmatpush3.bf16.msra.mxu1 %v5810_v1 }
  0x71   :  { %5347 = vmatprep.subr.bf16.mxu0 %v5811_v54  ;;  %5367 = vmatprep.subr.bf16.mxu1 %v5812_v10 }
  0x72   :  { %5321 = vmatprep.mubr.msk.bf16.mxu0 %vm417_vm7, %v6625_v42  ;;  %5341 = vmatprep.mubr.msk.bf16.mxu1 %vm417_vm7, %v6625_v42 }
  0x74   :  { %5348 = vmatpush3.bf16.msra.mxu0 %v5811_v54  ;;  %5368 = vmatpush3.bf16.msra.mxu1 %v5812_v10 }
  0x75   :  { %5349 = vmatprep.subr.bf16.mxu0 %v5813_v19  ;;  %5369 = vmatprep.subr.bf16.mxu1 %v5814_v22 }
  0x77   :  { %5322 = vmatmul.mubr.msk.bf16.gmra.mrb[4].mxu0 %vm417_vm7, %v1380_v38  ;;  %5342 = vmatmul.mubr.msk.bf16.gmra.mrb[4].mxu1 %vm417_vm7, %v1380_v38 }
  0x78   :  { %5350 = vmatpush3.bf16.msra.mxu0 %v5813_v19  ;;  %5370 = vmatpush3.bf16.msra.mxu1 %v5814_v22 }
  0x79   :  { %5351 = vmatprep.subr.bf16.mxu0 %v5815_v35  ;;  %5371 = vmatprep.subr.bf16.mxu1 %v5816_v36 }
  0x7a   :  { %5357 = vmatprep.mubr.msk.bf16.mxu0 %vm417_vm7, %v1649_v21  ;;  %5377 = vmatprep.mubr.msk.bf16.mxu1 %vm417_vm7, %v1649_v21 }
  0x7c   :  { %5352 = vmatpush3.bf16.msra.mxu0 %v5815_v35  ;;  %5372 = vmatpush3.bf16.msra.mxu1 %v5816_v36 }
  0x7d   :  { %5353 = vmatprep.subr.bf16.mxu0 %v5817_v51  ;;  %5373 = vmatprep.subr.bf16.mxu1 %v5818_v48 }
  0x80   :  { %5354 = vmatpush3.bf16.msra.mxu0 %v5817_v51  ;;  %5374 = vmatpush3.bf16.msra.mxu1 %v5818_v48 }
  0x81   :  { %5355 = vmatprep.subr.bf16.mxu0 %v5819_v55  ;;  %5375 = vmatprep.subr.bf16.mxu1 %v5820_v60 }
  0x82   :  { %18 = vsyncpa [#allocation3], 0  ;;  %v1691_v56 = vrot.slane %v1684_v3, %v6069_v26  ;;  %v5821_v41 = vld [vmem:[%s7673_s4 + $0x2c] sm:$0xff]   ;;  %v5823_v47 = vld [vmem:[%s7673_s4 + $0x34] sm:$0xff]   ;;  %vm2537_vm6 = vcmask 1041408   ;;  %vm2455_vm8 = vcmask 1041409  }
  0x83   :  { %v5822_v40 = vld [vmem:[%s7674_s5 + $0x2c] sm:$0xff]   ;;  %v5824_v62 = vld [vmem:[%s7674_s5 + $0x34] sm:$0xff]   ;;  %v5825_v43 = vld [vmem:[%s7673_s4 + $0x3c] sm:$0xff]   ;;  %vm2461_vm12 = vcmask 1043459   ;;  %vm2467_vm13 = vcmask 1045509   ;;  %vm2473_vm14 = vcmask 1047559  }
  0x84   :  { %5356 = vmatpush3.bf16.msra.mxu0 %v5819_v55  ;;  %5376 = vmatpush3.bf16.msra.mxu1 %v5820_v60  ;;  %v5826_v15 = vld [vmem:[%s7674_s5 + $0x3c] sm:$0xff]   ;;  %v5827_v28 = vld [vmem:[%s7673_s4 + $0x44] sm:$0xff]   ;;  %v5829_v58 = vld [vmem:[%s7673_s4 + $0x4c] sm:$0xff]   ;;  %vm2530_vm15 = vcmask 687104   ;;  %vm4336_vm0 = vcmask 1043456   ;;  %vm4332_vm1 = vcmask 982016  }
  0x85   :  { %5385 = vmatprep.subr.bf16.mxu0 %v5821_v41  ;;  %5401 = vmatprep.subr.bf16.mxu1 %v5822_v40  ;;  %v5828_v29 = vld [vmem:[%s7674_s5 + $0x44] sm:$0xff]   ;;  %v5830_v2 = vld [vmem:[%s7674_s5 + $0x4c] sm:$0xff]   ;;  %v5831_v63 = vld [vmem:[%s7673_s4 + $0x54] ss:$0 sps:$4 sm:$0x33]   ;;  %s5947_s21 = smov [#allocation2]  }
  0x86   :  { %v5832_v20 = vld [vmem:[%s7674_s5 + $0x54] ss:$0 sps:$4 sm:$0x33]   ;;  %v2539_v23 = vsel %vm2537_vm6, %v5831_v63, 0  ;;  %v6806_v14 = vld [vmem:[%s7673_s4] sm:$0xff]   ;;  %s4487_s22 = sshll.u32 %s5947_s21, 4  ;;  %s4488_s22 = int_to_ptr.vmem [resolvable:$true] %s4487_s22 }
  0x87   :  { %5358 = vmatmul.mubr.msk.bf16.vlgmr.msra.gmra.mrb[0].mxu0 %vm417_vm7, %v6633_v27  ;;  %5378 = vmatmul.mubr.msk.bf16.vlgmr.msra.gmra.mrb[0].mxu1 %vm417_vm7, %v6633_v27  ;;  %v2635_v44 = vsel %vm2537_vm6, %v5832_v20, 0  ;;  %v6811_v33 = vld [vmem:[%s7674_s5] sm:$0xff]   ;;  %vm4479_vm2 = vcmask 74752   ;;  %p5925_p1 = scmp.lt.s32.totalorder %s4488_s22, %s4488_s22 }
  0x88   :  { %5361 = vmatprep.mubr.msk.bf16.mxu0 %vm417_vm7, %v6654_v5  ;;  %5381 = vmatprep.mubr.msk.bf16.mxu1 %vm417_vm7, %v6654_v5 }
  0x89   :  { %5386 = vmatpush3.bf16.msra.mxu0 %v5821_v41  ;;  %5402 = vmatpush3.bf16.msra.mxu1 %v5822_v40 }
  0x8a   :  { %5387 = vmatprep.subr.bf16.mxu0 %v5823_v47  ;;  %5403 = vmatprep.subr.bf16.mxu1 %v5824_v62 }
  0x8d   :  { %5388 = vmatpush3.bf16.msra.mxu0 %v5823_v47  ;;  %5404 = vmatpush3.bf16.msra.mxu1 %v5824_v62 }
  0x8e   :  { %5389 = vmatprep.subr.bf16.mxu0 %v5825_v43  ;;  %5405 = vmatprep.subr.bf16.mxu1 %v5826_v15 }
  0x8f   :  { %5362 = vmatmul.mubr.msk.bf16.gmra.mrb[4].mxu0 %vm417_vm7, %v1691_v56  ;;  %5382 = vmatmul.mubr.msk.bf16.gmra.mrb[4].mxu1 %vm417_vm7, %v1691_v56  ;;  %vm2092_vm7 = vcmask 680960  }
  0x91   :  { %5390 = vmatpush3.bf16.msra.mxu0 %v5825_v43  ;;  %5406 = vmatpush3.bf16.msra.mxu1 %v5826_v15 }
  0x92   :  { %5391 = vmatprep.subr.bf16.mxu0 %v5827_v28  ;;  %5407 = vmatprep.subr.bf16.mxu1 %v5828_v29 }
  0x95   :  { %5392 = vmatpush3.bf16.msra.mxu0 %v5827_v28  ;;  %5408 = vmatpush3.bf16.msra.mxu1 %v5828_v29 }
  0x96   :  { %5393 = vmatprep.subr.bf16.mxu0 %v5829_v58  ;;  %5409 = vmatprep.subr.bf16.mxu1 %v5830_v2 }
  0x99   :  { %5394 = vmatpush3.bf16.msra.mxu0 %v5829_v58  ;;  %5410 = vmatpush3.bf16.msra.mxu1 %v5830_v2 }
  0x9a   :  { %5747 = vmatprep.subr.msk.bf16.mxu0 %vm2537_vm6, %v5831_v63  ;;  %5748 = vmatprep.subr.msk.bf16.mxu1 %vm2537_vm6, %v5832_v20 }
  0x9d   :  { %5396 = vmatpush3.bf16.msra.mxu0 %v2539_v23  ;;  %5412 = vmatpush3.bf16.msra.mxu1 %v2635_v44 }
  0x9e   :  { %5417 = vmatprep.subr.bf16.mxu0 %v6806_v14  ;;  %5433 = vmatprep.subr.bf16.mxu1 %v6811_v33 }
 0x15a   :  { %v5359_v34 = vpop.f32.mrb[0].mxu0  ;;  %v5379_v52 = vpop.f32.mrb[0].mxu1 }
 0x15b   :  { %v1933_v24 = vmax.f32 %v5359_v34, %v5379_v52  ;;  %v1774_v18 = vpop.f32.mrb[1].mxu0  ;;  %v1887_v13 = vpop.f32.mrb[1].mxu1 }
 0x15c   :  { %v1931_v42 = vmax.f32 %v1774_v18, %v1887_v13  ;;  %v5360_v4 = vpop.f32.mrb[2].mxu0  ;;  %v5380_v46 = vpop.f32.mrb[2].mxu1 }
 0x15d   :  { %v1979_v27 = vcombine.high %v1933_v24, %v1933_v24  ;;  %v1986_v49 = vrot.slane %v1933_v24, %v6069_v26  ;;  %v6816_v3 = vmax.f32 %v5360_v4, %v5380_v46  ;;  %v1777_v8 = vpop.f32.mrb[3].mxu0  ;;  %v1890_v57 = vpop.f32.mrb[3].mxu1  ;;  %v6846_v24 = vld [vmem:[%s7672_s3] ss:$0 sm:$0xff] }
 0x15e   :  { %v1945_v37 = vcombine.high %v1931_v42, %v1931_v42  ;;  %v1952_v6 = vrot.slane %v1931_v42, %v6069_v26  ;;  %v6819_v17 = vmax.f32 %v1777_v8, %v1890_v57 }
 0x15f   :  { %v1993_v5 = vrot.slane %v1979_v27, %v6069_v26  ;;  %v1994_v61 = vcombine.high %v1986_v49, %v1986_v49  ;;  %v2149_v53 = vsel %vm2092_vm7, %v1986_v49, -inf }
 0x160   :  { %v2150_v30 = vrot.slane %v2149_v53, 4  ;;  %v1959_v25 = vrot.slane %v1945_v37, %v6069_v26  ;;  %v1960_v39 = vcombine.high %v1952_v6, %v1952_v6  ;;  %v2093_v0 = vsel %vm2092_vm7, %v1952_v6, -inf }
 0x161   :  { %v1995_v9 = vcombine.high %v1993_v5, %v1993_v5  ;;  %v2156_v59 = vsel %vm2092_vm7, %v1994_v61, -inf  ;;  %v2163_v12 = vsel %vm2092_vm7, %v1993_v5, -inf  ;;  %v2094_v7 = vrot.slane %v2093_v0, 4 }
 0x162   :  { %v2151_v11 = vmax.f32 %v2149_v53, %v2150_v30  ;;  %v2157_v45 = vrot.slane %v2156_v59, 4  ;;  %v2164_v1 = vrot.slane %v2163_v12, 4  ;;  %v1961_v54 = vcombine.high %v1959_v25, %v1959_v25  ;;  %v6827_v10 = vpop.f32.mrb[4].mxu0  ;;  %v6829_v16 = vpop.f32.mrb[4].mxu1 }
 0x163   :  { %v2170_v50 = vsel %vm2092_vm7, %v1995_v9, -inf  ;;  %v2095_v19 = vmax.f32 %v2093_v0, %v2094_v7  ;;  %v2100_v22 = vsel %vm2092_vm7, %v1960_v39, -inf  ;;  %v2107_v31 = vsel %vm2092_vm7, %v1959_v25, -inf  ;;  %v6834_v32 = vpop.f32.mrb[5].mxu0  ;;  %v6836_v35 = vpop.f32.mrb[5].mxu1 }
 0x164   :  { %v2152_v36 = vrot.slane %v2151_v11, 2  ;;  %v2158_v38 = vmax.f32 %v2156_v59, %v2157_v45  ;;  %v2165_v21 = vmax.f32 %v2163_v12, %v2164_v1  ;;  %v2171_v51 = vrot.slane %v2170_v50, 4  ;;  %v5364_v48 = vpop.f32.mrb[6].mxu0  ;;  %v5384_v55 = vpop.f32.mrb[6].mxu1 }
 0x165   :  { %v2096_v60 = vrot.slane %v2095_v19, 2  ;;  %v2101_v56 = vrot.slane %v2100_v22, 4  ;;  %v2108_v41 = vrot.slane %v2107_v31, 4  ;;  %v2114_v40 = vsel %vm2092_vm7, %v1961_v54, -inf  ;;  %v6839_v47 = vpop.f32.mrb[7].mxu0  ;;  %v6841_v62 = vpop.f32.mrb[7].mxu1 }
 0x166   :  { %v2153_v43 = vmax.f32 %v2151_v11, %v2152_v36  ;;  %v2159_v15 = vrot.slane %v2158_v38, 2  ;;  %v2166_v28 = vrot.slane %v2165_v21, 2  ;;  %v2172_v29 = vmax.f32 %v2170_v50, %v2171_v51 }
 0x167   :  { %v2097_v58 = vmax.f32 %v2095_v19, %v2096_v60  ;;  %v2102_v2 = vmax.f32 %v2100_v22, %v2101_v56  ;;  %v2109_v63 = vmax.f32 %v2107_v31, %v2108_v41  ;;  %v2115_v20 = vrot.slane %v2114_v40, 4 }
 0x168   :  { %v2154_v23 = vrot.slane %v2153_v43, 1  ;;  %v2160_v44 = vmax.f32 %v2158_v38, %v2159_v15  ;;  %v2167_v34 = vmax.f32 %v2165_v21, %v2166_v28  ;;  %v2173_v52 = vrot.slane %v2172_v29, 2 }
 0x169   :  { %v2098_v18 = vrot.slane %v2097_v58, 1  ;;  %v2103_v13 = vrot.slane %v2102_v2, 2  ;;  %v2110_v42 = vrot.slane %v2109_v63, 2  ;;  %v2116_v4 = vmax.f32 %v2114_v40, %v2115_v20 }
 0x16a   :  { %v2155_v46 = vmax.f32 %v2153_v43, %v2154_v23  ;;  %v2161_v27 = vrot.slane %v2160_v44, 1  ;;  %v2168_v49 = vrot.slane %v2167_v34, 1  ;;  %v2174_v8 = vmax.f32 %v2172_v29, %v2173_v52 }
 0x16b   :  { %v2099_v57 = vmax.f32 %v2097_v58, %v2098_v18  ;;  %v2104_v37 = vmax.f32 %v2102_v2, %v2103_v13  ;;  %v2111_v6 = vmax.f32 %v2109_v63, %v2110_v42  ;;  %v2117_v5 = vrot.slane %v2116_v4, 2 }
 0x16c   :  { %v2162_v61 = vmax.f32 %v2160_v44, %v2161_v27  ;;  %v2169_v53 = vmax.f32 %v2167_v34, %v2168_v49  ;;  %v2175_v30 = vrot.slane %v2174_v8, 1  ;;  %v2304_v25 = vadd.f32 %v6846_v24, %v2155_v46 }
 0x16d   :  { %v2105_v39 = vrot.slane %v2104_v37, 1  ;;  %v2112_v0 = vrot.slane %v2111_v6, 1  ;;  %v2118_v9 = vmax.f32 %v2116_v4, %v2117_v5  ;;  %v2296_v59 = vadd.f32 %v6846_v24, %v2099_v57 }
 0x16e   :  { %v2176_v12 = vmax.f32 %v2174_v8, %v2175_v30  ;;  %v2305_v7 = vadd.f32 %v6846_v24, %v2162_v61  ;;  %v2306_v11 = vadd.f32 %v6846_v24, %v2169_v53  ;;  %v1996_v50 = vcombine.high %v6816_v3, %v6816_v3 }
 0x16f   :  { %v2106_v45 = vmax.f32 %v2104_v37, %v2105_v39  ;;  %v2113_v1 = vmax.f32 %v2111_v6, %v2112_v0  ;;  %v2119_v54 = vrot.slane %v2118_v9, 1  ;;  %v2332_v22 = vmax.f32 %v2304_v25, 0.0 }
 0x170   :  { %v2307_v19 = vadd.f32 %v6846_v24, %v2176_v12  ;;  %v2333_v31 = vmax.f32 %v2305_v7, 0.0  ;;  %v2324_v36 = vmax.f32 %v2296_v59, 0.0  ;;  %v2334_v38 = vmax.f32 %v2306_v11, 0.0 }
 0x171   :  { %v2120_v21 = vmax.f32 %v2118_v9, %v2119_v54  ;;  %v2297_v51 = vadd.f32 %v6846_v24, %v2106_v45  ;;  %v2298_v48 = vadd.f32 %v6846_v24, %v2113_v1  ;;  %v2360_v41 = vpack.c.bf16 %v2332_v22, %v2332_v22 }
 0x172   :  { %v2335_v55 = vmax.f32 %v2307_v19, 0.0  ;;  %v6858_v40 = vpack.c.bf16 %v2324_v36, %v2324_v36  ;;  %v2003_v43 = vrot.slane %v6816_v3, %v6069_v26  ;;  %v2361_v15 = vpack.c.bf16 %v2333_v31, %v2333_v31 }
 0x173   :  { %v2299_v60 = vadd.f32 %v6846_v24, %v2120_v21  ;;  %v2325_v56 = vmax.f32 %v2297_v51, 0.0  ;;  %v2362_v28 = vpack.c.bf16 %v2334_v38, %v2334_v38  ;;  %v2326_v29 = vmax.f32 %v2298_v48, 0.0 }
 0x174   :  { %v2010_v58 = vrot.slane %v1996_v50, %v6069_v26  ;;  %v2011_v2 = vcombine.high %v2003_v43, %v2003_v43  ;;  %v2177_v63 = vsel %vm2092_vm7, %v2003_v43, -inf  ;;  %v2363_v20 = vpack.c.bf16 %v2335_v55, %v2335_v55 }
 0x175   :  { %v2327_v23 = vmax.f32 %v2299_v60, 0.0  ;;  %v6864_v44 = vpack.c.bf16 %v2325_v56, %v2325_v56  ;;  %v6866_v52 = vunpack.c.l.b16 %v2360_v41  ;;  %v2178_v18 = vrot.slane %v2177_v63, 4 }
 0x176   :  { %v2012_v34 = vcombine.high %v2010_v58, %v2010_v58  ;;  %v2184_v13 = vsel %vm2092_vm7, %v2011_v2, -inf  ;;  %v2191_v3 = vsel %vm2092_vm7, %v2010_v58, -inf  ;;  %v6870_v42 = vunpack.c.l.b16 %v2361_v15 }
 0x177   :  { %v6872_v4 = vunpack.c.l.b16 %v2362_v28  ;;  %v2354_v46 = vpack.c.bf16 %v2326_v29, %v2326_v29  ;;  %v2687_v27 = vunpack.c.l.b16 %v6858_v40  ;;  %v2179_v49 = vmax.f32 %v2177_v63, %v2178_v18 }
 0x178   :  { %v2185_v8 = vrot.slane %v2184_v13, 4  ;;  %v2192_v57 = vrot.slane %v2191_v3, 4  ;;  %v2198_v37 = vsel %vm2092_vm7, %v2012_v34, -inf  ;;  %v6876_v6 = vunpack.c.l.b16 %v2363_v20 }
 0x179   :  { %v2355_v5 = vpack.c.bf16 %v2327_v23, %v2327_v23  ;;  %v2434_v61 = vunpack.c.l.b16 %v6864_v44  ;;  %v2199_v53 = vrot.slane %v2198_v37, 4  ;;  %v2180_v30 = vrot.slane %v2179_v49, 2 }
 0x17a   :  { %v2186_v25 = vmax.f32 %v2184_v13, %v2185_v8  ;;  %v2193_v39 = vmax.f32 %v2191_v3, %v2192_v57  ;;  %v1962_v0 = vcombine.high %v6819_v17, %v6819_v17  ;;  %v6881_v9 = vunpack.c.l.b16 %v2354_v46 }
 0x17b   :  { %v2200_v59 = vmax.f32 %v2198_v37, %v2199_v53  ;;  %v1969_v12 = vrot.slane %v6819_v17, %v6069_v26  ;;  %v6887_v7 = vmax.f32 %v6827_v10, %v6829_v16  ;;  %v2181_v11 = vmax.f32 %v2179_v49, %v2180_v30 }
 0x17c   :  { %v2187_v45 = vrot.slane %v2186_v25, 2  ;;  %v2194_v1 = vrot.slane %v2193_v39, 2  ;;  %v1976_v54 = vrot.slane %v1962_v0, %v6069_v26  ;;  %v6890_v50 = vunpack.c.l.b16 %v2355_v5 }
 0x17d   :  { %v2201_v19 = vrot.slane %v2200_v59, 2  ;;  %v1977_v22 = vcombine.high %v1969_v12, %v1969_v12  ;;  %v2121_v31 = vsel %vm2092_vm7, %v1969_v12, -inf  ;;  %v2182_v36 = vrot.slane %v2181_v11, 1 }
 0x17e   :  { %v2188_v38 = vmax.f32 %v2186_v25, %v2187_v45  ;;  %v2195_v21 = vmax.f32 %v2193_v39, %v2194_v1  ;;  %v1978_v51 = vcombine.high %v1976_v54, %v1976_v54  ;;  %v2122_v48 = vrot.slane %v2121_v31, 4 }
 0x17f   :  { %v2202_v17 = vmax.f32 %v2200_v59, %v2201_v19  ;;  %v2128_v10 = vsel %vm2092_vm7, %v1977_v22, -inf  ;;  %v2135_v16 = vsel %vm2092_vm7, %v1976_v54, -inf  ;;  %v2183_v55 = vmax.f32 %v2181_v11, %v2182_v36 }
 0x180   :  { %v2189_v60 = vrot.slane %v2188_v38, 1  ;;  %v2196_v56 = vrot.slane %v2195_v21, 1  ;;  %v2129_v41 = vrot.slane %v2128_v10, 4  ;;  %v2123_v15 = vmax.f32 %v2121_v31, %v2122_v48 }
 0x181   :  { %v2203_v43 = vrot.slane %v2202_v17, 1  ;;  %v2136_v28 = vrot.slane %v2135_v16, 4  ;;  %v2142_v29 = vsel %vm2092_vm7, %v1978_v51, -inf  ;;  %v2308_v63 = vadd.f32 %v6846_v24, %v2183_v55 }
 0x182   :  { %v2190_v58 = vmax.f32 %v2188_v38, %v2189_v60  ;;  %v2197_v2 = vmax.f32 %v2195_v21, %v2196_v56  ;;  %v2130_v20 = vmax.f32 %v2128_v10, %v2129_v41  ;;  %v2124_v34 = vrot.slane %v2123_v15, 2 }
 0x183   :  { %v2204_v23 = vmax.f32 %v2202_v17, %v2203_v43  ;;  %v2137_v18 = vmax.f32 %v2135_v16, %v2136_v28  ;;  %v2143_v13 = vrot.slane %v2142_v29, 4  ;;  %v2336_v49 = vmax.f32 %v2308_v63, 0.0 }
 0x184   :  { %v2309_v3 = vadd.f32 %v6846_v24, %v2190_v58  ;;  %v2310_v46 = vadd.f32 %v6846_v24, %v2197_v2  ;;  %v2131_v8 = vrot.slane %v2130_v20, 2  ;;  %v2125_v37 = vmax.f32 %v2123_v15, %v2124_v34 }
 0x185   :  { %v2311_v57 = vadd.f32 %v6846_v24, %v2204_v23  ;;  %v2138_v5 = vrot.slane %v2137_v18, 2  ;;  %v2144_v53 = vmax.f32 %v2142_v29, %v2143_v13  ;;  %v6900_v39 = vpack.c.bf16 %v2336_v49, %v2336_v49 }
 0x186   :  { %v2337_v30 = vmax.f32 %v2309_v3, 0.0  ;;  %v2338_v25 = vmax.f32 %v2310_v46, 0.0  ;;  %v2132_v0 = vmax.f32 %v2130_v20, %v2131_v8  ;;  %v2126_v12 = vrot.slane %v2125_v37, 1 }
 0x187   :  { %v2339_v59 = vmax.f32 %v2311_v57, 0.0  ;;  %v2139_v11 = vmax.f32 %v2137_v18, %v2138_v5  ;;  %v2145_v45 = vrot.slane %v2144_v53, 2  ;;  %v2454_v1 = vrot.slane %v6881_v9, 7 }
 0x188   :  { %v2366_v54 = vpack.c.bf16 %v2338_v25, %v2338_v25  ;;  %v3157_v19 = vunpack.c.l.b16 %v6900_v39  ;;  %v2133_v22 = vrot.slane %v2132_v0, 1  ;;  %v2365_v31 = vpack.c.bf16 %v2337_v30, %v2337_v30 }
 0x189   :  { %v2127_v36 = vmax.f32 %v2125_v37, %v2126_v12  ;;  %v2140_v38 = vrot.slane %v2139_v11, 1  ;;  %v2146_v21 = vmax.f32 %v2144_v53, %v2145_v45  ;;  %v2689_v51 = vrot.slane %v2434_v61, 7 }
 0x18a   :  { %v2915_v17 = vrot.slane %v6890_v50, 7  ;;  %v2367_v48 = vpack.c.bf16 %v2339_v59, %v2339_v59  ;;  %v3173_v10 = vrot.slane %v3157_v19, 7  ;;  %v2475_v16 = vrot.slane %v6872_v4, 7 }
 0x18b   :  { %v2134_v55 = vmax.f32 %v2132_v0, %v2133_v22  ;;  %v2147_v60 = vrot.slane %v2146_v21, 1  ;;  %v2047_v56 = vcombine.high %v6887_v7, %v6887_v7  ;;  %v2929_v41 = vrot.slane %v6876_v6, 7 }
 0x18c   :  { %v2688_v43 = vunpack.c.l.b16 %v2366_v54  ;;  %v6915_v15 = vsel %vm2455_vm8, %v3173_v10, %v6876_v6  ;;  %v2141_v28 = vmax.f32 %v2139_v11, %v2140_v38  ;;  %v6920_v29 = vsel %vm2455_vm8, %v2454_v1, %v2434_v61 }
 0x18d   :  { %v2691_v58 = vrot.slane %v6881_v9, 6  ;;  %v3401_v2 = vunpack.c.l.b16 %v2365_v31  ;;  %v2300_v63 = vadd.f32 %v6846_v24, %v2127_v36  ;;  %v6927_v20 = vsel %vm2455_vm8, %v2689_v51, %v2687_v27 }
 0x18e   :  { %v6931_v23 = vsel %vm2455_vm8, %v2915_v17, %v6881_v9  ;;  %v2444_v34 = vunpack.c.l.b16 %v2367_v48  ;;  %v2054_v44 = vrot.slane %v6887_v7, %v6069_v26  ;;  %v2148_v61 = vmax.f32 %v2146_v21, %v2147_v60 }
 0x18f   :  { %v6936_v18 = vadd.f32 %v6846_v24, %v2134_v55  ;;  %v2061_v13 = vrot.slane %v2047_v56, %v6069_v26  ;;  %v1935_v40 = vmax.f32 %v6834_v32, %v6836_v35  ;;  %v6941_v3 = vrot.slane %v2688_v43, 6 }
 0x190   :  { %v2302_v27 = vadd.f32 %v6846_v24, %v2141_v28  ;;  %v2062_v46 = vcombine.high %v2054_v44, %v2054_v44  ;;  %v2261_v49 = vsel %vm2092_vm7, %v2054_v44, -inf  ;;  %v6945_v8 = vrot.slane %v3401_v2, 7 }
 0x191   :  { %v2328_v57 = vmax.f32 %v2300_v63, 0.0  ;;  %v2063_v7 = vcombine.high %v2061_v13, %v2061_v13  ;;  %v2262_v37 = vrot.slane %v2261_v49, 4  ;;  %v6947_v5 = vrot.slane %v2444_v34, 6 }
 0x192   :  { %v6949_v53 = vrot.slane %v2444_v34, 5  ;;  %v2268_v30 = vsel %vm2092_vm7, %v2062_v46, -inf  ;;  %v2275_v32 = vsel %vm2092_vm7, %v2061_v13, -inf  ;;  %v2303_v35 = vadd.f32 %v6846_v24, %v2148_v61 }
 0x193   :  { %v2329_v25 = vmax.f32 %v6936_v18, 0.0  ;;  %v2263_v0 = vmax.f32 %v2261_v49, %v2262_v37  ;;  %v2269_v59 = vrot.slane %v2268_v30, 4  ;;  %v2330_v12 = vmax.f32 %v2302_v27, 0.0 }
 0x194   :  { %v2276_v11 = vrot.slane %v2275_v32, 4  ;;  %v2282_v45 = vsel %vm2092_vm7, %v2063_v7, -inf  ;;  %v2013_v1 = vcombine.high %v1935_v40, %v1935_v40  ;;  %v2356_v54 = vpack.c.bf16 %v2328_v57, %v2328_v57 }
 0x195   :  { %v2264_v22 = vrot.slane %v2263_v0, 2  ;;  %v2270_v31 = vmax.f32 %v2268_v30, %v2269_v59  ;;  %v2283_v36 = vrot.slane %v2282_v45, 4  ;;  %v2020_v21 = vrot.slane %v1935_v40, %v6069_v26 }
 0x196   :  { %v2277_v38 = vmax.f32 %v2275_v32, %v2276_v11  ;;  %v2027_v51 = vrot.slane %v2013_v1, %v6069_v26  ;;  %v6960_v17 = vmax.f32 %v6839_v47, %v6841_v62  ;;  %v2331_v48 = vmax.f32 %v2303_v35, 0.0 }
 0x197   :  { %v2265_v10 = vmax.f32 %v2263_v0, %v2264_v22  ;;  %v2271_v55 = vrot.slane %v2270_v31, 2  ;;  %v2284_v60 = vmax.f32 %v2282_v45, %v2283_v36  ;;  %v2028_v43 = vcombine.high %v2020_v21, %v2020_v21 }
 0x198   :  { %v2278_v56 = vrot.slane %v2277_v38, 2  ;;  %v2029_v28 = vcombine.high %v2027_v51, %v2027_v51  ;;  %v2205_v2 = vsel %vm2092_vm7, %v2020_v21, -inf  ;;  %v2219_v40 = vsel %vm2092_vm7, %v2027_v51, -inf }
 0x199   :  { %v2266_v63 = vrot.slane %v2265_v10, 1  ;;  %v2272_v34 = vmax.f32 %v2270_v31, %v2271_v55  ;;  %v2285_v44 = vrot.slane %v2284_v60, 2  ;;  %v2206_v61 = vrot.slane %v2205_v2, 4 }
 0x19a   :  { %v2279_v18 = vmax.f32 %v2277_v38, %v2278_v56  ;;  %v2212_v13 = vsel %vm2092_vm7, %v2028_v43, -inf  ;;  %v2226_v47 = vsel %vm2092_vm7, %v2029_v28, -inf  ;;  %v2220_v37 = vrot.slane %v2219_v40, 4 }
 0x19b   :  { %v2267_v62 = vmax.f32 %v2265_v10, %v2266_v63  ;;  %v2273_v27 = vrot.slane %v2272_v34, 1  ;;  %v2286_v46 = vmax.f32 %v2284_v60, %v2285_v44  ;;  %v2207_v49 = vmax.f32 %v2205_v2, %v2206_v61 }
 0x19c   :  { %v2280_v57 = vrot.slane %v2279_v18, 1  ;;  %v2213_v7 = vrot.slane %v2212_v13, 4  ;;  %v2227_v30 = vrot.slane %v2226_v47, 4  ;;  %v2221_v1 = vmax.f32 %v2219_v40, %v2220_v37 }
 0x19d   :  { %v2274_v32 = vmax.f32 %v2272_v34, %v2273_v27  ;;  %v2287_v35 = vrot.slane %v2286_v46, 1  ;;  %v2320_v0 = vadd.f32 %v6846_v24, %v2267_v62  ;;  %v2208_v59 = vrot.slane %v2207_v49, 2 }
 0x19e   :  { %v2281_v11 = vmax.f32 %v2279_v18, %v2280_v57  ;;  %v2214_v45 = vmax.f32 %v2212_v13, %v2213_v7  ;;  %v2228_v22 = vmax.f32 %v2226_v47, %v2227_v30  ;;  %v2357_v31 = vpack.c.bf16 %v2329_v25, %v2329_v25 }
 0x19f   :  { %v2358_v36 = vpack.c.bf16 %v2330_v12, %v2330_v12  ;;  %v2288_v38 = vmax.f32 %v2286_v46, %v2287_v35  ;;  %v2209_v21 = vmax.f32 %v2207_v49, %v2208_v59  ;;  %v2321_v51 = vadd.f32 %v6846_v24, %v2274_v32 }
 0x1a0   :  { %v2215_v10 = vrot.slane %v2214_v45, 2  ;;  %v2222_v55 = vrot.slane %v2221_v1, 2  ;;  %v2229_v60 = vrot.slane %v2228_v22, 2  ;;  %v2359_v56 = vpack.c.bf16 %v2331_v48, %v2331_v48 }
 0x1a1   :  { %v6968_v43 = vunpack.c.l.b16 %v2356_v54  ;;  %v2348_v28 = vmax.f32 %v2320_v0, 0.0  ;;  %v2210_v2 = vrot.slane %v2209_v21, 1  ;;  %v2322_v63 = vadd.f32 %v6846_v24, %v2281_v11 }
 0x1a2   :  { %v2216_v34 = vmax.f32 %v2214_v45, %v2215_v10  ;;  %v2223_v44 = vmax.f32 %v2221_v1, %v2222_v55  ;;  %v2230_v61 = vmax.f32 %v2228_v22, %v2229_v60  ;;  %v6975_v25 = vsel %vm2455_vm8, %v6945_v8, %v3157_v19 }
 0x1a3   :  { %v6977_v12 = vunpack.c.l.b16 %v2357_v31  ;;  %v6980_v18 = vadd.f32 %v6846_v24, %v2288_v38  ;;  %v2211_v54 = vmax.f32 %v2209_v21, %v2210_v2  ;;  %v2349_v48 = vmax.f32 %v2321_v51, 0.0 }
 0x1a4   :  { %v2217_v13 = vrot.slane %v2216_v34, 1  ;;  %v2224_v40 = vrot.slane %v2223_v44, 1  ;;  %v2231_v47 = vrot.slane %v2230_v61, 1  ;;  %v6982_v62 = vunpack.c.l.b16 %v2358_v36 }
 0x1a5   :  { %v6984_v27 = vunpack.c.l.b16 %v2359_v56  ;;  %v3159_v39 = vrot.slane %v6968_v43, 7  ;;  %v2376_v46 = vpack.c.bf16 %v2348_v28, %v2348_v28  ;;  %v2350_v49 = vmax.f32 %v2322_v63, 0.0 }
 0x1a6   :  { %v2218_v19 = vmax.f32 %v2216_v34, %v2217_v13  ;;  %v2225_v8 = vmax.f32 %v2223_v44, %v2224_v40  ;;  %v2232_v57 = vmax.f32 %v2230_v61, %v2231_v47  ;;  %v2351_v7 = vmax.f32 %v6980_v18, 0.0 }
 0x1a7   :  { %v2312_v37 = vadd.f32 %v6846_v24, %v2211_v54  ;;  %v2030_v30 = vcombine.high %v6960_v17, %v6960_v17  ;;  %v2457_v32 = vrot.slane %v6890_v50, 6  ;;  %v6992_v35 = vpack.c.bf16 %v2349_v48, %v2349_v48 }
 0x1a8   :  { %v2313_v0 = vadd.f32 %v6846_v24, %v2218_v19  ;;  %v2314_v59 = vadd.f32 %v6846_v24, %v2225_v8  ;;  %v2315_v11 = vadd.f32 %v6846_v24, %v2232_v57  ;;  %v6997_v45 = vunpack.c.l.b16 %v2376_v46 }
 0x1a9   :  { %v2340_v1 = vmax.f32 %v2312_v37, 0.0  ;;  %v2037_v22 = vrot.slane %v6960_v17, %v6069_v26  ;;  %v2044_v31 = vrot.slane %v2030_v30, %v6069_v26  ;;  %v7002_v36 = vpack.c.bf16 %v2350_v49, %v2350_v49 }
 0x1aa   :  { %v2341_v38 = vmax.f32 %v2313_v0, 0.0  ;;  %v2342_v21 = vmax.f32 %v2314_v59, 0.0  ;;  %v2343_v51 = vmax.f32 %v2315_v11, 0.0  ;;  %v2459_v40 = vsel %vm879_vm9, %v2457_v32, %v6920_v29 }
 0x1ab   :  { %v2368_v10 = vpack.c.bf16 %v2340_v1, %v2340_v1  ;;  %v2045_v55 = vcombine.high %v2037_v22, %v2037_v22  ;;  %v2046_v60 = vcombine.high %v2044_v31, %v2044_v31  ;;  %v2233_v56 = vsel %vm2092_vm7, %v2037_v22, -inf }
 0x1ac   :  { %v2369_v28 = vpack.c.bf16 %v2341_v38, %v2341_v38  ;;  %v2370_v2 = vpack.c.bf16 %v2342_v21, %v2342_v21  ;;  %v2371_v63 = vpack.c.bf16 %v2343_v51, %v2343_v51  ;;  %v2234_v34 = vrot.slane %v2233_v56, 4 }
 0x1ad   :  { %v7005_v44 = vunpack.c.l.b16 %v2368_v10  ;;  %v2240_v17 = vsel %vm2092_vm7, %v2045_v55, -inf  ;;  %v2247_v61 = vsel %vm2092_vm7, %v2044_v31, -inf  ;;  %v2254_v54 = vsel %vm2092_vm7, %v2046_v60, -inf }
 0x1ae   :  { %v7010_v48 = vunpack.c.l.b16 %v2369_v28  ;;  %v2235_v13 = vmax.f32 %v2233_v56, %v2234_v34  ;;  %v2460_v47 = vrot.slane %v6968_v43, 5  ;;  %v7015_v46 = vunpack.c.l.b16 %v2370_v2 }
 0x1af   :  { %v7017_v49 = vunpack.c.l.b16 %v2371_v63  ;;  %v2479_v19 = vrot.slane %v7005_v44, 5  ;;  %v2241_v8 = vrot.slane %v2240_v17, 4  ;;  %v2709_v57 = vrot.slane %v7005_v44, 4 }
 0x1b0   :  { %v2236_v37 = vrot.slane %v2235_v13, 2  ;;  %v2248_v30 = vrot.slane %v2247_v61, 4  ;;  %v2255_v0 = vrot.slane %v2254_v54, 4  ;;  %v2462_v11 = vsel %vm2461_vm12, %v2460_v47, %v2459_v40 }
 0x1b1   :  { %v2242_v59 = vmax.f32 %v2240_v17, %v2241_v8  ;;  %v2463_v1 = vrot.slane %v6977_v12, 4  ;;  %v2466_v29 = vrot.slane %v6982_v62, 3  ;;  %v2469_v38 = vrot.slane %v6984_v27, 2 }
 0x1b2   :  { %v2237_v32 = vmax.f32 %v2235_v13, %v2236_v37  ;;  %v2249_v22 = vmax.f32 %v2247_v61, %v2248_v30  ;;  %v2256_v31 = vmax.f32 %v2254_v54, %v2255_v0  ;;  %v2472_v10 = vrot.slane %v6866_v52, 1 }
 0x1b3   :  { %v2243_v21 = vrot.slane %v2242_v59, 2  ;;  %v2465_v51 = vsel %vm881_vm10, %v2463_v1, %v2462_v11  ;;  %v2476_v55 = vsel %vm2455_vm8, %v2475_v16, %v6870_v42  ;;  %v2481_v61 = vrot.slane %v7010_v48, 4 }
 0x1b4   :  { %v2238_v60 = vrot.slane %v2237_v32, 1  ;;  %v2250_v56 = vrot.slane %v2249_v22, 2  ;;  %v2257_v28 = vrot.slane %v2256_v31, 2  ;;  %v2468_v2 = vsel %vm2467_vm13, %v2466_v29, %v2465_v51 }
 0x1b5   :  { %v2244_v63 = vmax.f32 %v2242_v59, %v2243_v21  ;;  %v2471_v34 = vsel %vm883_vm11, %v2469_v38, %v2468_v2  ;;  %v2478_v17 = vsel %vm879_vm9, %v6947_v5, %v2476_v55  ;;  %v2483_v37 = vrot.slane %v7015_v46, 3 }
 0x1b6   :  { %v2239_v54 = vmax.f32 %v2237_v32, %v2238_v60  ;;  %v2251_v13 = vmax.f32 %v2249_v22, %v2250_v56  ;;  %v2258_v40 = vmax.f32 %v2256_v31, %v2257_v28  ;;  %v2474_v47 = vsel %vm2473_vm14, %v2472_v10, %v2471_v34 }
 0x1b7   :  { %v2245_v8 = vrot.slane %v2244_v63, 1  ;;  %v2480_v16 = vsel %vm2461_vm12, %v2479_v19, %v2478_v17  ;;  %v2485_v30 = vrot.slane %v7017_v49, 2  ;;  %v2692_v32 = vsel %vm879_vm9, %v2691_v58, %v6927_v20 }
 0x1b8   :  { %v2252_v0 = vrot.slane %v2251_v13, 1  ;;  %v2259_v59 = vrot.slane %v2258_v40, 1  ;;  %v2316_v11 = vadd.f32 %v6846_v24, %v2239_v54  ;;  %v2482_v5 = vsel %vm881_vm10, %v2481_v61, %v2480_v16 }
 0x1b9   :  { %v2246_v1 = vmax.f32 %v2244_v63, %v2245_v8  ;;  %v2484_v29 = vsel %vm2467_vm13, %v2483_v37, %v2482_v5  ;;  %v2693_v19 = vrot.slane %v6890_v50, 5  ;;  %v2695_v55 = vrot.slane %v6968_v43, 4 }
 0x1ba   :  { %v2253_v22 = vmax.f32 %v2251_v13, %v2252_v0  ;;  %v2260_v31 = vmax.f32 %v2258_v40, %v2259_v59  ;;  %v2344_v38 = vmax.f32 %v2316_v11, 0.0  ;;  %v2486_v21 = vsel %vm883_vm11, %v2485_v30, %v2484_v29 }
 0x1bb   :  { %v2317_v51 = vadd.f32 %v6846_v24, %v2246_v1  ;;  %v2694_v10 = vsel %vm2461_vm12, %v2693_v19, %v2692_v32  ;;  %v2697_v60 = vrot.slane %v6977_v12, 3  ;;  %v2699_v56 = vrot.slane %v6982_v62, 2 }
 0x1bc   :  { %v2318_v9 = vadd.f32 %v6846_v24, %v2253_v22  ;;  %v2319_v58 = vadd.f32 %v6846_v24, %v2260_v31  ;;  %v2372_v20 = vpack.c.bf16 %v2344_v38, %v2344_v38  ;;  %v2696_v2 = vsel %vm881_vm10, %v2695_v55, %v2694_v10 }
 0x1bd   :  { %v2345_v28 = vmax.f32 %v2317_v51, 0.0  ;;  %v2701_v63 = vrot.slane %v6984_v27, 1  ;;  %v2703_v34 = vrot.slane %v6870_v42, 7  ;;  %v2698_v13 = vsel %vm2467_vm13, %v2697_v60, %v2696_v2 }
 0x1be   :  { %v2346_v17 = vmax.f32 %v2318_v9, 0.0  ;;  %v2347_v61 = vmax.f32 %v2319_v58, 0.0  ;;  %v7059_v54 = vunpack.c.l.b16 %v2372_v20  ;;  %v2700_v8 = vsel %vm883_vm11, %v2699_v56, %v2698_v13 }
 0x1bf   :  { %v2373_v40 = vpack.c.bf16 %v2345_v28, %v2345_v28  ;;  %v2704_v24 = vsel %vm2455_vm8, %v2703_v34, %v6866_v52  ;;  %v2711_v16 = vrot.slane %v7010_v48, 3  ;;  %v2702_v59 = vsel %vm2473_vm14, %v2701_v63, %v2700_v8 }
 0x1c0   :  { %v2374_v37 = vpack.c.bf16 %v2346_v17, %v2346_v17  ;;  %v2375_v30 = vpack.c.bf16 %v2347_v61, %v2347_v61  ;;  %v2487_v0 = vrot.slane %v7059_v54, 1  ;;  %v7071_v11 = vpack.c.bf16 %v2351_v7, %v2351_v7 }
 0x1c1   :  { %v2706_v5 = vsel %vm879_vm9, %v6941_v3, %v2704_v24  ;;  %v2713_v1 = vrot.slane %v7015_v46, 2  ;;  %v2715_v29 = vrot.slane %v7017_v49, 1  ;;  %v2493_v18 = vrot.slane %v6997_v45, 5 }
 0x1c2   :  { %v7077_v32 = vunpack.c.l.b16 %v2374_v37  ;;  %v7079_v19 = vunpack.c.l.b16 %v2375_v30  ;;  %v2488_v22 = vsel %vm2473_vm14, %v2487_v0, %v2486_v21  ;;  %v2708_v31 = vsel %vm2461_vm12, %v6949_v53, %v2706_v5 }
 0x1c3   :  { %v7086_v7 = vunpack.c.l.b16 %v6992_v35  ;;  %v2495_v38 = vpack.c.b16 %v2488_v22, %v2474_v47  ;;  %v2710_v3 = vsel %vm881_vm10, %v2709_v57, %v2708_v31  ;;  %v7091_v51 = vunpack.c.l.b16 %v2373_v40 }
 0x1c4   :  { %v2489_v10 = vrot.slane %v7077_v32, 7  ;;  %v2491_v55 = vrot.slane %v7079_v19, 6  ;;  %v2712_v21 = vsel %vm2467_vm13, %v2711_v16, %v2710_v3  ;;  %v3158_v53 = vunpack.c.l.b16 %v7002_v36  ;;  %v5835_v16 = vld [vmem:[%s7673_s4 + $0x8] sm:$0xff]   ;;  %v5837_v3 = vld [vmem:[%s7673_s4 + $0x10] sm:$0xff]  }
 0x1c5   :  { %v3187_v60 = vrot.slane %v6997_v45, 7  ;;  %5397 = vmatprep.mubr.msk.bf16.mxu0 %vm2530_vm15, %v2495_v38  ;;  %5413 = vmatprep.mubr.msk.bf16.mxu1 %vm2530_vm15, %v2495_v38  ;;  %v2714_v35 = vsel %vm883_vm11, %v2713_v1, %v2712_v21  ;;  %v2917_v57 = vrot.slane %v6968_v43, 6  ;;  %v3402_v47 = vunpack.c.l.b16 %v7071_v11  ;;  %v5848_v11 = vld [vmem:[%s7674_s5 + $0x60] sm:$0xff]  }
 0x1c6   :  { %v2490_v9 = vsel %vm2455_vm8, %v2489_v10, %v7091_v51  ;;  %v2716_v58 = vsel %vm2473_vm14, %v2715_v29, %v2714_v35  ;;  %v2919_v20 = vrot.slane %v6977_v12, 5  ;;  %v2931_v56 = vrot.slane %v7005_v44, 6 }
 0x1c7   :  { %v2492_v28 = vsel %vm879_vm9, %v2491_v55, %v2490_v9  ;;  %v2723_v2 = vpack.c.b16 %v2716_v58, %v2702_v59  ;;  %v2918_v63 = vsel %vm879_vm9, %v2917_v57, %v6931_v23  ;;  %v3431_v34 = vrot.slane %v7086_v7, 7  ;;  %v5836_v23 = vld [vmem:[%s7674_s5 + $0x8] sm:$0xff]  }
 0x1c8   :  { %v2494_v17 = vsel %vm2461_vm12, %v2493_v18, %v2492_v28  ;;  %v2920_v61 = vsel %vm2461_vm12, %v2919_v20, %v2918_v63  ;;  %v2921_v13 = vrot.slane %v6982_v62, 4  ;;  %v2717_v8 = vrot.slane %v7091_v51, 7 }
 0x1c9   :  { %v2496_v40 = vpack.c.b16 %v2494_v17, %v2494_v17  ;;  %v2923_v24 = vrot.slane %v6984_v27, 3  ;;  %v2925_v44 = vrot.slane %v6866_v52, 2  ;;  %v2927_v30 = vrot.slane %v6870_v42, 1 }
 0x1ca   :  { %v2922_v37 = vsel %vm881_vm10, %v2921_v13, %v2920_v61  ;;  %v2930_v0 = vsel %vm2455_vm8, %v2929_v41, %v6872_v4  ;;  %v2933_v59 = vrot.slane %v7010_v48, 5  ;;  %v2935_v29 = vrot.slane %v7015_v46, 4 }
 0x1cb   :  { %5398 = vmatmul.mubr.msk.bf16.vlgmr.msra.gmra.mrb[8].mxu0 %vm2530_vm15, %v2496_v40  ;;  %5414 = vmatmul.mubr.msk.bf16.vlgmr.msra.gmra.mrb[8].mxu1 %vm2530_vm15, %v2496_v40  ;;  %v2924_v5 = vsel %vm2467_vm13, %v2923_v24, %v2922_v37  ;;  %v2932_v1 = vsel %vm879_vm9, %v2931_v56, %v2930_v0  ;;  %v2937_v22 = vrot.slane %v7017_v49, 3  ;;  %v3175_v31 = vrot.slane %v7010_v48, 6 }
 0x1cc   :  { %5418 = vmatpush3.bf16.msra.mxu0 %v6806_v14  ;;  %5434 = vmatpush3.bf16.msra.mxu1 %v6811_v33  ;;  %v2719_v41 = vrot.slane %v7077_v32, 6  ;;  %v2926_v18 = vsel %vm883_vm11, %v2925_v44, %v2924_v5  ;;  %v2934_v38 = vsel %vm2461_vm12, %v2933_v59, %v2932_v1  ;;  %v5838_v14 = vld [vmem:[%s7674_s5 + $0x10] sm:$0xff]   ;;  %v2718_v33 = vsel %vm2455_vm8, %v2717_v8, %v7059_v54  ;;  %v5841_v1 = vld [vmem:[%s7673_s4 + $0x20] sm:$0xff]  }
 0x1cd   :  { %5429 = vmatprep.mubr.msk.bf16.mxu0 %vm2530_vm15, %v2723_v2  ;;  %5445 = vmatprep.mubr.msk.bf16.mxu1 %vm2530_vm15, %v2723_v2  ;;  %v2928_v48 = vsel %vm2473_vm14, %v2927_v30, %v2926_v18  ;;  %v2936_v10 = vsel %vm881_vm10, %v2935_v29, %v2934_v38  ;;  %v2939_v55 = vrot.slane %v7059_v54, 2  ;;  %v2941_v35 = vrot.slane %v7091_v51, 1  ;;  %v5842_v18 = vld [vmem:[%s7674_s5 + $0x20] sm:$0xff]   ;;  %v5843_v38 = vld [vmem:[%s7673_s4 + $0x28] ss:$0 sps:$4 sm:$0x33]  }
 0x1ce   :  { %5419 = vmatprep.subr.bf16.mxu0 %v5835_v16  ;;  %5435 = vmatprep.subr.bf16.mxu1 %v5836_v23  ;;  %v2938_v21 = vsel %vm2467_vm13, %v2937_v22, %v2936_v10  ;;  %v2943_v57 = vrot.slane %v7079_v19, 7  ;;  %v2945_v9 = vrot.slane %v6997_v45, 6  ;;  %v3160_v20 = vsel %vm2455_vm8, %v3159_v39, %v6890_v50  ;;  %v5839_v50 = vld [vmem:[%s7673_s4 + $0x18] sm:$0xff]  }
 0x1cf   :  { %v2940_v58 = vsel %vm883_vm11, %v2939_v55, %v2938_v21  ;;  %v3161_v56 = vrot.slane %v6977_v12, 6  ;;  %v3163_v28 = vrot.slane %v6982_v62, 5  ;;  %v2947_v17 = vrot.slane %v7086_v7, 5  ;;  %v5840_v39 = vld [vmem:[%s7674_s5 + $0x18] sm:$0xff]  }
 0x1d0   :  { %5420 = vmatpush3.bf16.msra.mxu0 %v5835_v16  ;;  %5436 = vmatpush3.bf16.msra.mxu1 %v5836_v23  ;;  %v2942_v2 = vsel %vm2473_vm14, %v2941_v35, %v2940_v58  ;;  %v2944_v63 = vsel %vm2455_vm8, %v2943_v57, %v7077_v32  ;;  %v3165_v61 = vrot.slane %v6984_v27, 4  ;;  %v7174_v13 = vrot.slane %v3158_v53, 6 }
 0x1d1   :  { %5421 = vmatprep.subr.bf16.mxu0 %v5837_v3  ;;  %5437 = vmatprep.subr.bf16.mxu1 %v5838_v14  ;;  %v7182_v40 = vpack.c.b16 %v2942_v2, %v2928_v48  ;;  %v2946_v8 = vsel %vm879_vm9, %v2945_v9, %v2944_v63  ;;  %v3162_v24 = vsel %vm879_vm9, %v3161_v56, %v3160_v20  ;;  %v3167_v23 = vrot.slane %v6866_v52, 3  ;;  %v5844_v48 = vld [vmem:[%s7674_s5 + $0x28] ss:$0 sps:$4 sm:$0x33]  }
 0x1d2   :  { %v7187_v44 = vsel %vm2461_vm12, %v2947_v17, %v2946_v8  ;;  %v3164_v16 = vsel %vm2461_vm12, %v3163_v28, %v3162_v24  ;;  %v3176_v37 = vsel %vm879_vm9, %v3175_v31, %v6915_v15  ;;  %v3169_v0 = vrot.slane %v6870_v42, 2 }
 0x1d3   :  { %v3166_v30 = vsel %vm881_vm10, %v3165_v61, %v3164_v16  ;;  %v3177_v59 = vrot.slane %v7015_v46, 5  ;;  %v3179_v5 = vrot.slane %v7017_v49, 4  ;;  %v2720_v29 = vsel %vm879_vm9, %v2719_v41, %v2718_v33 }
 0x1d4   :  { %5422 = vmatpush3.bf16.msra.mxu0 %v5837_v3  ;;  %5438 = vmatpush3.bf16.msra.mxu1 %v5838_v14  ;;  %v2721_v22 = vrot.slane %v7079_v19, 5  ;;  %v3168_v15 = vsel %vm2467_vm13, %v3167_v23, %v3166_v30  ;;  %v3171_v31 = vrot.slane %v6872_v4, 1  ;;  %v3181_v14 = vrot.slane %v7059_v54, 3 }
 0x1d5   :  { %5423 = vmatprep.subr.bf16.mxu0 %v5839_v50  ;;  %5439 = vmatprep.subr.bf16.mxu1 %v5840_v39  ;;  %v3170_v3 = vsel %vm883_vm11, %v3169_v0, %v3168_v15  ;;  %v3178_v41 = vsel %vm2461_vm12, %v3177_v59, %v3176_v37  ;;  %v3183_v33 = vrot.slane %v7091_v51, 2  ;;  %v3185_v55 = vrot.slane %v7077_v32, 1  ;;  %v5850_v15 = vld [vmem:[%s7674_s5 + $0x68] sm:$0xff]  }
 0x1d6   :  { %v3180_v10 = vsel %vm881_vm10, %v3179_v5, %v3178_v41  ;;  %v3188_v21 = vsel %vm2455_vm8, %v3187_v60, %v7079_v19  ;;  %v3189_v35 = vrot.slane %v7086_v7, 6  ;;  %v3191_v9 = vrot.slane %v3158_v53, 5  ;;  %v5856_v41 = vld [vmem:[%s7674_s5 + $0x80] ss:$0 sps:$4 sm:$0x33]  }
 0x1d7   :  { %v3182_v57 = vsel %vm2467_vm13, %v3181_v14, %v3180_v10  ;;  %v3403_v58 = vrot.slane %v6977_v12, 7  ;;  %v3405_v20 = vrot.slane %v6982_v62, 6  ;;  %v3172_v56 = vsel %vm2473_vm14, %v3171_v31, %v3170_v3  ;;  %v5851_v31 = vld [vmem:[%s7673_s4 + $0x70] sm:$0xff]   ;;  %v5855_v3 = vld [vmem:[%s7673_s4 + $0x80] ss:$0 sps:$4 sm:$0x33]  }
 0x1d8   :  { %5424 = vmatpush3.bf16.msra.mxu0 %v5839_v50  ;;  %5440 = vmatpush3.bf16.msra.mxu1 %v5840_v39  ;;  %v3184_v28 = vsel %vm883_vm11, %v3183_v33, %v3182_v57  ;;  %v3190_v2 = vsel %vm879_vm9, %v3189_v35, %v3188_v21  ;;  %v3407_v60 = vrot.slane %v6984_v27, 5  ;;  %v2765_v63 = vsel %vm2537_vm6, %v5843_v38, 0  ;;  %v5857_v33 = vld [vmem:[%s7673_s4 + $0x84] sm:$0xff]   ;;  %v5859_v21 = vld [vmem:[%s7673_s4 + $0x8c] sm:$0xff]   ;;  %v5862_v57 = vld [vmem:[%s7674_s5 + $0x94] sm:$0xff]  }
 0x1d9   :  { %5425 = vmatprep.subr.bf16.mxu0 %v5841_v1  ;;  %5441 = vmatprep.subr.bf16.mxu1 %v5842_v18  ;;  %v3186_v36 = vsel %vm2473_vm14, %v3185_v55, %v3184_v28  ;;  %v7236_v12 = vsel %vm2461_vm12, %v3191_v9, %v3190_v2  ;;  %v3404_v62 = vsel %vm2455_vm8, %v3403_v58, %v6968_v43  ;;  %v2849_v53 = vsel %vm2537_vm6, %v5844_v48, 0  ;;  %v5858_v10 = vld [vmem:[%s7674_s5 + $0x84] sm:$0xff]   ;;  %v5860_v35 = vld [vmem:[%s7674_s5 + $0x8c] sm:$0xff]   ;;  %v5863_v9 = vld [vmem:[%s7673_s4 + $0x9c] sm:$0xff]  }
 0x1da   :  { %v7241_v17 = vpack.c.b16 %v3186_v36, %v3172_v56  ;;  %v3406_v61 = vsel %vm879_vm9, %v3405_v20, %v3404_v62  ;;  %v3409_v27 = vrot.slane %v6866_v52, 4  ;;  %v3411_v39 = vrot.slane %v6870_v42, 3  ;;  %v5845_v52 = vld [vmem:[%s7673_s4 + $0x58] sm:$0xff]   ;;  %v5865_v20 = vld [vmem:[%s7673_s4 + $0xa4] sm:$0xff]   ;;  %v5870_v62 = vld [vmem:[%s7674_s5 + $0xb0] sm:$0xff]  }
 0x1db   :  { %v3408_v50 = vsel %vm2461_vm12, %v3407_v60, %v3406_v61  ;;  %v3419_v8 = vrot.slane %v7015_v46, 6  ;;  %v3421_v24 = vrot.slane %v7017_v49, 5  ;;  %v2722_v43 = vsel %vm2461_vm12, %v2721_v22, %v2720_v29  ;;  %v5846_v42 = vld [vmem:[%s7674_s5 + $0x58] sm:$0xff]   ;;  %v5866_v56 = vld [vmem:[%s7674_s5 + $0xa4] sm:$0xff]  }
 0x1dc   :  { %5426 = vmatpush3.bf16.msra.mxu0 %v5841_v1  ;;  %5442 = vmatpush3.bf16.msra.mxu1 %v5842_v18  ;;  %v3410_v16 = vsel %vm881_vm10, %v3409_v27, %v3408_v50  ;;  %v3413_v23 = vrot.slane %v6872_v4, 2  ;;  %v3415_v37 = vrot.slane %v6876_v6, 1  ;;  %v3423_v4 = vrot.slane %v7059_v54, 4  ;;  %v5853_v18 = vld [vmem:[%s7673_s4 + $0x78] sm:$0xff]   ;;  %v5874_v27 = vld [vmem:[%s7674_s5 + $0xc0] sm:$0xff]   ;;  %v5875_v50 = vld [vmem:[%s7673_s4 + $0xc8] sm:$0xff]  }
 0x1dd   :  { %5749 = vmatprep.subr.msk.bf16.mxu0 %vm2537_vm6, %v5843_v38  ;;  %5750 = vmatprep.subr.msk.bf16.mxu1 %vm2537_vm6, %v5844_v48  ;;  %v3412_v46 = vsel %vm2467_vm13, %v3411_v39, %v3410_v16  ;;  %v3420_v49 = vsel %vm879_vm9, %v3419_v8, %v6975_v25  ;;  %v3425_v6 = vrot.slane %v7091_v51, 3  ;;  %v3427_v59 = vrot.slane %v7077_v32, 2  ;;  %v5854_v38 = vld [vmem:[%s7674_s5 + $0x78] sm:$0xff]   ;;  %v5867_v28 = vld [vmem:[%s7673_s4 + $0xac] ss:$0 sps:$4 sm:$0x33]  }
 0x1de   :  { %v3414_v30 = vsel %vm883_vm11, %v3413_v23, %v3412_v46  ;;  %v3422_v0 = vsel %vm2461_vm12, %v3421_v24, %v3420_v49  ;;  %v3432_v5 = vsel %vm2455_vm8, %v3431_v34, %v6997_v45  ;;  %v3435_v54 = vrot.slane %v3402_v47, 5  ;;  %v5847_v34 = vld [vmem:[%s7673_s4 + $0x60] sm:$0xff]   ;;  %v5868_v2 = vld [vmem:[%s7674_s5 + $0xac] ss:$0 sps:$4 sm:$0x33]   ;;  %v5872_v61 = vld [vmem:[%s7674_s5 + $0xb8] sm:$0xff]  }
 0x1df   :  { %v3416_v1 = vsel %vm2473_vm14, %v3415_v37, %v3414_v30  ;;  %v3424_v29 = vsel %vm881_vm10, %v3423_v4, %v3422_v0  ;;  %v3434_v25 = vsel %vm879_vm9, %v7174_v13, %v3432_v5  ;;  %v3429_v32 = vrot.slane %v7079_v19, 1  ;;  %v5849_v13 = vld [vmem:[%s7673_s4 + $0x68] sm:$0xff]   ;;  %v5864_v58 = vld [vmem:[%s7674_s5 + $0x9c] sm:$0xff]   ;;  %v5877_v8 = vld [vmem:[%s7673_s4 + $0xd0] sm:$0xff]  }
 0x1e0   :  { %5428 = vmatpush3.bf16.msra.mxu0 %v2765_v63  ;;  %5444 = vmatpush3.bf16.msra.mxu1 %v2849_v53  ;;  %v3426_v51 = vsel %vm2467_vm13, %v3425_v6, %v3424_v29  ;;  %v2724_v22 = vpack.c.b16 %v2722_v43, %v2722_v43  ;;  %v7283_v7 = vsel %vm2461_vm12, %v3435_v54, %v3434_v25  ;;  %v2991_v14 = vsel %vm2537_vm6, %v5855_v3, 0  ;;  %v5869_v63 = vld [vmem:[%s7673_s4 + $0xb0] sm:$0xff]   ;;  %v5876_v39 = vld [vmem:[%s7674_s5 + $0xc8] sm:$0xff]   ;;  %v5879_v43 = vld [vmem:[%s7673_s4 + $0xd8] ss:$0 sps:$4 sm:$0x33]  }
 0x1e1   :  { %5449 = vmatprep.subr.bf16.mxu0 %v5845_v52  ;;  %5465 = vmatprep.subr.bf16.mxu1 %v5846_v42  ;;  %v3428_v45 = vsel %vm883_vm11, %v3427_v59, %v3426_v51  ;;  %v3087_v48 = vsel %vm2537_vm6, %v5856_v41, 0  ;;  %v2950_v55 = vpack.c.b16 %v7187_v44, %v7187_v44  ;;  %v5861_v44 = vld [vmem:[%s7673_s4 + $0x94] sm:$0xff]   ;;  %v3235_v60 = vsel %vm2537_vm6, %v5867_v28, 0  ;;  %v5882_v46 = vld [vmem:[%s7676_s7] sm:$0xff]   ;;  %v5884_v6 = vld [vmem:[%s7676_s7 + $0x8] sm:$0xff]  }
 0x1e2   :  { %v3430_v47 = vsel %vm2473_vm14, %v3429_v32, %v3428_v45  ;;  %v3331_v36 = vsel %vm2537_vm6, %v5868_v2, 0  ;;  %v3194_v53 = vpack.c.b16 %v7236_v12, %v7236_v12  ;;  %v5873_v12 = vld [vmem:[%s7673_s4 + $0xc0] sm:$0xff]   ;;  %v5878_v24 = vld [vmem:[%s7674_s5 + $0xd0] sm:$0xff]   ;;  %v5880_v16 = vld [vmem:[%s7674_s5 + $0xd8] ss:$0 sps:$4 sm:$0x33]  }
 0x1e3   :  { %5430 = vmatmul.mubr.msk.bf16.vlgmr.msra.gmra.mrb[8].mxu0 %vm2530_vm15, %v2724_v22  ;;  %5446 = vmatmul.mubr.msk.bf16.vlgmr.msra.gmra.mrb[8].mxu1 %vm2530_vm15, %v2724_v22  ;;  %v7294_v19 = vpack.c.b16 %v3430_v47, %v3416_v1  ;;  %v3479_v23 = vsel %vm2537_vm6, %v5879_v43, 0  ;;  %v3575_v37 = vsel %vm2537_vm6, %v5880_v16, 0  ;;  %v5945_v49 = vmov 0.0   ;;  %v5883_v4 = vld [vmem:[%s7676_s7 + $0x30] sm:$0xff]   ;;  %v5885_v30 = vld [vmem:[%s7676_s7 + $0x38] sm:$0xff]   ;;  %v5887_v59 = vld [vmem:[%s7676_s7 + $0x40] sm:$0xff]  }
 0x1e4   :  { %5450 = vmatpush3.bf16.msra.mxu0 %v5845_v52  ;;  %5461 = vmatprep.mubr.msk.bf16.mxu0 %vm2530_vm15, %v7182_v40  ;;  %v3438_v52 = vpack.c.b16 %v7283_v7, %v7283_v7  ;;  %vm5946_vm9 = vmmov 0   ;;  %v5886_v0 = vld [vmem:[%s7676_s7 + $0x10] sm:$0xff]   ;;  %v5888_v5 = vld [vmem:[%s7676_s7 + $0x18] sm:$0xff]   ;;  %v5889_v1 = vld [vmem:[%s7676_s7 + $0x48] sm:$0xff]   ;;  %vm3689_vm10 = vcmask 648192   ;;  %vm3855_vm11 = vcmask 654336  }
 0x1e5   :  { %5466 = vmatpush3.bf16.msra.mxu1 %v5846_v42  ;;  %5477 = vmatprep.mubr.msk.bf16.mxu1 %vm2530_vm15, %v7182_v40  ;;  %v5852_v40 = vld [vmem:[%s7674_s5 + $0x70] sm:$0xff]   ;;  %v5881_v42 = vld [vmem:[%s7676_s7 + $0x28] sm:$0xff]   ;;  %v5890_v29 = vld [vmem:[%s7676_s7 + $0x20] sm:$0xff]  }
 0x1e6   :  { %5451 = vmatprep.subr.bf16.mxu0 %v5847_v34  ;;  %5467 = vmatprep.subr.bf16.mxu1 %v5848_v11 }
 0x1e8   :  { %5452 = vmatpush3.bf16.msra.mxu0 %v5847_v34 }
 0x1e9   :  { %5468 = vmatpush3.bf16.msra.mxu1 %v5848_v11  ;;  %5453 = vmatprep.subr.bf16.mxu0 %v5849_v13 }
 0x1ea   :  { %5469 = vmatprep.subr.bf16.mxu1 %v5850_v15 }
 0x1ec   :  { %5454 = vmatpush3.bf16.msra.mxu0 %v5849_v13 }
 0x1ed   :  { %5470 = vmatpush3.bf16.msra.mxu1 %v5850_v15  ;;  %5455 = vmatprep.subr.bf16.mxu0 %v5851_v31 }
 0x1ee   :  { %5471 = vmatprep.subr.bf16.mxu1 %v5852_v40 }
 0x1f0   :  { %5456 = vmatpush3.bf16.msra.mxu0 %v5851_v31 }
 0x1f1   :  { %5472 = vmatpush3.bf16.msra.mxu1 %v5852_v40  ;;  %5457 = vmatprep.subr.bf16.mxu0 %v5853_v18 }
 0x1f2   :  { %5473 = vmatprep.subr.bf16.mxu1 %v5854_v38 }
 0x1f4   :  { %5458 = vmatpush3.bf16.msra.mxu0 %v5853_v18 }
 0x1f5   :  { %5474 = vmatpush3.bf16.msra.mxu1 %v5854_v38  ;;  %5751 = vmatprep.subr.msk.bf16.mxu0 %vm2537_vm6, %v5855_v3 }
 0x1f6   :  { %5752 = vmatprep.subr.msk.bf16.mxu1 %vm2537_vm6, %v5856_v41 }
 0x1f8   :  { %5460 = vmatpush3.bf16.msra.mxu0 %v2991_v14 }
 0x1f9   :  { %5476 = vmatpush3.bf16.msra.mxu1 %v3087_v48  ;;  %5481 = vmatprep.subr.bf16.mxu0 %v5857_v33 }
 0x1fa   :  { %5497 = vmatprep.subr.bf16.mxu1 %v5858_v10 }
 0x1fb   :  { %5462 = vmatmul.mubr.msk.bf16.vlgmr.msra.gmra.mrb[8].mxu0 %vm2530_vm15, %v2950_v55 }
 0x1fc   :  { %5478 = vmatmul.mubr.msk.bf16.vlgmr.msra.gmra.mrb[8].mxu1 %vm2530_vm15, %v2950_v55  ;;  %5482 = vmatpush3.bf16.msra.mxu0 %v5857_v33 }
 0x1fd   :  { %5493 = vmatprep.mubr.msk.bf16.mxu0 %vm2530_vm15, %v7241_v17  ;;  %5498 = vmatpush3.bf16.msra.mxu1 %v5858_v10 }
 0x1fe   :  { %5509 = vmatprep.mubr.msk.bf16.mxu1 %vm2530_vm15, %v7241_v17  ;;  %5483 = vmatprep.subr.bf16.mxu0 %v5859_v21  ;;  %v5871_v17 = vld [vmem:[%s7673_s4 + $0xb8] sm:$0xff]  }
 0x1ff   :  { %5499 = vmatprep.subr.bf16.mxu1 %v5860_v35 }
 0x200   :  { %5484 = vmatpush3.bf16.msra.mxu0 %v5859_v21 }
 0x201   :  { %5500 = vmatpush3.bf16.msra.mxu1 %v5860_v35  ;;  %5485 = vmatprep.subr.bf16.mxu0 %v5861_v44 }
 0x202   :  { %5501 = vmatprep.subr.bf16.mxu1 %v5862_v57 }
 0x204   :  { %5486 = vmatpush3.bf16.msra.mxu0 %v5861_v44 }
 0x205   :  { %5502 = vmatpush3.bf16.msra.mxu1 %v5862_v57  ;;  %5487 = vmatprep.subr.bf16.mxu0 %v5863_v9 }
 0x206   :  { %5503 = vmatprep.subr.bf16.mxu1 %v5864_v58 }
 0x208   :  { %5488 = vmatpush3.bf16.msra.mxu0 %v5863_v9 }
 0x209   :  { %5504 = vmatpush3.bf16.msra.mxu1 %v5864_v58  ;;  %5489 = vmatprep.subr.bf16.mxu0 %v5865_v20 }
 0x20a   :  { %5505 = vmatprep.subr.bf16.mxu1 %v5866_v56 }
 0x20c   :  { %5490 = vmatpush3.bf16.msra.mxu0 %v5865_v20 }
 0x20d   :  { %5506 = vmatpush3.bf16.msra.mxu1 %v5866_v56  ;;  %5753 = vmatprep.subr.msk.bf16.mxu0 %vm2537_vm6, %v5867_v28 }
 0x20e   :  { %5754 = vmatprep.subr.msk.bf16.mxu1 %vm2537_vm6, %v5868_v2 }
 0x210   :  { %5492 = vmatpush3.bf16.msra.mxu0 %v3235_v60 }
 0x211   :  { %5508 = vmatpush3.bf16.msra.mxu1 %v3331_v36  ;;  %5513 = vmatprep.subr.bf16.mxu0 %v5869_v63 }
 0x212   :  { %5529 = vmatprep.subr.bf16.mxu1 %v5870_v62 }
 0x213   :  { %5494 = vmatmul.mubr.msk.bf16.vlgmr.msra.gmra.mrb[8].mxu0 %vm2530_vm15, %v3194_v53 }
 0x214   :  { %5510 = vmatmul.mubr.msk.bf16.vlgmr.msra.gmra.mrb[8].mxu1 %vm2530_vm15, %v3194_v53  ;;  %5514 = vmatpush3.bf16.msra.mxu0 %v5869_v63 }
 0x215   :  { %5525 = vmatprep.mubr.msk.bf16.mxu0 %vm2530_vm15, %v7294_v19  ;;  %5530 = vmatpush3.bf16.msra.mxu1 %v5870_v62 }
 0x216   :  { %5541 = vmatprep.mubr.msk.bf16.mxu1 %vm2530_vm15, %v7294_v19  ;;  %5515 = vmatprep.subr.bf16.mxu0 %v5871_v17 }
 0x217   :  { %5531 = vmatprep.subr.bf16.mxu1 %v5872_v61 }
 0x218   :  { %5516 = vmatpush3.bf16.msra.mxu0 %v5871_v17 }
 0x219   :  { %5532 = vmatpush3.bf16.msra.mxu1 %v5872_v61  ;;  %5517 = vmatprep.subr.bf16.mxu0 %v5873_v12 }
 0x21a   :  { %5533 = vmatprep.subr.bf16.mxu1 %v5874_v27 }
 0x21c   :  { %5518 = vmatpush3.bf16.msra.mxu0 %v5873_v12 }
 0x21d   :  { %5534 = vmatpush3.bf16.msra.mxu1 %v5874_v27  ;;  %5519 = vmatprep.subr.bf16.mxu0 %v5875_v50 }
 0x21e   :  { %5535 = vmatprep.subr.bf16.mxu1 %v5876_v39 }
 0x220   :  { %5520 = vmatpush3.bf16.msra.mxu0 %v5875_v50 }
 0x221   :  { %5536 = vmatpush3.bf16.msra.mxu1 %v5876_v39  ;;  %5521 = vmatprep.subr.bf16.mxu0 %v5877_v8 }
 0x222   :  { %5537 = vmatprep.subr.bf16.mxu1 %v5878_v24 }
 0x224   :  { %5522 = vmatpush3.bf16.msra.mxu0 %v5877_v8 }
 0x225   :  { %5538 = vmatpush3.bf16.msra.mxu1 %v5878_v24  ;;  %5755 = vmatprep.subr.msk.bf16.mxu0 %vm2537_vm6, %v5879_v43  ;;  %v7488_v43 = vld [vmem:[%s7675_s6] ss:$0 sm:$0xff] }
 0x226   :  { %5756 = vmatprep.subr.msk.bf16.mxu1 %vm2537_vm6, %v5880_v16 }
 0x228   :  { %5524 = vmatpush3.bf16.msra.mxu0 %v3479_v23 }
 0x229   :  { %5540 = vmatpush3.bf16.msra.mxu1 %v3575_v37  ;;  %5545 = vmatprep.subr.bf16.mxu0 %v5945_v49 }
 0x22a   :  { %5559 = vmatprep.subr.bf16.mxu1 %v5945_v49 }
 0x22b   :  { %5526 = vmatmul.mubr.msk.bf16.vlgmr.msra.gmra.mrb[8].mxu0 %vm2530_vm15, %v3438_v52 }
 0x22c   :  { %5542 = vmatmul.mubr.msk.bf16.vlgmr.msra.gmra.mrb[8].mxu1 %vm2530_vm15, %v3438_v52  ;;  %5546 = vmatpush3.bf16.msra.mxu0 %v5881_v42 }
 0x22d   :  { %5560 = vmatpush3.bf16.msra.mxu1 %v5882_v46  ;;  %5547 = vmatprep.subr.bf16.mxu0 %v5945_v49 }
 0x22e   :  { %5561 = vmatprep.subr.bf16.mxu1 %v5945_v49  ;;  %5555 = vmatprep.mubr.msk.bf16.mxu0 %vm5946_vm9, %v5945_v49 }
 0x22f   :  { %5569 = vmatprep.mubr.msk.bf16.mxu1 %vm5946_vm9, %v5945_v49 }
 0x230   :  { %5548 = vmatpush3.bf16.msra.mxu0 %v5883_v4 }
 0x231   :  { %5562 = vmatpush3.bf16.msra.mxu1 %v5884_v6  ;;  %5549 = vmatprep.subr.bf16.mxu0 %v5945_v49 }
 0x232   :  { %5563 = vmatprep.subr.bf16.mxu1 %v5945_v49 }
 0x234   :  { %5550 = vmatpush3.bf16.msra.mxu0 %v5885_v30 }
 0x235   :  { %5564 = vmatpush3.bf16.msra.mxu1 %v5886_v0  ;;  %5551 = vmatprep.subr.bf16.mxu0 %v5945_v49 }
 0x236   :  { %5565 = vmatprep.subr.bf16.mxu1 %v5945_v49 }
 0x238   :  { %5552 = vmatpush3.bf16.msra.mxu0 %v5887_v59 }
 0x239   :  { %5566 = vmatpush3.bf16.msra.mxu1 %v5888_v5  ;;  %5553 = vmatprep.subr.bf16.mxu0 %v5945_v49 }
 0x23a   :  { %5567 = vmatprep.subr.bf16.mxu1 %v5945_v49 }
 0x23c   :  { %5554 = vmatpush3.bf16.msra.mxu0 %v5889_v1 }
 0x23d   :  { %5568 = vmatpush3.bf16.msra.mxu1 %v5890_v29  ;;  %5573 = vmatprep.subr.bf16.mxu0 %v5945_v49 }
 0x23e   :  { %5587 = vmatprep.subr.bf16.mxu1 %v5945_v49 }
 0x2fe   :  { %v5527_v25 = vpop.f32.mrb[8].mxu0 }
 0x2ff   :  { %v5543_v54 = vpop.f32.mrb[8].mxu1  ;;  %v3515_v51 = vpop.f32.mrb[9].mxu0 }
 0x300   :  { %v3633_v32 = vmax.f32 %v5527_v25, %v5543_v54  ;;  %v3611_v22 = vpop.f32.mrb[9].mxu1  ;;  %v5528_v45 = vpop.f32.mrb[10].mxu0 }
 0x301   :  { %v3631_v7 = vmax.f32 %v3515_v51, %v3611_v22  ;;  %v5544_v34 = vpop.f32.mrb[10].mxu1  ;;  %v3518_v11 = vpop.f32.mrb[11].mxu0 }
 0x302   :  { %v3677_v47 = vrot.slane %v3633_v32, %v6069_v26  ;;  %v3614_v19 = vpop.f32.mrb[11].mxu1 }
 0x303   :  { %v3637_v13 = vcombine.high %v3631_v7, %v3631_v7  ;;  %v3644_v15 = vrot.slane %v3631_v7, %v6069_v26  ;;  %v3632_v31 = vmax.f32 %v3518_v11, %v3614_v19 }
 0x304   :  { %v3678_v40 = vcombine.high %v3677_v47, %v3677_v47  ;;  %v3746_v18 = vsel %vm3689_vm10, %v3677_v47, -inf }
 0x305   :  { %v3747_v38 = vrot.slane %v3746_v18, 4  ;;  %v3651_v3 = vrot.slane %v3637_v13, %v6069_v26  ;;  %v3652_v41 = vcombine.high %v3644_v15, %v3644_v15  ;;  %v3690_v14 = vsel %vm3689_vm10, %v3644_v15, -inf }
 0x306   :  { %v3753_v33 = vsel %vm3689_vm10, %v3678_v40, -inf  ;;  %v3691_v48 = vrot.slane %v3690_v14, 4  ;;  %v3661_v10 = vrot.slane %v3632_v31, %v6069_v26  ;;  %v3654_v46 = vcombine.high %v3632_v31, %v3632_v31 }
 0x307   :  { %v3748_v55 = vmax.f32 %v3746_v18, %v3747_v38  ;;  %v3754_v21 = vrot.slane %v3753_v33, 4  ;;  %v3653_v35 = vcombine.high %v3651_v3, %v3651_v3  ;;  %v3697_v44 = vsel %vm3689_vm10, %v3652_v41, -inf }
 0x308   :  { %v3692_v57 = vmax.f32 %v3690_v14, %v3691_v48  ;;  %v3698_v9 = vrot.slane %v3697_v44, 4  ;;  %v3704_v58 = vsel %vm3689_vm10, %v3651_v3, -inf  ;;  %v3669_v36 = vcombine.high %v3661_v10, %v3661_v10 }
 0x309   :  { %v3749_v20 = vrot.slane %v3748_v55, 2  ;;  %v3755_v56 = vmax.f32 %v3753_v33, %v3754_v21  ;;  %v3705_v28 = vrot.slane %v3704_v58, 4  ;;  %v3711_v2 = vsel %vm3689_vm10, %v3653_v35, -inf }
 0x30a   :  { %v3693_v60 = vrot.slane %v3692_v57, 2  ;;  %v3712_v63 = vrot.slane %v3711_v2, 4  ;;  %v3699_v61 = vmax.f32 %v3697_v44, %v3698_v9  ;;  %v3718_v27 = vsel %vm3689_vm10, %v3661_v10, -inf }
 0x30b   :  { %v3750_v62 = vmax.f32 %v3748_v55, %v3749_v20  ;;  %v3756_v53 = vrot.slane %v3755_v56, 2  ;;  %v3706_v8 = vmax.f32 %v3704_v58, %v3705_v28  ;;  %v3719_v24 = vrot.slane %v3718_v27, 4 }
 0x30c   :  { %v3694_v17 = vmax.f32 %v3692_v57, %v3693_v60  ;;  %v3713_v12 = vmax.f32 %v3711_v2, %v3712_v63  ;;  %v3725_v37 = vsel %vm3689_vm10, %v3669_v36, -inf  ;;  %v3700_v6 = vrot.slane %v3699_v61, 2 }
 0x30d   :  { %v3751_v50 = vrot.slane %v3750_v62, 1  ;;  %v3757_v39 = vmax.f32 %v3755_v56, %v3756_v53  ;;  %v3720_v4 = vmax.f32 %v3718_v27, %v3719_v24  ;;  %v3726_v0 = vrot.slane %v3725_v37, 4 }
 0x30e   :  { %v3695_v16 = vrot.slane %v3694_v17, 1  ;;  %v3714_v23 = vrot.slane %v3713_v12, 2  ;;  %v3707_v1 = vrot.slane %v3706_v8, 2  ;;  %v3668_v45 = vrot.slane %v3654_v46, %v6069_v26 }
 0x30f   :  { %v3752_v52 = vmax.f32 %v3750_v62, %v3751_v50  ;;  %v3758_v42 = vrot.slane %v3757_v39, 1  ;;  %v3721_v29 = vrot.slane %v3720_v4, 2  ;;  %v3727_v51 = vmax.f32 %v3725_v37, %v3726_v0 }
 0x310   :  { %v3715_v30 = vmax.f32 %v3713_v12, %v3714_v23  ;;  %v3696_v25 = vmax.f32 %v3694_v17, %v3695_v16  ;;  %v3701_v34 = vmax.f32 %v3699_v61, %v3700_v6  ;;  %v3708_v15 = vmax.f32 %v3706_v8, %v3707_v1 }
 0x311   :  { %v3759_v59 = vmax.f32 %v3757_v39, %v3758_v42  ;;  %v3775_v5 = vadd.f32 %v7488_v43, %v3752_v52  ;;  %v3722_v7 = vmax.f32 %v3720_v4, %v3721_v29  ;;  %v3728_v47 = vrot.slane %v3727_v51, 2 }
 0x312   :  { %v3716_v54 = vrot.slane %v3715_v30, 1  ;;  %v3767_v40 = vadd.f32 %v7488_v43, %v3696_v25  ;;  %v3670_v14 = vcombine.high %v3668_v45, %v3668_v45  ;;  %v3702_v26 = vrot.slane %v3701_v34, 1 }
 0x313   :  { %v3776_v32 = vadd.f32 %v7488_v43, %v3759_v59  ;;  %v3785_v22 = vmax.f32 %v3775_v5, 0.0  ;;  %v3723_v31 = vrot.slane %v3722_v7, 1  ;;  %v3729_v38 = vmax.f32 %v3727_v51, %v3728_v47 }
 0x314   :  { %v3717_v11 = vmax.f32 %v3715_v30, %v3716_v54  ;;  %v3709_v55 = vrot.slane %v3708_v15, 1  ;;  %v3732_v21 = vsel %vm3689_vm10, %v3668_v45, -inf  ;;  %v3777_v35 = vmax.f32 %v3767_v40, 0.0 }
 0x315   :  { %v3786_v19 = vmax.f32 %v3776_v32, 0.0  ;;  %v3795_v13 = vpack.c.bf16 %v3785_v22, %v3785_v22  ;;  %v3724_v33 = vmax.f32 %v3722_v7, %v3723_v31  ;;  %v3730_v10 = vrot.slane %v3729_v38, 1  ;;  %v5892_v22 = vld [vmem:[%s7676_s7 + $0x78] sm:$0xff]  }
 0x316   :  { %v3770_v18 = vadd.f32 %v7488_v43, %v3717_v11  ;;  %v3733_v9 = vrot.slane %v3732_v21, 4  ;;  %v3739_v56 = vsel %vm3689_vm10, %v3670_v14, -inf  ;;  %v3703_v62 = vmax.f32 %v3701_v34, %v3702_v26 }
 0x317   :  { %v3796_v3 = vpack.c.bf16 %v3786_v19, %v3786_v19  ;;  %v4085_v41 = vunpack.c.l.b16 %v3795_v13  ;;  %v3731_v57 = vmax.f32 %v3729_v38, %v3730_v10  ;;  %v3771_v28 = vadd.f32 %v7488_v43, %v3724_v33 }
 0x318   :  { %v3780_v48 = vmax.f32 %v3770_v18, 0.0  ;;  %v3734_v2 = vmax.f32 %v3732_v21, %v3733_v9  ;;  %v3740_v60 = vrot.slane %v3739_v56, 4  ;;  %v3710_v39 = vmax.f32 %v3708_v15, %v3709_v55  ;;  %v5894_v15 = vld [vmem:[%s7676_s7 + $0x80] sm:$0xff]   ;;  %v5898_v55 = vld [vmem:[%s7676_s7 + $0x90] sm:$0xff]  }
 0x319   :  { %v4086_v58 = vrot.slane %v4085_v41, 7  ;;  %v4177_v20 = vunpack.c.l.b16 %v3796_v3  ;;  %v3772_v63 = vadd.f32 %v7488_v43, %v3731_v57  ;;  %v3781_v53 = vmax.f32 %v3771_v28, 0.0  ;;  %v5896_v41 = vld [vmem:[%s7676_s7 + $0x88] sm:$0xff]   ;;  %v5895_v57 = vld [vmem:[%s7676_s7 + $0x60] sm:$0xff]  }
 0x31a   :  { %v3790_v44 = vpack.c.bf16 %v3780_v48, %v3780_v48  ;;  %v3735_v17 = vrot.slane %v3734_v2, 2  ;;  %v3741_v61 = vmax.f32 %v3739_v56, %v3740_v60  ;;  %v3787_v24 = vpack.c.bf16 %v3777_v35, %v3777_v35  ;;  %v5891_v48 = vld [vmem:[%s7676_s7 + $0x50] sm:$0xff]   ;;  %v5893_v35 = vld [vmem:[%s7676_s7 + $0x58] sm:$0xff]   ;;  %v5901_v56 = vld [vmem:[%s7676_s7 + $0xa0] sm:$0xff]  }
 0x31b   :  { %v3782_v12 = vmax.f32 %v3772_v63, 0.0  ;;  %v4178_v50 = vrot.slane %v4177_v20, 7  ;;  %v3791_v8 = vpack.c.bf16 %v3781_v53, %v3781_v53  ;;  %v3768_v42 = vadd.f32 %v7488_v43, %v3703_v62  ;;  %v5899_v20 = vld [vmem:[%s7676_s7 + $0x70] sm:$0xff]   ;;  %v5904_v63 = vld [vmem:[%s7676_s7 + $0xb8] sm:$0xff]   ;;  %v5906_v53 = vld [vmem:[%s7678_s9] sm:$0xff]  }
 0x31c   :  { %v4084_v36 = vunpack.c.l.b16 %v3790_v44  ;;  %v3736_v16 = vmax.f32 %v3734_v2, %v3735_v17  ;;  %v3742_v23 = vrot.slane %v3741_v61, 2  ;;  %v3769_v30 = vadd.f32 %v7488_v43, %v3710_v39  ;;  %v5900_v44 = vld [vmem:[%s7676_s7 + $0x98] sm:$0xff]   ;;  %v5902_v2 = vld [vmem:[%s7676_s7 + $0xa8] sm:$0xff]   ;;  %v5903_v60 = vld [vmem:[%s7676_s7 + $0xb0] sm:$0xff]  }
 0x31d   :  { %v3792_v37 = vpack.c.bf16 %v3782_v12, %v3782_v12  ;;  %v4176_v52 = vunpack.c.l.b16 %v3791_v8  ;;  %v3901_v59 = vunpack.c.l.b16 %v3787_v24  ;;  %v3778_v25 = vmax.f32 %v3768_v42, 0.0  ;;  %v5907_v17 = vld [vmem:[%s7678_s9 + $0x8] sm:$0xff]   ;;  %v5909_v12 = vld [vmem:[%s7678_s9 + $0x18] sm:$0xff]   ;;  %v5912_v39 = vld [vmem:[%s7678_s9 + $0x30] sm:$0xff]  }
 0x31e   :  { %v7501_v27 = vsel %vm2455_vm8, %v4086_v58, %v4084_v36  ;;  %v3737_v46 = vrot.slane %v3736_v16, 1  ;;  %v3743_v4 = vmax.f32 %v3741_v61, %v3742_v23  ;;  %v3779_v7 = vmax.f32 %v3769_v30, 0.0  ;;  %v5897_v58 = vld [vmem:[%s7676_s7 + $0x68] sm:$0xff]   ;;  %v5905_v36 = vld [vmem:[%s7676_s7 + $0xc0] sm:$0xff]   ;;  %v5908_v61 = vld [vmem:[%s7678_s9 + $0x10] sm:$0xff]  }
 0x31f   :  { %v3902_v6 = vunpack.c.l.b16 %v3792_v37  ;;  %v7506_v0 = vsel %vm2455_vm8, %v4178_v50, %v4176_v52  ;;  %v3788_v47 = vpack.c.bf16 %v3778_v25, %v3778_v25  ;;  %v4088_v9 = vpack.c.b16 %v7501_v27, %v7501_v27  ;;  %v5910_v27 = vld [vmem:[%s7678_s9 + $0x20] sm:$0xff]   ;;  %v5911_v50 = vld [vmem:[%s7678_s9 + $0x28] sm:$0xff]   ;;  %v5913_v8 = vld [vmem:[%s7678_s9 + $0x38] ss:$0 sps:$4 sm:$0xff]  }
 0x320   :  { %v3738_v5 = vmax.f32 %v3736_v16, %v3737_v46  ;;  %v3744_v1 = vrot.slane %v3743_v4, 1  ;;  %v3789_v31 = vpack.c.bf16 %v3779_v7, %v3779_v7  ;;  %v4180_v62 = vpack.c.b16 %v7506_v0, %v7506_v0  ;;  %v5914_v24 = vld [vmem:[%s7680_s11] sm:$0xff]   ;;  %v5915_v23 = vld [vmem:[%s7680_s11 + $0x8] sm:$0xff]   ;;  %v5916_v37 = vld [vmem:[%s7680_s11 + $0x10] sm:$0xff]  }
 0x321   :  { %v3903_v29 = vrot.slane %v3902_v6, 7  ;;  %v4338_v16 = vsel %vm4336_vm0, %v5913_v8, 0  ;;  %v5917_v52 = vld [vmem:[%s7680_s11 + $0x18] sm:$0xff]  }
 0x322   :  { %v3745_v54 = vmax.f32 %v3743_v4, %v3744_v1  ;;  %v3773_v51 = vadd.f32 %v7488_v43, %v3738_v5  ;;  %v3992_v14 = vunpack.c.l.b16 %v3789_v31 }
 0x323   :  { %v3904_v32 = vsel %vm2455_vm8, %v3903_v29, %v3901_v59 }
 0x324   :  { %v3905_v45 = vpack.c.b16 %v3904_v32, %v3904_v32  ;;  %v3774_v34 = vadd.f32 %v7488_v43, %v3745_v54  ;;  %v3783_v11 = vmax.f32 %v3773_v51, 0.0  ;;  %v3820_v43 = vunpack.c.l.b16 %v3788_v47 }
 0x326   :  { %5570 = vmatmul.mubr.msk.bf16.vlgmr.msra.gmra.mrb[12].mxu1 %vm3855_vm11, %v3905_v45  ;;  %v3784_v19 = vmax.f32 %v3774_v34, 0.0  ;;  %v3793_v13 = vpack.c.bf16 %v3783_v11, %v3783_v11 }
 0x327   :  { %5588 = vmatpush3.bf16.msra.mxu1 %v5892_v22  ;;  %5597 = vmatprep.mubr.msk.bf16.mxu1 %vm5946_vm9, %v5945_v49 }
 0x328   :  { %5589 = vmatprep.subr.bf16.mxu1 %v5945_v49  ;;  %v3794_v40 = vpack.c.bf16 %v3784_v19, %v3784_v19  ;;  %v3821_v18 = vunpack.c.l.b16 %v3793_v13  ;;  %v4940_v19 = vld [vmem:[%s7677_s8] ss:$0 sm:$0xff] }
 0x32a   :  { %v3822_v38 = vrot.slane %v3821_v18, 7  ;;  %v3993_v3 = vunpack.c.l.b16 %v3794_v40 }
 0x32b   :  { %5590 = vmatpush3.bf16.msra.mxu1 %v5894_v15 }
 0x32c   :  { %5591 = vmatprep.subr.bf16.mxu1 %v5945_v49  ;;  %v3823_v33 = vsel %vm2455_vm8, %v3822_v38, %v3820_v43  ;;  %v3994_v10 = vrot.slane %v3993_v3, 7  ;;  %v5918_v3 = vld [vmem:[%s7680_s11 + $0x20] sm:$0xff]  }
 0x32d   :  { %v3824_v26 = vpack.c.b16 %v3823_v33, %v3823_v33  ;;  %v4941_v33 = vld [vmem:[%s7679_s10] ss:$0 sm:$0xff]  ;;  %s5920_s10 = scalar_lea.vmem %s4488_s22, 32 }
 0x32e   :  { %v3995_v21 = vsel %vm2455_vm8, %v3994_v10, %v3992_v14  ;;  %p5921_p0 = scmp.ne.s32.totalorder %s4488_s22, %s5920_s10  ;;  %p5926_p2 = scmp.lt.s32.totalorder %s5920_s10, %s5920_s10 }
 0x32f   :  { %5592 = vmatpush3.bf16.msra.mxu1 %v5896_v41  ;;  %5556 = vmatmul.mubr.msk.bf16.vlgmr.msra.gmra.mrb[12].mxu0 %vm3855_vm11, %v3824_v26  ;;  %v3996_v28 = vpack.c.b16 %v3995_v21, %v3995_v21  ;;  %v5919_v41 = vld [vmem:[%s7680_s11 + $0x28] ss:$0 sps:$4 sm:$0x33]  }
 0x330   :  { %5593 = vmatprep.subr.bf16.mxu1 %v5945_v49  ;;  %5574 = vmatpush3.bf16.msra.mxu0 %v5891_v48  ;;  %v4437_v14 = vsel %vm2537_vm6, %v5919_v41, 0  ;;  %p5927_p3 = por %p5926_p2, %p5925_p1 }
 0x331   :  { %5583 = vmatprep.mubr.msk.bf16.mxu0 %vm5946_vm9, %v5945_v49  ;;  %5575 = vmatprep.subr.bf16.mxu0 %v5945_v49 }
 0x332   :  { %p5928_p4 = pnand %p5927_p3, %p5921_p0 }
 0x333   :  { %5594 = vmatpush3.bf16.msra.mxu1 %v5898_v55 }
 0x334   :  { %5595 = vmatprep.subr.bf16.mxu1 %v5945_v49  ;;  %5576 = vmatpush3.bf16.msra.mxu0 %v5893_v35 }
 0x335   :  { %5577 = vmatprep.subr.bf16.mxu0 %v5945_v49 }
 0x337   :  { %5596 = vmatpush3.bf16.msra.mxu1 %v5900_v44 }
 0x338   :  { %5615 = vmatprep.subr.bf16.mxu1 %v5945_v49  ;;  %5578 = vmatpush3.bf16.msra.mxu0 %v5895_v57 }
 0x339   :  { %5579 = vmatprep.subr.bf16.mxu0 %v5945_v49 }
 0x33a   :  { %5598 = vmatmul.mubr.msk.bf16.vlgmr.msra.gmra.mrb[16].mxu1 %vm3855_vm11, %v4088_v9 }
 0x33b   :  { %5631 = vmatprep.mubr.msk.bf16.mxu1 %vm5946_vm9, %v5945_v49  ;;  %5616 = vmatpush3.bf16.msra.mxu1 %v5906_v53 }
 0x33c   :  { %5580 = vmatpush3.bf16.msra.mxu0 %v5897_v58  ;;  %5617 = vmatprep.subr.bf16.mxu1 %v5945_v49 }
 0x33d   :  { %5581 = vmatprep.subr.bf16.mxu0 %v5945_v49 }
 0x33f   :  { %5618 = vmatpush3.bf16.msra.mxu1 %v5907_v17 }
 0x340   :  { %5582 = vmatpush3.bf16.msra.mxu0 %v5899_v20  ;;  %5619 = vmatprep.subr.bf16.mxu1 %v5945_v49 }
 0x341   :  { %5601 = vmatprep.subr.bf16.mxu0 %v5945_v49 }
 0x343   :  { %5584 = vmatmul.mubr.msk.bf16.vlgmr.msra.gmra.mrb[16].mxu0 %vm3855_vm11, %v3996_v28  ;;  %5620 = vmatpush3.bf16.msra.mxu1 %v5908_v61 }
 0x344   :  { %5602 = vmatpush3.bf16.msra.mxu0 %v5901_v56  ;;  %5611 = vmatprep.mubr.msk.bf16.mxu0 %vm5946_vm9, %v5945_v49 }
 0x345   :  { %5603 = vmatprep.subr.bf16.mxu0 %v5945_v49  ;;  %5621 = vmatprep.subr.bf16.mxu1 %v5945_v49 }
 0x347   :  { %5622 = vmatpush3.bf16.msra.mxu1 %v5909_v12 }
 0x348   :  { %5604 = vmatpush3.bf16.msra.mxu0 %v5902_v2  ;;  %5623 = vmatprep.subr.bf16.mxu1 %v5945_v49 }
 0x349   :  { %5605 = vmatprep.subr.bf16.mxu0 %v5945_v49 }
 0x34b   :  { %5624 = vmatpush3.bf16.msra.mxu1 %v5910_v27 }
 0x34c   :  { %5606 = vmatpush3.bf16.msra.mxu0 %v5903_v60  ;;  %5625 = vmatprep.subr.bf16.mxu1 %v5945_v49 }
 0x34d   :  { %5607 = vmatprep.subr.bf16.mxu0 %v5945_v49 }
 0x34f   :  { %5626 = vmatpush3.bf16.msra.mxu1 %v5911_v50 }
 0x350   :  { %5608 = vmatpush3.bf16.msra.mxu0 %v5904_v63  ;;  %5627 = vmatprep.subr.bf16.mxu1 %v5945_v49 }
 0x351   :  { %5609 = vmatprep.subr.bf16.mxu0 %v5945_v49 }
 0x353   :  { %5628 = vmatpush3.bf16.msra.mxu1 %v5912_v39 }
 0x354   :  { %5610 = vmatpush3.bf16.msra.mxu0 %v5905_v36  ;;  %5629 = vmatprep.subr.bf16.mxu1 %v5945_v49 }
 0x355   :  { %5635 = vmatprep.subr.bf16.mxu0 %v5945_v49 }
 0x357   :  { %5612 = vmatmul.mubr.msk.bf16.vlgmr.msra.gmra.mrb[20].mxu0 %vm3855_vm11, %v4180_v62  ;;  %5630 = vmatpush3.bf16.msra.mxu1 %v4338_v16 }
 0x358   :  { %5647 = vmatprep.mubr.msk.bf16.mxu0 %vm5946_vm9, %v5945_v49  ;;  %5636 = vmatpush3.bf16.msra.mxu0 %v5914_v24 }
 0x359   :  { %5637 = vmatprep.subr.bf16.mxu0 %v5945_v49 }
 0x35c   :  { %5638 = vmatpush3.bf16.msra.mxu0 %v5915_v23 }
 0x35d   :  { %5639 = vmatprep.subr.bf16.mxu0 %v5945_v49 }
 0x360   :  { %5640 = vmatpush3.bf16.msra.mxu0 %v5916_v37 }
 0x361   :  { %5641 = vmatprep.subr.bf16.mxu0 %v5945_v49 }
 0x364   :  { %5642 = vmatpush3.bf16.msra.mxu0 %v5917_v52 }
 0x365   :  { %5643 = vmatprep.subr.bf16.mxu0 %v5945_v49 }
 0x368   :  { %5644 = vmatpush3.bf16.msra.mxu0 %v5918_v3 }
 0x369   :  { %5645 = vmatprep.subr.bf16.mxu0 %v5945_v49  ;;  %v4951_v49 = vld [vmem:[%s7681_s12] ss:$0 sm:$0xff] }
 0x36c   :  { %5646 = vmatpush3.bf16.msra.mxu0 %v4437_v14 }
 0x3f9   :  { %v3973_v42 = vpop.f32.mrb[12].mxu1 }
 0x3fa   :  { %v5571_v46 = vpop.f32.mrb[13].mxu1 }
 0x3fb   :  { %v3976_v4 = vpop.f32.mrb[14].mxu1 }
 0x3fc   :  { %v5572_v6 = vpop.f32.mrb[15].mxu1 }
 0x402   :  { %v3893_v30 = vpop.f32.mrb[12].mxu0 }
 0x403   :  { %v3974_v0 = vadd.f32 %v3973_v42, %v3893_v30  ;;  %v5557_v59 = vpop.f32.mrb[13].mxu0 }
 0x404   :  { %v3896_v5 = vpop.f32.mrb[14].mxu0 }
 0x405   :  { %v5558_v1 = vpop.f32.mrb[15].mxu0 }
 0x40d   :  { %v4156_v29 = vpop.f32.mrb[16].mxu1 }
 0x40e   :  { %v5599_v25 = vpop.f32.mrb[17].mxu1 }
 0x40f   :  { %v4159_v54 = vpop.f32.mrb[18].mxu1 }
 0x410   :  { %v5600_v51 = vpop.f32.mrb[19].mxu1 }
 0x416   :  { %v4064_v32 = vpop.f32.mrb[16].mxu0 }
 0x417   :  { %v4070_v22 = vadd.f32 %v4064_v32, %v3974_v0  ;;  %v5585_v45 = vpop.f32.mrb[17].mxu0 }
 0x418   :  { %v4067_v7 = vpop.f32.mrb[18].mxu0 }
 0x419   :  { %v4162_v34 = vadd.f32 %v4156_v29, %v4070_v22  ;;  %v5586_v11 = vpop.f32.mrb[19].mxu0 }
 0x42a   :  { %v4248_v47 = vpop.f32.mrb[20].mxu0 }
 0x42b   :  { %v4254_v13 = vadd.f32 %v4248_v47, %v4162_v34  ;;  %v5613_v15 = vpop.f32.mrb[21].mxu0 }
 0x42c   :  { %v4251_v31 = vpop.f32.mrb[22].mxu0 }
 0x42d   :  { %v4262_v40 = vadd.f32 %v4940_v19, %v4254_v13  ;;  %v5614_v18 = vpop.f32.mrb[23].mxu0 }
 0x42f   :  { %v4263_v43 = vmax.f32 %v4262_v40, 0.0 }
 0x431   :  { %v4264_v38 = vpack.c.bf16 %v4263_v43, %v4263_v43 }
 0x433   :  { %5632 = vmatmul.mubr.msk.bf16.vlgmr.msra.gmra.mrb[20].mxu1 %vm4332_vm1, %v4264_v38 }
 0x506   :  { %v4374_v48 = vpop.f32.mrb[20].mxu1 }
 0x507   :  { %v4375_v10 = vadd.f32 %v4941_v33, %v4374_v48  ;;  %v5633_v26 = vpop.f32.mrb[21].mxu1 }
 0x508   :  { %v4377_v55 = vpop.f32.mrb[22].mxu1 }
 0x509   :  { %v4380_v21 = vmax.f32 %v4375_v10, 0.0  ;;  %v5634_v35 = vpop.f32.mrb[23].mxu1 }
 0x50b   :  { %v4381_v44 = vpack.c.bf16 %v4380_v21, %v4380_v21 }
 0x50d   :  { %5648 = vmatmul.mubr.msk.bf16.vlgmr.msra.gmra.mrb[24].mxu0 %vm2530_vm15, %v4381_v44 }
 0x5e0   :  { %v4473_v57 = vpop.f32.mrb[24].mxu0 }
 0x5e1   :  { %v4474_v9 = vadd.f32 %v4951_v49, %v4473_v57  ;;  %v5649_v58 = vpop.f32.mrb[25].mxu0 }
 0x5e2   :  { %v4476_v20 = vpop.f32.mrb[26].mxu0 }
 0x5e3   :  { %v5650_v56 = vpop.f32.mrb[27].mxu0  ;;  %4480 = vst.msk [vmem:[#allocation2] sm:$0x3] %vm4479_vm2, %v4474_v9 }
 0x5e4   :  { %5931 = shalt.err (!%p5928_p4)
}
 0x5e5   :  { %s5932_s12 = scalar_lea.hbm %s7682_s13, 32 }
 0x5e6   :  { %p5933_p5 = scmp.ne.s32.totalorder %s7682_s13, %s5932_s12  ;;  %p5936_p6 = scmp.lt.u32.totalorder %s5932_s12, %s7682_s13 }
 0x5e8   :  { %p5938_p7 = pnand %p5936_p6, %p5933_p5 }
 0x5ea   :  { %5941 = shalt.err (!%p5938_p7)
}
 0x5eb   :  { %4490 = dma.vmem_to_hbm [thread:$0]  %s4488_s22, 32, %s7682_s13, [#allocation3]  }
 0x5ec   :  { %5942 = dma.done.wait [#allocation3], 32  }
 0x5ed   :  { %5943 = vsyncadd [#allocation3], 4294967264 }
 0x5ee   :  { %4494 = vsyncpa [#allocation3], 1 }

</bundles_post_ra>
